<compile_context>
chip_gen: v7x
topology: tpu7x:2x2x1
jax: 0.10.0
libtpu: 0.0.40
codegen_flags: <defaults>
</compile_context>

<pallas_src>
import functools

import jax
import jax.numpy as jnp
from jax.experimental import pallas as pl
from jax.experimental.pallas import tpu as pltpu


def _round_up(x, m):
    return (x + m - 1) // m * m


# ---------------------------------------------------------------------------
# Kernel 1: fused MaxPool2d(2) + 3x3 conv (single K = 9*Cin_pad matmul) + BN
# batch-statistic partials.
#   xe_ref/xo_ref : (1, Ho, 2, Wo, Cin_pad) bf16   even/odd-column views
#   w_ref         : (9*Cin_pad, Cout_pad)   bf16   folded weight (resident)
#   y_ref         : (1, Ho*Wo, Cout_pad)    bf16   conv output (lane-dense)
#   sum/sq_ref    : (1, 1, Cout_pad)        f32    per-image BN partials
# ---------------------------------------------------------------------------
def _pool_conv1_kernel(xe_ref, xo_ref, w_ref, y_ref, sum_ref, sq_ref,
                       xpad_ref, *, Ho, Wo):
    cin_p = xe_ref.shape[4]
    hw = Ho * Wo

    # 2x2 max pool: only leading-axis indexing (free) + elementwise max (VPU).
    p0 = jnp.maximum(xe_ref[0, :, 0, :, :], xe_ref[0, :, 1, :, :])
    p1 = jnp.maximum(xo_ref[0, :, 0, :, :], xo_ref[0, :, 1, :, :])
    pooled = jnp.maximum(p0, p1)                       # (Ho, Wo, Cin_pad) bf16

    # Zero-padded (+1 halo) copy in VMEM, then cheap im2col (9*Cin_pad lanes).
    xpad_ref[...] = jnp.zeros(xpad_ref.shape, xpad_ref.dtype)
    xpad_ref[1:Ho + 1, 1:Wo + 1, :] = pooled

    cols = []
    for dy in range(3):
        for dx in range(3):
            cols.append(xpad_ref[dy:dy + Ho, dx:dx + Wo, :].reshape(hw, cin_p))
    lhs = jnp.concatenate(cols, axis=-1)               # (hw, 9*Cin_pad) bf16

    acc = jnp.dot(lhs, w_ref[...], preferred_element_type=jnp.float32)

    y_ref[0] = acc.astype(y_ref.dtype)
    sum_ref[0] = jnp.sum(acc, axis=0, keepdims=True)
    sq_ref[0] = jnp.sum(acc * acc, axis=0, keepdims=True)


def pool_conv1_bnstats(xe, xo, w_folded, Ho, Wo):
    n = xe.shape[0]
    cin_p = xe.shape[4]
    cp = w_folded.shape[1]
    hw = Ho * Wo
    kernel = functools.partial(_pool_conv1_kernel, Ho=Ho, Wo=Wo)
    return pl.pallas_call(
        kernel,
        out_shape=(
            jax.ShapeDtypeStruct((n, hw, cp), jnp.bfloat16),
            jax.ShapeDtypeStruct((n, 1, cp), jnp.float32),
            jax.ShapeDtypeStruct((n, 1, cp), jnp.float32),
        ),
        grid=(n,),
        in_specs=[
            pl.BlockSpec((1, Ho, 2, Wo, cin_p), lambda i: (i, 0, 0, 0, 0)),
            pl.BlockSpec((1, Ho, 2, Wo, cin_p), lambda i: (i, 0, 0, 0, 0)),
            # Constant index_map -> weight DMA'd once, resident across the grid.
            pl.BlockSpec((9 * cin_p, cp), lambda i: (0, 0)),
        ],
        out_specs=(
            pl.BlockSpec((1, hw, cp), lambda i: (i, 0, 0)),
            pl.BlockSpec((1, 1, cp), lambda i: (i, 0, 0)),
            pl.BlockSpec((1, 1, cp), lambda i: (i, 0, 0)),
        ),
        scratch_shapes=[pltpu.VMEM((Ho + 2, Wo + 2, cin_p), jnp.bfloat16)],
        compiler_params=pltpu.CompilerParams(dimension_semantics=("parallel",)),
    )(xe, xo, w_folded)


# ---------------------------------------------------------------------------
# Kernel 2: 3x3 conv (dy-grouped K = 3*Cin_pad matmuls) + BN partials.
#   x_ref : (1, H+2, W+2, Cin_pad)       bf16  zero-padded NHWC activation
#   w_ref : (3, 3*Cin_pad, Cout_pad)     bf16  folded weight (resident)
#   y_ref : (1, H*W, Cout_pad)           bf16
#   acc_ref / lhs_ref                    VMEM scratch (f32 acc / bf16 LHS)
# ---------------------------------------------------------------------------
def _conv3x3_kernel(x_ref, w_ref, y_ref, sum_ref, sq_ref, acc_ref, lhs_ref,
                    *, H, W):
    cp = x_ref.shape[3]
    hw = H * W

    for dy in range(3):   # unrolled: 3 MXU matmuls of K = 3*Cin_pad
        for dx in range(3):
            # Lane-aligned staging store (offsets are multiples of Cin_pad=128).
            lhs_ref[:, dx * cp:(dx + 1) * cp] = (
                x_ref[0, dy:dy + H, dx:dx + W, :].reshape(hw, cp))
        contrib = jnp.dot(lhs_ref[...], w_ref[dy],
                          preferred_element_type=jnp.float32)
        if dy == 0:
            acc_ref[...] = contrib
        else:
            acc_ref[...] += contrib

    acc = acc_ref[...]
    y_ref[0] = acc.astype(y_ref.dtype)
    sum_ref[0] = jnp.sum(acc, axis=0, keepdims=True)
    sq_ref[0] = jnp.sum(acc * acc, axis=0, keepdims=True)


def conv3x3_bnstats(x_padded, w_folded, H, W):
    n = x_padded.shape[0]
    cp = x_padded.shape[3]
    cout_p = w_folded.shape[2]
    hw = H * W
    kernel = functools.partial(_conv3x3_kernel, H=H, W=W)
    return pl.pallas_call(
        kernel,
        out_shape=(
            jax.ShapeDtypeStruct((n, hw, cout_p), jnp.bfloat16),
            jax.ShapeDtypeStruct((n, 1, cout_p), jnp.float32),
            jax.ShapeDtypeStruct((n, 1, cout_p), jnp.float32),
        ),
        grid=(n,),
        in_specs=[
            pl.BlockSpec((1, H + 2, W + 2, cp), lambda i: (i, 0, 0, 0)),
            pl.BlockSpec((3, 3 * cp, cout_p), lambda i: (0, 0, 0)),
        ],
        out_specs=(
            pl.BlockSpec((1, hw, cout_p), lambda i: (i, 0, 0)),
            pl.BlockSpec((1, 1, cout_p), lambda i: (i, 0, 0)),
            pl.BlockSpec((1, 1, cout_p), lambda i: (i, 0, 0)),
        ),
        scratch_shapes=[
            pltpu.VMEM((hw, cout_p), jnp.float32),     # f32 accumulator
            pltpu.VMEM((hw, 3 * cp), jnp.bfloat16),    # grouped-K LHS staging
        ],
        compiler_params=pltpu.CompilerParams(dimension_semantics=("parallel",)),
    )(x_padded, w_folded)


# ---------------------------------------------------------------------------
# Lightweight normalize (+ optional residual) + ReLU, tiled along hw.
# ---------------------------------------------------------------------------
def _bn_relu_kernel(y_ref, scale_ref, shift_ref, o_ref):
    z = y_ref[...].astype(jnp.float32) * scale_ref[...] + shift_ref[...]
    o_ref[...] = jnp.maximum(z, 0.0).astype(o_ref.dtype)


def _bn_add_relu_kernel(y_ref, res_ref, scale_ref, shift_ref, o_ref):
    z = (y_ref[...].astype(jnp.float32) * scale_ref[...] + shift_ref[...]
         + res_ref[...].astype(jnp.float32))
    o_ref[...] = jnp.maximum(z, 0.0).astype(o_ref.dtype)


def bn_relu(y, scale, shift, out_dtype, residual=None, row_tile=512):
    n, hw, cp = y.shape
    th = row_tile if (hw > row_tile and hw % row_tile == 0) else hw
    slab = pl.BlockSpec((1, th, cp), lambda i, j: (i, j, 0))
    vec = pl.BlockSpec((1, cp), lambda i, j: (0, 0))
    if residual is None:
        kernel, operands = _bn_relu_kernel, (y, scale, shift)
        in_specs = [slab, vec, vec]
    else:
        kernel, operands = _bn_add_relu_kernel, (y, residual, scale, shift)
        in_specs = [slab, slab, vec, vec]
    return pl.pallas_call(
        kernel,
        out_shape=jax.ShapeDtypeStruct((n, hw, cp), out_dtype),
        grid=(n, hw // th),
        in_specs=in_specs,
        out_specs=slab,
        compiler_params=pltpu.CompilerParams(
            dimension_semantics=("parallel", "parallel")),
    )(*operands)


# ---------------------------------------------------------------------------
# O(C) glue + layout helpers (plain JAX).
# ---------------------------------------------------------------------------
def _bn_scale_shift(sum_partials, sq_partials, count, gamma_pad, beta_pad,
                    eps=1e-5):
    s = jnp.sum(sum_partials, axis=0)                  # (1, C_pad)
    sq = jnp.sum(sq_partials, axis=0)
    mean = s / count
    var = jnp.maximum(sq / count - mean * mean, 0.0)   # biased var (PyTorch BN)
    inv_std = jax.lax.rsqrt(var + eps)                 # once per channel
    scale = gamma_pad * inv_std
    shift = beta_pad - mean * scale
    return scale, shift


def _fold_weight(w_oihw, cin_pad, cout_pad, groups):
    # groups=1 -> (9*cin_pad, cout_pad)     conv1: all 9 taps folded into K
    # groups=3 -> (3, 3*cin_pad, cout_pad)  conv2/3: dy groups of K = 3*cin_pad
    cout, cin, kh, kw = w_oihw.shape
    w = jnp.transpose(w_oihw, (2, 3, 1, 0))            # (3, 3, Cin, Cout)
    w = jnp.pad(w, ((0, 0), (0, 0), (0, cin_pad - cin), (0, cout_pad - cout)))
    if groups == 1:
        w = w.reshape(kh * kw * cin_pad, cout_pad)
    else:
        w = w.reshape(kh, kw * cin_pad, cout_pad)
    return w.astype(jnp.bfloat16)


def _pad_vec(v, cpad):
    # Zero-padded gamma/beta keep padded output channels exactly zero
    # (scale = 0 * rsqrt(eps), shift = 0) -> safe inputs to the next conv.
    return jnp.pad(v, (0, cpad - v.shape[0])).astype(jnp.float32).reshape(1, cpad)


def _pad_act(a_flat, n, ho, wo, cp):
    # TODO(synk): fuse this 1-pixel zero pad into bn_relu's output spec to save
    # one HBM round trip per conv input.
    return jnp.pad(a_flat.reshape(n, ho, wo, cp), ((0, 0), (1, 1), (1, 1), (0, 0)))


# ---------------------------------------------------------------------------
# DownBlock forward (training-mode BatchNorm: batch statistics).
# ---------------------------------------------------------------------------
def downblock_forward(x_nchw, params, eps=1e-5):
    n, c_in, h, w = x_nchw.shape
    assert h % 2 == 0 and w % 2 == 0
    c_out = params["w1"].shape[0]
    ho, wo = h // 2, w // 2
    hw = ho * wo
    count = float(n * hw)
    cp = _round_up(c_out, 128)        # lane-dense output channels
    cin_p = _round_up(c_in, 8)

    # NCHW -> NHWC (module interface is NCHW), channel-pad, bf16.  The even/odd
    # column views feed the fused pool+conv1 kernel; at C_in=4 this plumbing is
    # negligible next to the 128-channel conv2/3 work.
    x = jnp.transpose(x_nchw, (0, 2, 3, 1))
    x = jnp.pad(x, ((0, 0), (0, 0), (0, 0), (0, cin_p - c_in))).astype(jnp.bfloat16)
    xe = x[:, :, 0::2, :].reshape(n, ho, 2, wo, cin_p)
    xo = x[:, :, 1::2, :].reshape(n, ho, 2, wo, cin_p)

    # --- SimpleBlock: [maxpool + conv1] (fused) -> BN -> ReLU ---
    w1 = _fold_weight(params["w1"], cin_p, cp, groups=1)
    y1, s1, q1 = pool_conv1_bnstats(xe, xo, w1, ho, wo)
    sc1, sh1 = _bn_scale_shift(s1, q1, count,
                               _pad_vec(params["g1"], cp),
                               _pad_vec(params["b1"], cp), eps)
    a0 = bn_relu(y1, sc1, sh1, jnp.bfloat16)            # (N, Ho*Wo, Cp) bf16

    # --- ResidualBlock: conv2 -> BN -> ReLU -> conv3 -> BN -> (+a0) -> ReLU ---
    w2 = _fold_weight(params["w2"], cp, cp, groups=3)
    y2, s2, q2 = conv3x3_bnstats(_pad_act(a0, n, ho, wo, cp), w2, ho, wo)
    sc2, sh2 = _bn_scale_shift(s2, q2, count,
                               _pad_vec(params["g2"], cp),
                               _pad_vec(params["b2"], cp), eps)
    a1 = bn_relu(y2, sc2, sh2, jnp.bfloat16)

    w3 = _fold_weight(params["w3"], cp, cp, groups=3)
    y3, s3, q3 = conv3x3_bnstats(_pad_act(a1, n, ho, wo, cp), w3, ho, wo)
    sc3, sh3 = _bn_scale_shift(s3, q3, count,
                               _pad_vec(params["g3"], cp),
                               _pad_vec(params["b3"], cp), eps)
    out = bn_relu(y3, sc3, sh3, jnp.float32, residual=a0)

    out = out.reshape(n, ho, wo, cp)[:, :, :, :c_out]
    return jnp.transpose(out, (0, 3, 1, 2))             # NCHW


# ---------------------------------------------------------------------------
# Pure-JAX reference (same semantics) for a sanity check.
# ---------------------------------------------------------------------------
def downblock_reference(x_nchw, params, eps=1e-5):
    def conv_bn_relu(a, w_oihw, gamma, beta, residual=None):
        w = jnp.transpose(w_oihw, (2, 3, 1, 0))          # HWIO
        y = jax.lax.conv_general_dilated(
            a, w, window_strides=(1, 1), padding="SAME",
            dimension_numbers=("NHWC", "HWIO", "NHWC"),
            precision=jax.lax.Precision.HIGHEST)
        mean = jnp.mean(y, axis=(0, 1, 2))
        var = jnp.mean(jnp.square(y - mean), axis=(0, 1, 2))   # biased
        z = (y - mean) * jax.lax.rsqrt(var + eps) * gamma + beta
        if residual is not None:
            z = z + residual
        return jnp.maximum(z, 0.0)

    n, c, h, w = x_nchw.shape
    a = jnp.transpose(x_nchw, (0, 2, 3, 1))
    a = a.reshape(n, h // 2, 2, w // 2, 2, c).max(axis=(2, 4))
    a0 = conv_bn_relu(a, params["w1"], params["g1"], params["b1"])
    a1 = conv_bn_relu(a0, params["w2"], params["g2"], params["b2"])
    out = conv_bn_relu(a1, params["w3"], params["g3"], params["b3"], residual=a0)
    return jnp.transpose(out, (0, 3, 1, 2))


if __name__ == "__main__":
    key = jax.random.PRNGKey(0)
    keys = jax.random.split(key, 10)
    n, c_in, h, w = 2, 4, 16, 16
    c_out = 8

    x = jax.random.normal(keys[0], (n, c_in, h, w), jnp.float32)
    params = {
        "w1": 0.2 * jax.random.normal(keys[1], (c_out, c_in, 3, 3), jnp.float32),
        "g1": 1.0 + 0.1 * jax.random.normal(keys[2], (c_out,), jnp.float32),
        "b1": 0.1 * jax.random.normal(keys[3], (c_out,), jnp.float32),
        "w2": 0.2 * jax.random.normal(keys[4], (c_out, c_out, 3, 3), jnp.float32),
        "g2": 1.0 + 0.1 * jax.random.normal(keys[5], (c_out,), jnp.float32),
        "b2": 0.1 * jax.random.normal(keys[6], (c_out,), jnp.float32),
        "w3": 0.2 * jax.random.normal(keys[7], (c_out, c_out, 3, 3), jnp.float32),
        "g3": 1.0 + 0.1 * jax.random.normal(keys[8], (c_out,), jnp.float32),
        "b3": 0.1 * jax.random.normal(keys[9], (c_out,), jnp.float32),
    }

    out = jax.jit(downblock_forward)(x, params)
    out = jax.block_until_ready(out)

    ref = downblock_reference(x, params)
    err = float(jnp.max(jnp.abs(out - ref)))
    mean_err = float(jnp.mean(jnp.abs(out - ref)))
    assert out.shape == (n, c_out, h // 2, w // 2), out.shape
    # bf16 conv operands vs f32 HIGHEST reference: tightened (was 0.3).
    assert err < 0.15 and mean_err < 0.02, (err, mean_err)
    print("KERNEL_OK")
</pallas_src>

<mosaic_0001>
module attributes {stable_mosaic.version = 11 : i64} {
  func.func @_pool_conv1_kernel(%arg0: i32, %arg1: memref<1x8x2x8x8xbf16, #tpu.memory_space<vmem>>, %arg2: memref<1x8x2x8x8xbf16, #tpu.memory_space<vmem>>, %arg3: memref<72x128xbf16, #tpu.memory_space<vmem>>, %arg4: memref<1x64x128xbf16, #tpu.memory_space<vmem>>, %arg5: memref<1x1x128xf32, #tpu.memory_space<vmem>>, %arg6: memref<1x1x128xf32, #tpu.memory_space<vmem>>, %arg7: memref<10x10x8xbf16, #tpu.memory_space<vmem>>) attributes {dimension_semantics = [#tpu.dimension_semantics<parallel>], iteration_bounds = array<i64: 2>, scalar_prefetch = 0 : i64, scratch_operands = 1 : i64, tpu.core_type = #tpu.core_type<tc>, window_params = [{transform_indices = @transform_0, window_bounds = array<i64: 1, 8, 2, 8, 8>}, {transform_indices = @transform_1, window_bounds = array<i64: 1, 8, 2, 8, 8>}, {pipeline_mode = #tpu.pipeline_mode<synchronous>, transform_indices = @transform_2, window_bounds = array<i64: 72, 128>}, {transform_indices = @transform_3, window_bounds = array<i64: 1, 64, 128>}, {transform_indices = @transform_4, window_bounds = array<i64: 1, 1, 128>}, {transform_indices = @transform_5, window_bounds = array<i64: 1, 1, 128>}]} {
    %c0 = arith.constant 0 : index
    %c0_0 = arith.constant 0 : index
    %c0_1 = arith.constant 0 : index
    %c0_2 = arith.constant 0 : index
    %c0_3 = arith.constant 0 : index
    %0 = vector.load %arg1[%c0, %c0_0, %c0_1, %c0_2, %c0_3] : memref<1x8x2x8x8xbf16, #tpu.memory_space<vmem>>, vector<1x8x1x8x8xbf16>
    %1 = vector.shape_cast %0 : vector<1x8x1x8x8xbf16> to vector<8x8x8xbf16>
    %c0_4 = arith.constant 0 : index
    %c0_5 = arith.constant 0 : index
    %c1 = arith.constant 1 : index
    %c0_6 = arith.constant 0 : index
    %c0_7 = arith.constant 0 : index
    %2 = vector.load %arg1[%c0_4, %c0_5, %c1, %c0_6, %c0_7] : memref<1x8x2x8x8xbf16, #tpu.memory_space<vmem>>, vector<1x8x1x8x8xbf16>
    %3 = vector.shape_cast %2 : vector<1x8x1x8x8xbf16> to vector<8x8x8xbf16>
    %4 = arith.maximumf %1, %3 : vector<8x8x8xbf16>
    %c0_8 = arith.constant 0 : index
    %c0_9 = arith.constant 0 : index
    %c0_10 = arith.constant 0 : index
    %c0_11 = arith.constant 0 : index
    %c0_12 = arith.constant 0 : index
    %5 = vector.load %arg2[%c0_8, %c0_9, %c0_10, %c0_11, %c0_12] : memref<1x8x2x8x8xbf16, #tpu.memory_space<vmem>>, vector<1x8x1x8x8xbf16>
    %6 = vector.shape_cast %5 : vector<1x8x1x8x8xbf16> to vector<8x8x8xbf16>
    %c0_13 = arith.constant 0 : index
    %c0_14 = arith.constant 0 : index
    %c1_15 = arith.constant 1 : index
    %c0_16 = arith.constant 0 : index
    %c0_17 = arith.constant 0 : index
    %7 = vector.load %arg2[%c0_13, %c0_14, %c1_15, %c0_16, %c0_17] : memref<1x8x2x8x8xbf16, #tpu.memory_space<vmem>>, vector<1x8x1x8x8xbf16>
    %8 = vector.shape_cast %7 : vector<1x8x1x8x8xbf16> to vector<8x8x8xbf16>
    %9 = arith.maximumf %6, %8 : vector<8x8x8xbf16>
    %10 = arith.maximumf %4, %9 : vector<8x8x8xbf16>
    %cst = arith.constant 0.000000e+00 : bf16
    %11 = vector.broadcast %cst : bf16 to vector<10x10x8xbf16>
    %c0_18 = arith.constant 0 : index
    %c0_19 = arith.constant 0 : index
    %c0_20 = arith.constant 0 : index
    %12 = vector.load %arg7[%c0_18, %c0_19, %c0_20] : memref<10x10x8xbf16, #tpu.memory_space<vmem>>, vector<10x10x8xbf16>
    tpu.vector_store %arg7[%c0_18, %c0_19, %c0_20], %11 {strides = array<i32>} : memref<10x10x8xbf16, #tpu.memory_space<vmem>>, vector<10x10x8xbf16>,
    %c1_21 = arith.constant 1 : index
    %c1_22 = arith.constant 1 : index
    %c0_23 = arith.constant 0 : index
    %13 = vector.load %arg7[%c1_21, %c1_22, %c0_23] : memref<10x10x8xbf16, #tpu.memory_space<vmem>>, vector<8x8x8xbf16>
    tpu.vector_store %arg7[%c1_21, %c1_22, %c0_23], %10 {strides = array<i32>} : memref<10x10x8xbf16, #tpu.memory_space<vmem>>, vector<8x8x8xbf16>,
    %c0_24 = arith.constant 0 : index
    %c0_25 = arith.constant 0 : index
    %c0_26 = arith.constant 0 : index
    %14 = vector.load %arg7[%c0_24, %c0_25, %c0_26] : memref<10x10x8xbf16, #tpu.memory_space<vmem>>, vector<8x8x8xbf16>
    %15 = vector.shape_cast %14 : vector<8x8x8xbf16> to vector<64x8xbf16>
    %c0_27 = arith.constant 0 : index
    %c1_28 = arith.constant 1 : index
    %c0_29 = arith.constant 0 : index
    %16 = vector.load %arg7[%c0_27, %c1_28, %c0_29] : memref<10x10x8xbf16, #tpu.memory_space<vmem>>, vector<8x8x8xbf16>
    %17 = vector.shape_cast %16 : vector<8x8x8xbf16> to vector<64x8xbf16>
    %c0_30 = arith.constant 0 : index
    %c2 = arith.constant 2 : index
    %c0_31 = arith.constant 0 : index
    %18 = vector.load %arg7[%c0_30, %c2, %c0_31] : memref<10x10x8xbf16, #tpu.memory_space<vmem>>, vector<8x8x8xbf16>
    %19 = vector.shape_cast %18 : vector<8x8x8xbf16> to vector<64x8xbf16>
    %c1_32 = arith.constant 1 : index
    %c0_33 = arith.constant 0 : index
    %c0_34 = arith.constant 0 : index
    %20 = vector.load %arg7[%c1_32, %c0_33, %c0_34] : memref<10x10x8xbf16, #tpu.memory_space<vmem>>, vector<8x8x8xbf16>
    %21 = vector.shape_cast %20 : vector<8x8x8xbf16> to vector<64x8xbf16>
    %c1_35 = arith.constant 1 : index
    %c1_36 = arith.constant 1 : index
    %c0_37 = arith.constant 0 : index
    %22 = vector.load %arg7[%c1_35, %c1_36, %c0_37] : memref<10x10x8xbf16, #tpu.memory_space<vmem>>, vector<8x8x8xbf16>
    %23 = vector.shape_cast %22 : vector<8x8x8xbf16> to vector<64x8xbf16>
    %c1_38 = arith.constant 1 : index
    %c2_39 = arith.constant 2 : index
    %c0_40 = arith.constant 0 : index
    %24 = vector.load %arg7[%c1_38, %c2_39, %c0_40] : memref<10x10x8xbf16, #tpu.memory_space<vmem>>, vector<8x8x8xbf16>
    %25 = vector.shape_cast %24 : vector<8x8x8xbf16> to vector<64x8xbf16>
    %c2_41 = arith.constant 2 : index
    %c0_42 = arith.constant 0 : index
    %c0_43 = arith.constant 0 : index
    %26 = vector.load %arg7[%c2_41, %c0_42, %c0_43] : memref<10x10x8xbf16, #tpu.memory_space<vmem>>, vector<8x8x8xbf16>
    %27 = vector.shape_cast %26 : vector<8x8x8xbf16> to vector<64x8xbf16>
    %c2_44 = arith.constant 2 : index
    %c1_45 = arith.constant 1 : index
    %c0_46 = arith.constant 0 : index
    %28 = vector.load %arg7[%c2_44, %c1_45, %c0_46] : memref<10x10x8xbf16, #tpu.memory_space<vmem>>, vector<8x8x8xbf16>
    %29 = vector.shape_cast %28 : vector<8x8x8xbf16> to vector<64x8xbf16>
    %c2_47 = arith.constant 2 : index
    %c2_48 = arith.constant 2 : index
    %c0_49 = arith.constant 0 : index
    %30 = vector.load %arg7[%c2_47, %c2_48, %c0_49] : memref<10x10x8xbf16, #tpu.memory_space<vmem>>, vector<8x8x8xbf16>
    %31 = vector.shape_cast %30 : vector<8x8x8xbf16> to vector<64x8xbf16>
    %32 = tpu.concatenate %15, %17, %19, %21, %23, %25, %27, %29, %31 in 1 : vector<64x8xbf16>, vector<64x8xbf16>, vector<64x8xbf16>, vector<64x8xbf16>, vector<64x8xbf16>, vector<64x8xbf16>, vector<64x8xbf16>, vector<64x8xbf16>, vector<64x8xbf16> -> vector<64x72xbf16>
    %c0_50 = arith.constant 0 : index
    %c0_51 = arith.constant 0 : index
    %33 = vector.load %arg3[%c0_50, %c0_51] : memref<72x128xbf16, #tpu.memory_space<vmem>>, vector<72x128xbf16>
    %cst_52 = arith.constant dense<0.000000e+00> : vector<64x128xf32>
    %34 = tpu.matmul %32, %33, %cst_52 {dimension_numbers = #tpu.dot_dimension_numbers<[1], [0], [0], [1], [0, 0, 1, 1], [], []>} : vector<64x72xbf16>, vector<72x128xbf16>, vector<64x128xf32> -> vector<64x128xf32>
    %35 = arith.truncf %34 : vector<64x128xf32> to vector<64x128xbf16>
    %c0_53 = arith.constant 0 : index
    %c0_54 = arith.constant 0 : index
    %c0_55 = arith.constant 0 : index
    %36 = vector.load %arg4[%c0_53, %c0_54, %c0_55] : memref<1x64x128xbf16, #tpu.memory_space<vmem>>, vector<1x64x128xbf16>
    %37 = vector.shape_cast %36 : vector<1x64x128xbf16> to vector<64x128xbf16>
    %38 = vector.shape_cast %35 : vector<64x128xbf16> to vector<1x64x128xbf16>
    tpu.vector_store %arg4[%c0_53, %c0_54, %c0_55], %38 {strides = array<i32>} : memref<1x64x128xbf16, #tpu.memory_space<vmem>>, vector<1x64x128xbf16>,
    %cst_56 = arith.constant dense<0.000000e+00> : vector<128xf32>
    %39 = vector.multi_reduction <add>, %34, %cst_56 [0] : vector<64x128xf32> to vector<128xf32>
    %40 = vector.shape_cast %39 : vector<128xf32> to vector<1x128xf32>
    %c0_57 = arith.constant 0 : index
    %c0_58 = arith.constant 0 : index
    %c0_59 = arith.constant 0 : index
    %41 = vector.load %arg5[%c0_57, %c0_58, %c0_59] : memref<1x1x128xf32, #tpu.memory_space<vmem>>, vector<1x1x128xf32>
    %42 = vector.shape_cast %41 : vector<1x1x128xf32> to vector<1x128xf32>
    %43 = vector.shape_cast %40 : vector<1x128xf32> to vector<1x1x128xf32>
    tpu.vector_store %arg5[%c0_57, %c0_58, %c0_59], %43 {strides = array<i32>} : memref<1x1x128xf32, #tpu.memory_space<vmem>>, vector<1x1x128xf32>,
    %44 = arith.mulf %34, %34 : vector<64x128xf32>
    %cst_60 = arith.constant dense<0.000000e+00> : vector<128xf32>
    %45 = vector.multi_reduction <add>, %44, %cst_60 [0] : vector<64x128xf32> to vector<128xf32>
    %46 = vector.shape_cast %45 : vector<128xf32> to vector<1x128xf32>
    %c0_61 = arith.constant 0 : index
    %c0_62 = arith.constant 0 : index
    %c0_63 = arith.constant 0 : index
    %47 = vector.load %arg6[%c0_61, %c0_62, %c0_63] : memref<1x1x128xf32, #tpu.memory_space<vmem>>, vector<1x1x128xf32>
    %48 = vector.shape_cast %47 : vector<1x1x128xf32> to vector<1x128xf32>
    %49 = vector.shape_cast %46 : vector<1x128xf32> to vector<1x1x128xf32>
    tpu.vector_store %arg6[%c0_61, %c0_62, %c0_63], %49 {strides = array<i32>} : memref<1x1x128xf32, #tpu.memory_space<vmem>>, vector<1x1x128xf32>,
    return
  }
  func.func @transform_0(%arg0: i32) -> (i32, i32, i32, i32, i32) {
    %c0_i32 = arith.constant 0 : i32
    %c0_i32_0 = arith.constant 0 : i32
    %c0_i32_1 = arith.constant 0 : i32
    %c0_i32_2 = arith.constant 0 : i32
    %c0_i32_3 = arith.constant 0 : i32
    return %arg0, %c0_i32, %c0_i32_0, %c0_i32_1, %c0_i32_2 : i32, i32, i32, i32, i32
  }
  func.func @transform_1(%arg0: i32) -> (i32, i32, i32, i32, i32) {
    %c0_i32 = arith.constant 0 : i32
    %c0_i32_0 = arith.constant 0 : i32
    %c0_i32_1 = arith.constant 0 : i32
    %c0_i32_2 = arith.constant 0 : i32
    %c0_i32_3 = arith.constant 0 : i32
    return %arg0, %c0_i32, %c0_i32_0, %c0_i32_1, %c0_i32_2 : i32, i32, i32, i32, i32
  }
  func.func @transform_2(%arg0: i32) -> (i32, i32) {
    %c0_i32 = arith.constant 0 : i32
    %c0_i32_0 = arith.constant 0 : i32
    %c0_i32_1 = arith.constant 0 : i32
    return %c0_i32, %c0_i32_0 : i32, i32
  }
  func.func @transform_3(%arg0: i32) -> (i32, i32, i32) {
    %c0_i32 = arith.constant 0 : i32
    %c0_i32_0 = arith.constant 0 : i32
    %c0_i32_1 = arith.constant 0 : i32
    return %arg0, %c0_i32, %c0_i32_0 : i32, i32, i32
  }
  func.func @transform_4(%arg0: i32) -> (i32, i32, i32) {
    %c0_i32 = arith.constant 0 : i32
    %c0_i32_0 = arith.constant 0 : i32
    %c0_i32_1 = arith.constant 0 : i32
    return %arg0, %c0_i32, %c0_i32_0 : i32, i32, i32
  }
  func.func @transform_5(%arg0: i32) -> (i32, i32, i32) {
    %c0_i32 = arith.constant 0 : i32
    %c0_i32_0 = arith.constant 0 : i32
    %c0_i32_1 = arith.constant 0 : i32
    return %arg0, %c0_i32, %c0_i32_0 : i32, i32, i32
  }
}

module attributes {stable_mosaic.version = 11 : i64} {
  func.func @_bn_relu_kernel(%arg0: i32, %arg1: i32, %arg2: memref<1x64x128xbf16, #tpu.memory_space<vmem>>, %arg3: memref<1x128xf32, #tpu.memory_space<vmem>>, %arg4: memref<1x128xf32, #tpu.memory_space<vmem>>, %arg5: memref<1x64x128xbf16, #tpu.memory_space<vmem>>) attributes {dimension_semantics = [#tpu.dimension_semantics<parallel>, #tpu.dimension_semantics<parallel>], iteration_bounds = array<i64: 2, 1>, scalar_prefetch = 0 : i64, scratch_operands = 0 : i64, tpu.core_type = #tpu.core_type<tc>, window_params = [{transform_indices = @transform_0, window_bounds = array<i64: 1, 64, 128>}, {pipeline_mode = #tpu.pipeline_mode<synchronous>, transform_indices = @transform_1, window_bounds = array<i64: 1, 128>}, {pipeline_mode = #tpu.pipeline_mode<synchronous>, transform_indices = @transform_2, window_bounds = array<i64: 1, 128>}, {transform_indices = @transform_3, window_bounds = array<i64: 1, 64, 128>}]} {
    %c0 = arith.constant 0 : index
    %c0_0 = arith.constant 0 : index
    %c0_1 = arith.constant 0 : index
    %0 = vector.load %arg2[%c0, %c0_0, %c0_1] : memref<1x64x128xbf16, #tpu.memory_space<vmem>>, vector<1x64x128xbf16>
    %1 = arith.extf %0 : vector<1x64x128xbf16> to vector<1x64x128xf32>
    %c0_2 = arith.constant 0 : index
    %c0_3 = arith.constant 0 : index
    %2 = vector.load %arg3[%c0_2, %c0_3] : memref<1x128xf32, #tpu.memory_space<vmem>>, vector<1x128xf32>
    %3 = vector.shape_cast %2 : vector<1x128xf32> to vector<1x1x128xf32>
    %4 = vector.broadcast %3 : vector<1x1x128xf32> to vector<1x64x128xf32>
    %5 = arith.mulf %1, %4 : vector<1x64x128xf32>
    %c0_4 = arith.constant 0 : index
    %c0_5 = arith.constant 0 : index
    %6 = vector.load %arg4[%c0_4, %c0_5] : memref<1x128xf32, #tpu.memory_space<vmem>>, vector<1x128xf32>
    %7 = vector.shape_cast %6 : vector<1x128xf32> to vector<1x1x128xf32>
    %8 = vector.broadcast %7 : vector<1x1x128xf32> to vector<1x64x128xf32>
    %9 = arith.addf %5, %8 : vector<1x64x128xf32>
    %cst = arith.constant 0.000000e+00 : f32
    %10 = vector.broadcast %cst : f32 to vector<1x64x128xf32>
    %11 = arith.maximumf %9, %10 : vector<1x64x128xf32>
    %12 = arith.truncf %11 : vector<1x64x128xf32> to vector<1x64x128xbf16>
    %c0_6 = arith.constant 0 : index
    %c0_7 = arith.constant 0 : index
    %c0_8 = arith.constant 0 : index
    %13 = vector.load %arg5[%c0_6, %c0_7, %c0_8] : memref<1x64x128xbf16, #tpu.memory_space<vmem>>, vector<1x64x128xbf16>
    tpu.vector_store %arg5[%c0_6, %c0_7, %c0_8], %12 {strides = array<i32>} : memref<1x64x128xbf16, #tpu.memory_space<vmem>>, vector<1x64x128xbf16>,
    return
  }
  func.func @transform_0(%arg0: i32, %arg1: i32) -> (i32, i32, i32) {
    %c0_i32 = arith.constant 0 : i32
    %c0_i32_0 = arith.constant 0 : i32
    return %arg0, %arg1, %c0_i32 : i32, i32, i32
  }
  func.func @transform_1(%arg0: i32, %arg1: i32) -> (i32, i32) {
    %c0_i32 = arith.constant 0 : i32
    %c0_i32_0 = arith.constant 0 : i32
    %c0_i32_1 = arith.constant 0 : i32
    return %c0_i32, %c0_i32_0 : i32, i32
  }
  func.func @transform_2(%arg0: i32, %arg1: i32) -> (i32, i32) {
    %c0_i32 = arith.constant 0 : i32
    %c0_i32_0 = arith.constant 0 : i32
    %c0_i32_1 = arith.constant 0 : i32
    return %c0_i32, %c0_i32_0 : i32, i32
  }
  func.func @transform_3(%arg0: i32, %arg1: i32) -> (i32, i32, i32) {
    %c0_i32 = arith.constant 0 : i32
    %c0_i32_0 = arith.constant 0 : i32
    return %arg0, %arg1, %c0_i32 : i32, i32, i32
  }
}

module attributes {stable_mosaic.version = 11 : i64} {
  func.func @_conv3x3_kernel(%arg0: i32, %arg1: memref<1x10x10x128xbf16, #tpu.memory_space<vmem>>, %arg2: memref<3x384x128xbf16, #tpu.memory_space<vmem>>, %arg3: memref<1x64x128xbf16, #tpu.memory_space<vmem>>, %arg4: memref<1x1x128xf32, #tpu.memory_space<vmem>>, %arg5: memref<1x1x128xf32, #tpu.memory_space<vmem>>, %arg6: memref<64x128xf32, #tpu.memory_space<vmem>>, %arg7: memref<64x384xbf16, #tpu.memory_space<vmem>>) attributes {dimension_semantics = [#tpu.dimension_semantics<parallel>], iteration_bounds = array<i64: 2>, scalar_prefetch = 0 : i64, scratch_operands = 2 : i64, tpu.core_type = #tpu.core_type<tc>, window_params = [{transform_indices = @transform_0, window_bounds = array<i64: 1, 10, 10, 128>}, {pipeline_mode = #tpu.pipeline_mode<synchronous>, transform_indices = @transform_1, window_bounds = array<i64: 3, 384, 128>}, {transform_indices = @transform_2, window_bounds = array<i64: 1, 64, 128>}, {transform_indices = @transform_3, window_bounds = array<i64: 1, 1, 128>}, {transform_indices = @transform_4, window_bounds = array<i64: 1, 1, 128>}]} {
    %c0 = arith.constant 0 : index
    %c0_0 = arith.constant 0 : index
    %c0_1 = arith.constant 0 : index
    %c0_2 = arith.constant 0 : index
    %0 = vector.load %arg1[%c0, %c0_0, %c0_1, %c0_2] : memref<1x10x10x128xbf16, #tpu.memory_space<vmem>>, vector<1x8x8x128xbf16>
    %1 = vector.shape_cast %0 : vector<1x8x8x128xbf16> to vector<8x8x128xbf16>
    %2 = vector.shape_cast %1 : vector<8x8x128xbf16> to vector<64x128xbf16>
    %c0_3 = arith.constant 0 : index
    %c0_4 = arith.constant 0 : index
    %3 = vector.load %arg7[%c0_3, %c0_4] : memref<64x384xbf16, #tpu.memory_space<vmem>>, vector<64x128xbf16>
    tpu.vector_store %arg7[%c0_3, %c0_4], %2 {strides = array<i32>} : memref<64x384xbf16, #tpu.memory_space<vmem>>, vector<64x128xbf16>,
    %c0_5 = arith.constant 0 : index
    %c0_6 = arith.constant 0 : index
    %c1 = arith.constant 1 : index
    %c0_7 = arith.constant 0 : index
    %4 = vector.load %arg1[%c0_5, %c0_6, %c1, %c0_7] : memref<1x10x10x128xbf16, #tpu.memory_space<vmem>>, vector<1x8x8x128xbf16>
    %5 = vector.shape_cast %4 : vector<1x8x8x128xbf16> to vector<8x8x128xbf16>
    %6 = vector.shape_cast %5 : vector<8x8x128xbf16> to vector<64x128xbf16>
    %c0_8 = arith.constant 0 : index
    %c128 = arith.constant 128 : index
    %7 = vector.load %arg7[%c0_8, %c128] : memref<64x384xbf16, #tpu.memory_space<vmem>>, vector<64x128xbf16>
    tpu.vector_store %arg7[%c0_8, %c128], %6 {strides = array<i32>} : memref<64x384xbf16, #tpu.memory_space<vmem>>, vector<64x128xbf16>,
    %c0_9 = arith.constant 0 : index
    %c0_10 = arith.constant 0 : index
    %c2 = arith.constant 2 : index
    %c0_11 = arith.constant 0 : index
    %8 = vector.load %arg1[%c0_9, %c0_10, %c2, %c0_11] : memref<1x10x10x128xbf16, #tpu.memory_space<vmem>>, vector<1x8x8x128xbf16>
    %9 = vector.shape_cast %8 : vector<1x8x8x128xbf16> to vector<8x8x128xbf16>
    %10 = vector.shape_cast %9 : vector<8x8x128xbf16> to vector<64x128xbf16>
    %c0_12 = arith.constant 0 : index
    %c256 = arith.constant 256 : index
    %11 = vector.load %arg7[%c0_12, %c256] : memref<64x384xbf16, #tpu.memory_space<vmem>>, vector<64x128xbf16>
    tpu.vector_store %arg7[%c0_12, %c256], %10 {strides = array<i32>} : memref<64x384xbf16, #tpu.memory_space<vmem>>, vector<64x128xbf16>,
    %c0_13 = arith.constant 0 : index
    %c0_14 = arith.constant 0 : index
    %12 = vector.load %arg7[%c0_13, %c0_14] : memref<64x384xbf16, #tpu.memory_space<vmem>>, vector<64x384xbf16>
    %c0_15 = arith.constant 0 : index
    %c0_16 = arith.constant 0 : index
    %c0_17 = arith.constant 0 : index
    %13 = vector.load %arg2[%c0_15, %c0_16, %c0_17] : memref<3x384x128xbf16, #tpu.memory_space<vmem>>, vector<1x384x128xbf16>
    %14 = vector.shape_cast %13 : vector<1x384x128xbf16> to vector<384x128xbf16>
    %cst = arith.constant dense<0.000000e+00> : vector<64x128xf32>
    %15 = tpu.matmul %12, %14, %cst {dimension_numbers = #tpu.dot_dimension_numbers<[1], [0], [0], [1], [0, 0, 1, 1], [], []>} : vector<64x384xbf16>, vector<384x128xbf16>, vector<64x128xf32> -> vector<64x128xf32>
    %c0_18 = arith.constant 0 : index
    %c0_19 = arith.constant 0 : index
    %16 = vector.load %arg6[%c0_18, %c0_19] : memref<64x128xf32, #tpu.memory_space<vmem>>, vector<64x128xf32>
    tpu.vector_store %arg6[%c0_18, %c0_19], %15 {strides = array<i32>} : memref<64x128xf32, #tpu.memory_space<vmem>>, vector<64x128xf32>,
    %c0_20 = arith.constant 0 : index
    %c1_21 = arith.constant 1 : index
    %c0_22 = arith.constant 0 : index
    %c0_23 = arith.constant 0 : index
    %17 = vector.load %arg1[%c0_20, %c1_21, %c0_22, %c0_23] : memref<1x10x10x128xbf16, #tpu.memory_space<vmem>>, vector<1x8x8x128xbf16>
    %18 = vector.shape_cast %17 : vector<1x8x8x128xbf16> to vector<8x8x128xbf16>
    %19 = vector.shape_cast %18 : vector<8x8x128xbf16> to vector<64x128xbf16>
    %c0_24 = arith.constant 0 : index
    %c0_25 = arith.constant 0 : index
    %20 = vector.load %arg7[%c0_24, %c0_25] : memref<64x384xbf16, #tpu.memory_space<vmem>>, vector<64x128xbf16>
    tpu.vector_store %arg7[%c0_24, %c0_25], %19 {strides = array<i32>} : memref<64x384xbf16, #tpu.memory_space<vmem>>, vector<64x128xbf16>,
    %c0_26 = arith.constant 0 : index
    %c1_27 = arith.constant 1 : index
    %c1_28 = arith.constant 1 : index
    %c0_29 = arith.constant 0 : index
    %21 = vector.load %arg1[%c0_26, %c1_27, %c1_28, %c0_29] : memref<1x10x10x128xbf16, #tpu.memory_space<vmem>>, vector<1x8x8x128xbf16>
    %22 = vector.shape_cast %21 : vector<1x8x8x128xbf16> to vector<8x8x128xbf16>
    %23 = vector.shape_cast %22 : vector<8x8x128xbf16> to vector<64x128xbf16>
    %c0_30 = arith.constant 0 : index
    %c128_31 = arith.constant 128 : index
    %24 = vector.load %arg7[%c0_30, %c128_31] : memref<64x384xbf16, #tpu.memory_space<vmem>>, vector<64x128xbf16>
    tpu.vector_store %arg7[%c0_30, %c128_31], %23 {strides = array<i32>} : memref<64x384xbf16, #tpu.memory_space<vmem>>, vector<64x128xbf16>,
    %c0_32 = arith.constant 0 : index
    %c1_33 = arith.constant 1 : index
    %c2_34 = arith.constant 2 : index
    %c0_35 = arith.constant 0 : index
    %25 = vector.load %arg1[%c0_32, %c1_33, %c2_34, %c0_35] : memref<1x10x10x128xbf16, #tpu.memory_space<vmem>>, vector<1x8x8x128xbf16>
    %26 = vector.shape_cast %25 : vector<1x8x8x128xbf16> to vector<8x8x128xbf16>
    %27 = vector.shape_cast %26 : vector<8x8x128xbf16> to vector<64x128xbf16>
    %c0_36 = arith.constant 0 : index
    %c256_37 = arith.constant 256 : index
    %28 = vector.load %arg7[%c0_36, %c256_37] : memref<64x384xbf16, #tpu.memory_space<vmem>>, vector<64x128xbf16>
    tpu.vector_store %arg7[%c0_36, %c256_37], %27 {strides = array<i32>} : memref<64x384xbf16, #tpu.memory_space<vmem>>, vector<64x128xbf16>,
    %c0_38 = arith.constant 0 : index
    %c0_39 = arith.constant 0 : index
    %29 = vector.load %arg7[%c0_38, %c0_39] : memref<64x384xbf16, #tpu.memory_space<vmem>>, vector<64x384xbf16>
    %c1_40 = arith.constant 1 : index
    %c0_41 = arith.constant 0 : index
    %c0_42 = arith.constant 0 : index
    %30 = vector.load %arg2[%c1_40, %c0_41, %c0_42] : memref<3x384x128xbf16, #tpu.memory_space<vmem>>, vector<1x384x128xbf16>
    %31 = vector.shape_cast %30 : vector<1x384x128xbf16> to vector<384x128xbf16>
    %cst_43 = arith.constant dense<0.000000e+00> : vector<64x128xf32>
    %32 = tpu.matmul %29, %31, %cst_43 {dimension_numbers = #tpu.dot_dimension_numbers<[1], [0], [0], [1], [0, 0, 1, 1], [], []>} : vector<64x384xbf16>, vector<384x128xbf16>, vector<64x128xf32> -> vector<64x128xf32>
    %c0_44 = arith.constant 0 : index
    %c0_45 = arith.constant 0 : index
    %33 = vector.load %arg6[%c0_44, %c0_45] : memref<64x128xf32, #tpu.memory_space<vmem>>, vector<64x128xf32>
    %34 = arith.addf %33, %32 : vector<64x128xf32>
    %c0_46 = arith.constant 0 : index
    %c0_47 = arith.constant 0 : index
    %35 = vector.load %arg6[%c0_46, %c0_47] : memref<64x128xf32, #tpu.memory_space<vmem>>, vector<64x128xf32>
    tpu.vector_store %arg6[%c0_46, %c0_47], %34 {strides = array<i32>} : memref<64x128xf32, #tpu.memory_space<vmem>>, vector<64x128xf32>,
    %c0_48 = arith.constant 0 : index
    %c2_49 = arith.constant 2 : index
    %c0_50 = arith.constant 0 : index
    %c0_51 = arith.constant 0 : index
    %36 = vector.load %arg1[%c0_48, %c2_49, %c0_50, %c0_51] : memref<1x10x10x128xbf16, #tpu.memory_space<vmem>>, vector<1x8x8x128xbf16>
    %37 = vector.shape_cast %36 : vector<1x8x8x128xbf16> to vector<8x8x128xbf16>
    %38 = vector.shape_cast %37 : vector<8x8x128xbf16> to vector<64x128xbf16>
    %c0_52 = arith.constant 0 : index
    %c0_53 = arith.constant 0 : index
    %39 = vector.load %arg7[%c0_52, %c0_53] : memref<64x384xbf16, #tpu.memory_space<vmem>>, vector<64x128xbf16>
    tpu.vector_store %arg7[%c0_52, %c0_53], %38 {strides = array<i32>} : memref<64x384xbf16, #tpu.memory_space<vmem>>, vector<64x128xbf16>,
    %c0_54 = arith.constant 0 : index
    %c2_55 = arith.constant 2 : index
    %c1_56 = arith.constant 1 : index
    %c0_57 = arith.constant 0 : index
    %40 = vector.load %arg1[%c0_54, %c2_55, %c1_56, %c0_57] : memref<1x10x10x128xbf16, #tpu.memory_space<vmem>>, vector<1x8x8x128xbf16>
    %41 = vector.shape_cast %40 : vector<1x8x8x128xbf16> to vector<8x8x128xbf16>
    %42 = vector.shape_cast %41 : vector<8x8x128xbf16> to vector<64x128xbf16>
    %c0_58 = arith.constant 0 : index
    %c128_59 = arith.constant 128 : index
    %43 = vector.load %arg7[%c0_58, %c128_59] : memref<64x384xbf16, #tpu.memory_space<vmem>>, vector<64x128xbf16>
    tpu.vector_store %arg7[%c0_58, %c128_59], %42 {strides = array<i32>} : memref<64x384xbf16, #tpu.memory_space<vmem>>, vector<64x128xbf16>,
    %c0_60 = arith.constant 0 : index
    %c2_61 = arith.constant 2 : index
    %c2_62 = arith.constant 2 : index
    %c0_63 = arith.constant 0 : index
    %44 = vector.load %arg1[%c0_60, %c2_61, %c2_62, %c0_63] : memref<1x10x10x128xbf16, #tpu.memory_space<vmem>>, vector<1x8x8x128xbf16>
    %45 = vector.shape_cast %44 : vector<1x8x8x128xbf16> to vector<8x8x128xbf16>
    %46 = vector.shape_cast %45 : vector<8x8x128xbf16> to vector<64x128xbf16>
    %c0_64 = arith.constant 0 : index
    %c256_65 = arith.constant 256 : index
    %47 = vector.load %arg7[%c0_64, %c256_65] : memref<64x384xbf16, #tpu.memory_space<vmem>>, vector<64x128xbf16>
    tpu.vector_store %arg7[%c0_64, %c256_65], %46 {strides = array<i32>} : memref<64x384xbf16, #tpu.memory_space<vmem>>, vector<64x128xbf16>,
    %c0_66 = arith.constant 0 : index
    %c0_67 = arith.constant 0 : index
    %48 = vector.load %arg7[%c0_66, %c0_67] : memref<64x384xbf16, #tpu.memory_space<vmem>>, vector<64x384xbf16>
    %c2_68 = arith.constant 2 : index
    %c0_69 = arith.constant 0 : index
    %c0_70 = arith.constant 0 : index
    %49 = vector.load %arg2[%c2_68, %c0_69, %c0_70] : memref<3x384x128xbf16, #tpu.memory_space<vmem>>, vector<1x384x128xbf16>
    %50 = vector.shape_cast %49 : vector<1x384x128xbf16> to vector<384x128xbf16>
    %cst_71 = arith.constant dense<0.000000e+00> : vector<64x128xf32>
    %51 = tpu.matmul %48, %50, %cst_71 {dimension_numbers = #tpu.dot_dimension_numbers<[1], [0], [0], [1], [0, 0, 1, 1], [], []>} : vector<64x384xbf16>, vector<384x128xbf16>, vector<64x128xf32> -> vector<64x128xf32>
    %c0_72 = arith.constant 0 : index
    %c0_73 = arith.constant 0 : index
    %52 = vector.load %arg6[%c0_72, %c0_73] : memref<64x128xf32, #tpu.memory_space<vmem>>, vector<64x128xf32>
    %53 = arith.addf %52, %51 : vector<64x128xf32>
    %c0_74 = arith.constant 0 : index
    %c0_75 = arith.constant 0 : index
    %54 = vector.load %arg6[%c0_74, %c0_75] : memref<64x128xf32, #tpu.memory_space<vmem>>, vector<64x128xf32>
    tpu.vector_store %arg6[%c0_74, %c0_75], %53 {strides = array<i32>} : memref<64x128xf32, #tpu.memory_space<vmem>>, vector<64x128xf32>,
    %c0_76 = arith.constant 0 : index
    %c0_77 = arith.constant 0 : index
    %55 = vector.load %arg6[%c0_76, %c0_77] : memref<64x128xf32, #tpu.memory_space<vmem>>, vector<64x128xf32>
    %56 = arith.truncf %55 : vector<64x128xf32> to vector<64x128xbf16>
    %c0_78 = arith.constant 0 : index
    %c0_79 = arith.constant 0 : index
    %c0_80 = arith.constant 0 : index
    %57 = vector.load %arg3[%c0_78, %c0_79, %c0_80] : memref<1x64x128xbf16, #tpu.memory_space<vmem>>, vector<1x64x128xbf16>
    %58 = vector.shape_cast %57 : vector<1x64x128xbf16> to vector<64x128xbf16>
    %59 = vector.shape_cast %56 : vector<64x128xbf16> to vector<1x64x128xbf16>
    tpu.vector_store %arg3[%c0_78, %c0_79, %c0_80], %59 {strides = array<i32>} : memref<1x64x128xbf16, #tpu.memory_space<vmem>>, vector<1x64x128xbf16>,
    %cst_81 = arith.constant dense<0.000000e+00> : vector<128xf32>
    %60 = vector.multi_reduction <add>, %55, %cst_81 [0] : vector<64x128xf32> to vector<128xf32>
    %61 = vector.shape_cast %60 : vector<128xf32> to vector<1x128xf32>
    %c0_82 = arith.constant 0 : index
    %c0_83 = arith.constant 0 : index
    %c0_84 = arith.constant 0 : index
    %62 = vector.load %arg4[%c0_82, %c0_83, %c0_84] : memref<1x1x128xf32, #tpu.memory_space<vmem>>, vector<1x1x128xf32>
    %63 = vector.shape_cast %62 : vector<1x1x128xf32> to vector<1x128xf32>
    %64 = vector.shape_cast %61 : vector<1x128xf32> to vector<1x1x128xf32>
    tpu.vector_store %arg4[%c0_82, %c0_83, %c0_84], %64 {strides = array<i32>} : memref<1x1x128xf32, #tpu.memory_space<vmem>>, vector<1x1x128xf32>,
    %65 = arith.mulf %55, %55 : vector<64x128xf32>
    %cst_85 = arith.constant dense<0.000000e+00> : vector<128xf32>
    %66 = vector.multi_reduction <add>, %65, %cst_85 [0] : vector<64x128xf32> to vector<128xf32>
    %67 = vector.shape_cast %66 : vector<128xf32> to vector<1x128xf32>
    %c0_86 = arith.constant 0 : index
    %c0_87 = arith.constant 0 : index
    %c0_88 = arith.constant 0 : index
    %68 = vector.load %arg5[%c0_86, %c0_87, %c0_88] : memref<1x1x128xf32, #tpu.memory_space<vmem>>, vector<1x1x128xf32>
    %69 = vector.shape_cast %68 : vector<1x1x128xf32> to vector<1x128xf32>
    %70 = vector.shape_cast %67 : vector<1x128xf32> to vector<1x1x128xf32>
    tpu.vector_store %arg5[%c0_86, %c0_87, %c0_88], %70 {strides = array<i32>} : memref<1x1x128xf32, #tpu.memory_space<vmem>>, vector<1x1x128xf32>,
    return
  }
  func.func @transform_0(%arg0: i32) -> (i32, i32, i32, i32) {
    %c0_i32 = arith.constant 0 : i32
    %c0_i32_0 = arith.constant 0 : i32
    %c0_i32_1 = arith.constant 0 : i32
    %c0_i32_2 = arith.constant 0 : i32
    return %arg0, %c0_i32, %c0_i32_0, %c0_i32_1 : i32, i32, i32, i32
  }
  func.func @transform_1(%arg0: i32) -> (i32, i32, i32) {
    %c0_i32 = arith.constant 0 : i32
    %c0_i32_0 = arith.constant 0 : i32
    %c0_i32_1 = arith.constant 0 : i32
    %c0_i32_2 = arith.constant 0 : i32
    return %c0_i32, %c0_i32_0, %c0_i32_1 : i32, i32, i32
  }
  func.func @transform_2(%arg0: i32) -> (i32, i32, i32) {
    %c0_i32 = arith.constant 0 : i32
    %c0_i32_0 = arith.constant 0 : i32
    %c0_i32_1 = arith.constant 0 : i32
    return %arg0, %c0_i32, %c0_i32_0 : i32, i32, i32
  }
  func.func @transform_3(%arg0: i32) -> (i32, i32, i32) {
    %c0_i32 = arith.constant 0 : i32
    %c0_i32_0 = arith.constant 0 : i32
    %c0_i32_1 = arith.constant 0 : i32
    return %arg0, %c0_i32, %c0_i32_0 : i32, i32, i32
  }
  func.func @transform_4(%arg0: i32) -> (i32, i32, i32) {
    %c0_i32 = arith.constant 0 : i32
    %c0_i32_0 = arith.constant 0 : i32
    %c0_i32_1 = arith.constant 0 : i32
    return %arg0, %c0_i32, %c0_i32_0 : i32, i32, i32
  }
}

module attributes {stable_mosaic.version = 11 : i64} {
  func.func @_bn_add_relu_kernel(%arg0: i32, %arg1: i32, %arg2: memref<1x64x128xbf16, #tpu.memory_space<vmem>>, %arg3: memref<1x64x128xbf16, #tpu.memory_space<vmem>>, %arg4: memref<1x128xf32, #tpu.memory_space<vmem>>, %arg5: memref<1x128xf32, #tpu.memory_space<vmem>>, %arg6: memref<1x64x128xf32, #tpu.memory_space<vmem>>) attributes {dimension_semantics = [#tpu.dimension_semantics<parallel>, #tpu.dimension_semantics<parallel>], iteration_bounds = array<i64: 2, 1>, scalar_prefetch = 0 : i64, scratch_operands = 0 : i64, tpu.core_type = #tpu.core_type<tc>, window_params = [{transform_indices = @transform_0, window_bounds = array<i64: 1, 64, 128>}, {transform_indices = @transform_1, window_bounds = array<i64: 1, 64, 128>}, {pipeline_mode = #tpu.pipeline_mode<synchronous>, transform_indices = @transform_2, window_bounds = array<i64: 1, 128>}, {pipeline_mode = #tpu.pipeline_mode<synchronous>, transform_indices = @transform_3, window_bounds = array<i64: 1, 128>}, {transform_indices = @transform_4, window_bounds = array<i64: 1, 64, 128>}]} {
    %c0 = arith.constant 0 : index
    %c0_0 = arith.constant 0 : index
    %c0_1 = arith.constant 0 : index
    %0 = vector.load %arg2[%c0, %c0_0, %c0_1] : memref<1x64x128xbf16, #tpu.memory_space<vmem>>, vector<1x64x128xbf16>
    %1 = arith.extf %0 : vector<1x64x128xbf16> to vector<1x64x128xf32>
    %c0_2 = arith.constant 0 : index
    %c0_3 = arith.constant 0 : index
    %2 = vector.load %arg4[%c0_2, %c0_3] : memref<1x128xf32, #tpu.memory_space<vmem>>, vector<1x128xf32>
    %3 = vector.shape_cast %2 : vector<1x128xf32> to vector<1x1x128xf32>
    %4 = vector.broadcast %3 : vector<1x1x128xf32> to vector<1x64x128xf32>
    %5 = arith.mulf %1, %4 : vector<1x64x128xf32>
    %c0_4 = arith.constant 0 : index
    %c0_5 = arith.constant 0 : index
    %6 = vector.load %arg5[%c0_4, %c0_5] : memref<1x128xf32, #tpu.memory_space<vmem>>, vector<1x128xf32>
    %7 = vector.shape_cast %6 : vector<1x128xf32> to vector<1x1x128xf32>
    %8 = vector.broadcast %7 : vector<1x1x128xf32> to vector<1x64x128xf32>
    %9 = arith.addf %5, %8 : vector<1x64x128xf32>
    %c0_6 = arith.constant 0 : index
    %c0_7 = arith.constant 0 : index
    %c0_8 = arith.constant 0 : index
    %10 = vector.load %arg3[%c0_6, %c0_7, %c0_8] : memref<1x64x128xbf16, #tpu.memory_space<vmem>>, vector<1x64x128xbf16>
    %11 = arith.extf %10 : vector<1x64x128xbf16> to vector<1x64x128xf32>
    %12 = arith.addf %9, %11 : vector<1x64x128xf32>
    %cst = arith.constant 0.000000e+00 : f32
    %13 = vector.broadcast %cst : f32 to vector<1x64x128xf32>
    %14 = arith.maximumf %12, %13 : vector<1x64x128xf32>
    %c0_9 = arith.constant 0 : index
    %c0_10 = arith.constant 0 : index
    %c0_11 = arith.constant 0 : index
    %15 = vector.load %arg6[%c0_9, %c0_10, %c0_11] : memref<1x64x128xf32, #tpu.memory_space<vmem>>, vector<1x64x128xf32>
    tpu.vector_store %arg6[%c0_9, %c0_10, %c0_11], %14 {strides = array<i32>} : memref<1x64x128xf32, #tpu.memory_space<vmem>>, vector<1x64x128xf32>,
    return
  }
  func.func @transform_0(%arg0: i32, %arg1: i32) -> (i32, i32, i32) {
    %c0_i32 = arith.constant 0 : i32
    %c0_i32_0 = arith.constant 0 : i32
    return %arg0, %arg1, %c0_i32 : i32, i32, i32
  }
  func.func @transform_1(%arg0: i32, %arg1: i32) -> (i32, i32, i32) {
    %c0_i32 = arith.constant 0 : i32
    %c0_i32_0 = arith.constant 0 : i32
    return %arg0, %arg1, %c0_i32 : i32, i32, i32
  }
  func.func @transform_2(%arg0: i32, %arg1: i32) -> (i32, i32) {
    %c0_i32 = arith.constant 0 : i32
    %c0_i32_0 = arith.constant 0 : i32
    %c0_i32_1 = arith.constant 0 : i32
    return %c0_i32, %c0_i32_0 : i32, i32
  }
  func.func @transform_3(%arg0: i32, %arg1: i32) -> (i32, i32) {
    %c0_i32 = arith.constant 0 : i32
    %c0_i32_0 = arith.constant 0 : i32
    %c0_i32_1 = arith.constant 0 : i32
    return %c0_i32, %c0_i32_0 : i32, i32
  }
  func.func @transform_4(%arg0: i32, %arg1: i32) -> (i32, i32, i32) {
    %c0_i32 = arith.constant 0 : i32
    %c0_i32_0 = arith.constant 0 : i32
    return %arg0, %arg1, %c0_i32 : i32, i32, i32
  }
}

</mosaic_0001>

<bundles_post_ra>
// kernel: downblock_forward.7
= control target key start
LH: loop header
LB: loop body
LE: loop exit
PB: predicated region body
PF: predicated region fallthrough
CT: control target
= control target key end

     0   :  { %s532_s12 = smov 0   ;;  %s534_s13 = smov 0   ;;  %s578_s0 = inlined_call_operand.vmem [shape: bf16[2,64,128], index: 0, kind: input, shape index: {}]   ;;  %s579_s1 = inlined_call_operand.vmem [shape: f32[1,128], index: 1, kind: input, shape index: {}]   ;;  %s580_s2 = inlined_call_operand.vmem [shape: f32[1,128], index: 2, kind: input, shape index: {}]   ;;  %s581_s3 = inlined_call_operand.vmem [shape: bf16[2,64,128], index: 3, kind: output, shape index: {}]  }
   0x1   :  { %s536_s14 = smov 0  }
   0x2 LB: > { %s25_s15 = sadd.s32 1, %s506_s13  ;;  %p395_p0 = scmp.ge.s32.totalorder %s510_s14, 1  ;;  %s510_s14 = sphi %s536_s14, %s13_s14   ;;  %s506_s13 = sphi %s534_s13, %s583_s13   ;;  %s502_s12 = sphi %s532_s12, %s582_s12  }
   0x3   : > { %p27_p1 = scmp.ge.s32.totalorder %s25_s15, 2  ;;  %p158_p2 = scmp.lt.s32.totalorder %s510_s14, 3 }
   0x5   : > { %s585_s15 = smov (%p27_p1, %s25_s15), 0  ;;  %p159_p3 = pnand %p395_p0, %p158_p2 }
   0x6   : > { %p191_p4 = scmp.lt.s32.totalorder (!%p159_p3), %s502_s12, 1  ;;  %v400_v0 = vld [vmem:[%s579_s1] ss:$0 sm:$0xff] (!%p159_p3) }
   0x7   : > { %162 = sbr.rel (%p159_p3) target bundleno = 30 (0x1e), region = 32  ;;  %v401_v9 = vld [vmem:[%s580_s2] ss:$0 sm:$0xff] (!%p159_p3) }
   0xe   : > { %s587_s12 = smov (!%p191_p4, %s502_s12), 1 }
   0xf   : > { %s412_s16 = sshll.u32 %s587_s12, 5 }
  0x10   : > { %s198_s19 = scalar_lea.vmem %s578_s0, %s412_s16  ;;  %s208_s26 = scalar_lea.vmem %s581_s3, %s412_s16 }
  0x11   : > { %v423_v1 = vld [vmem:[%s198_s19] sm:$0xff]   ;;  %v458_v2 = vld [vmem:[%s198_s19 + $0x8] sm:$0xff]   ;;  %v459_v3 = vld [vmem:[%s198_s19 + $0x10] sm:$0xff]  }
  0x12   : > { %v424_v4 = vunpack.c.l.bf16 %v423_v1  ;;  %v425_v5 = vunpack.c.h.bf16 %v423_v1  ;;  %v428_v6 = vunpack.c.l.bf16 %v458_v2  ;;  %v429_v7 = vunpack.c.h.bf16 %v458_v2  ;;  %v460_v8 = vld [vmem:[%s198_s19 + $0x18] sm:$0xff]  }
  0x13   : > { %v432_v10 = vunpack.c.l.bf16 %v459_v3  ;;  %v433_v11 = vunpack.c.h.bf16 %v459_v3  ;;  %v436_v12 = vunpack.c.l.bf16 %v460_v8  ;;  %v437_v13 = vunpack.c.h.bf16 %v460_v8 }
  0x14   : > { %v233_v14 = vmul.f32 %v424_v4, %v400_v0  ;;  %v234_v15 = vmul.f32 %v425_v5, %v400_v0  ;;  %v235_v16 = vmul.f32 %v428_v6, %v400_v0  ;;  %v236_v17 = vmul.f32 %v429_v7, %v400_v0 }
  0x15   : > { %v237_v18 = vmul.f32 %v432_v10, %v400_v0  ;;  %v238_v19 = vmul.f32 %v433_v11, %v400_v0  ;;  %v239_v20 = vmul.f32 %v436_v12, %v400_v0  ;;  %v240_v21 = vmul.f32 %v437_v13, %v400_v0 }
  0x16   : > { %v248_v22 = vadd.f32 %v401_v9, %v233_v14  ;;  %v249_v23 = vadd.f32 %v401_v9, %v234_v15  ;;  %v250_v24 = vadd.f32 %v401_v9, %v235_v16  ;;  %v251_v25 = vadd.f32 %v401_v9, %v236_v17 }
  0x17   : > { %v252_v26 = vadd.f32 %v401_v9, %v237_v18  ;;  %v253_v27 = vadd.f32 %v401_v9, %v238_v19  ;;  %v254_v28 = vadd.f32 %v401_v9, %v239_v20  ;;  %v255_v29 = vadd.f32 %v401_v9, %v240_v21 }
  0x18   : > { %v256_v30 = vmax.f32 %v248_v22, 0.0  ;;  %v257_v31 = vmax.f32 %v249_v23, 0.0  ;;  %v258_v32 = vmax.f32 %v250_v24, 0.0  ;;  %v259_v33 = vmax.f32 %v251_v25, 0.0 }
  0x19   : > { %v260_v34 = vmax.f32 %v252_v26, 0.0  ;;  %v261_v35 = vmax.f32 %v253_v27, 0.0  ;;  %v262_v36 = vmax.f32 %v254_v28, 0.0  ;;  %v263_v37 = vmax.f32 %v255_v29, 0.0 }
  0x1a   : > { %v441_v38 = vpack.c.bf16 %v257_v31, %v256_v30  ;;  %v446_v39 = vpack.c.bf16 %v259_v33, %v258_v32 }
  0x1b   : > { %v451_v40 = vpack.c.bf16 %v261_v35, %v260_v34  ;;  %v456_v41 = vpack.c.bf16 %v263_v37, %v262_v36 }
  0x1c   : > { %442 = vst [vmem:[%s208_s26] sm:$0xff] %v441_v38   ;;  %461 = vst [vmem:[%s208_s26 + $0x8] sm:$0xff] %v446_v39  }
  0x1d   : > { %462 = vst [vmem:[%s208_s26 + $0x10] sm:$0xff] %v451_v40   ;;  %463 = vst [vmem:[%s208_s26 + $0x18] sm:$0xff] %v456_v41  }
  0x1e PF: > { %s13_s14 = sadd.s32 1, %s510_s14   ;;  %s582_s12 = smov %s506_s13 }
  0x1f   : > { %p10_p5 = scmp.ge.s32.totalorder %s13_s14, 4   ;;  %s583_s13 = smov %s585_s15 }
  0x21   :  { %12 = sbr.rel (!%p10_p5) target bundleno = 2 (0x2), region = 62 }

// kernel: downblock_forward.11
= control target key start
LH: loop header
LB: loop body
LE: loop exit
PB: predicated region body
PF: predicated region fallthrough
CT: control target
= control target key end

     0   :  { %s593_s15 = smov 0   ;;  %s595_s16 = smov 0   ;;  %s639_s0 = inlined_call_operand.vmem [shape: bf16[2,64,128], index: 0, kind: input, shape index: {}]   ;;  %s640_s1 = inlined_call_operand.vmem [shape: bf16[2,64,128], index: 1, kind: input, shape index: {}]   ;;  %s641_s2 = inlined_call_operand.vmem [shape: f32[1,128], index: 2, kind: input, shape index: {}]   ;;  %s642_s3 = inlined_call_operand.vmem [shape: f32[1,128], index: 3, kind: input, shape index: {}]   ;;  %s643_s4 = inlined_call_operand.vmem [shape: f32[2,64,128], index: 4, kind: output, shape index: {}]  }
   0x1   :  { %s597_s17 = smov 0  }
   0x2 LB: > { %s26_s18 = sadd.s32 1, %s562_s16  ;;  %p468_p0 = scmp.ge.s32.totalorder %s566_s17, 1  ;;  %s566_s17 = sphi %s597_s17, %s14_s17   ;;  %s562_s16 = sphi %s595_s16, %s645_s16   ;;  %s558_s15 = sphi %s593_s15, %s644_s15  }
   0x3   : > { %p28_p1 = scmp.ge.s32.totalorder %s26_s18, 2  ;;  %p200_p2 = scmp.lt.s32.totalorder %s566_s17, 3 }
   0x5   : > { %s647_s18 = smov (%p28_p1, %s26_s18), 0  ;;  %p201_p3 = pnand %p468_p0, %p200_p2 }
   0x6   : > { %p244_p4 = scmp.lt.s32.totalorder (!%p201_p3), %s558_s15, 1  ;;  %v475_v0 = vld [vmem:[%s641_s2] ss:$0 sm:$0xff] (!%p201_p3) }
   0x7   : > { %204 = sbr.rel (%p201_p3) target bundleno = 36 (0x24), region = 36  ;;  %v476_v11 = vld [vmem:[%s642_s3] ss:$0 sm:$0xff] (!%p201_p3) }
   0xe   : > { %s649_s15 = smov (!%p244_p4, %s558_s15), 1 }
   0xf   : > { %s479_s19 = sshll.u32 %s649_s15, 5  ;;  %s481_s30 = sshll.u32 %s649_s15, 6 }
  0x10   : > { %s251_s22 = scalar_lea.vmem %s639_s0, %s479_s19  ;;  %s261_s25 = scalar_lea.vmem %s640_s1, %s479_s19 }
  0x11   : > { %v483_v1 = vld [vmem:[%s251_s22] sm:$0xff]   ;;  %v514_v3 = vld [vmem:[%s251_s22 + $0x8] sm:$0xff]   ;;  %v515_v9 = vld [vmem:[%s251_s22 + $0x10] sm:$0xff]   ;;  %s271_s7 = scalar_lea.vmem %s643_s4, %s481_s30 }
  0x12   : > { %v499_v2 = vld [vmem:[%s261_s25] sm:$0xff]   ;;  %v484_v4 = vunpack.c.l.bf16 %v483_v1  ;;  %v485_v6 = vunpack.c.h.bf16 %v483_v1  ;;  %v517_v8 = vld [vmem:[%s261_s25 + $0x8] sm:$0xff]   ;;  %v518_v10 = vld [vmem:[%s261_s25 + $0x10] sm:$0xff]   ;;  %v488_v12 = vunpack.c.l.bf16 %v514_v3  ;;  %v489_v14 = vunpack.c.h.bf16 %v514_v3 }
  0x13   : > { %v500_v5 = vunpack.c.l.bf16 %v499_v2  ;;  %v501_v7 = vunpack.c.h.bf16 %v499_v2  ;;  %v504_v13 = vunpack.c.l.bf16 %v517_v8  ;;  %v505_v15 = vunpack.c.h.bf16 %v517_v8  ;;  %v516_v16 = vld [vmem:[%s251_s22 + $0x18] sm:$0xff]  }
  0x14   : > { %v296_v17 = vmul.f32 %v484_v4, %v475_v0  ;;  %v297_v18 = vmul.f32 %v485_v6, %v475_v0  ;;  %v492_v19 = vunpack.c.l.bf16 %v515_v9  ;;  %v508_v20 = vunpack.c.l.bf16 %v518_v10  ;;  %v519_v21 = vld [vmem:[%s261_s25 + $0x18] sm:$0xff]  }
  0x15   : > { %v298_v22 = vmul.f32 %v488_v12, %v475_v0  ;;  %v299_v23 = vmul.f32 %v489_v14, %v475_v0  ;;  %v493_v24 = vunpack.c.h.bf16 %v515_v9  ;;  %v509_v25 = vunpack.c.h.bf16 %v518_v10 }
  0x16   : > { %v311_v26 = vadd.f32 %v476_v11, %v296_v17  ;;  %v312_v27 = vadd.f32 %v476_v11, %v297_v18  ;;  %v300_v28 = vmul.f32 %v492_v19, %v475_v0  ;;  %v496_v29 = vunpack.c.l.bf16 %v516_v16 }
  0x17   : > { %v313_v30 = vadd.f32 %v476_v11, %v298_v22  ;;  %v314_v31 = vadd.f32 %v476_v11, %v299_v23  ;;  %v301_v32 = vmul.f32 %v493_v24, %v475_v0  ;;  %v512_v33 = vunpack.c.l.bf16 %v519_v21 }
  0x18   : > { %v335_v34 = vadd.f32 %v500_v5, %v311_v26  ;;  %v336_v35 = vadd.f32 %v501_v7, %v312_v27  ;;  %v315_v36 = vadd.f32 %v476_v11, %v300_v28  ;;  %v302_v37 = vmul.f32 %v496_v29, %v475_v0 }
  0x19   : > { %v337_v38 = vadd.f32 %v504_v13, %v313_v30  ;;  %v338_v39 = vadd.f32 %v505_v15, %v314_v31  ;;  %v316_v40 = vadd.f32 %v476_v11, %v301_v32  ;;  %v497_v41 = vunpack.c.h.bf16 %v516_v16 }
  0x1a   : > { %v343_v42 = vmax.f32 %v335_v34, 0.0  ;;  %v344_v43 = vmax.f32 %v336_v35, 0.0  ;;  %v339_v44 = vadd.f32 %v508_v20, %v315_v36  ;;  %v317_v45 = vadd.f32 %v476_v11, %v302_v37 }
  0x1b   : > { %v345_v46 = vmax.f32 %v337_v38, 0.0  ;;  %v346_v47 = vmax.f32 %v338_v39, 0.0  ;;  %v340_v48 = vadd.f32 %v509_v25, %v316_v40  ;;  %v303_v49 = vmul.f32 %v497_v41, %v475_v0 }
  0x1c   : > { %351 = vst [vmem:[%s271_s7] sm:$0xff] %v343_v42  ;;  %352 = vst [vmem:[%s271_s7 + $0x8] sm:$0xff] %v344_v43  ;;  %v347_v50 = vmax.f32 %v339_v44, 0.0  ;;  %v341_v51 = vadd.f32 %v512_v33, %v317_v45  ;;  %v513_v52 = vunpack.c.h.bf16 %v519_v21 }
  0x1d   : > { %353 = vst [vmem:[%s271_s7 + $0x10] sm:$0xff] %v345_v46  ;;  %354 = vst [vmem:[%s271_s7 + $0x18] sm:$0xff] %v346_v47  ;;  %v348_v53 = vmax.f32 %v340_v48, 0.0  ;;  %v318_v54 = vadd.f32 %v476_v11, %v303_v49 }
  0x1e   : > { %355 = vst [vmem:[%s271_s7 + $0x20] sm:$0xff] %v347_v50  ;;  %v349_v55 = vmax.f32 %v341_v51, 0.0 }
  0x1f   : > { %356 = vst [vmem:[%s271_s7 + $0x28] sm:$0xff] %v348_v53  ;;  %v342_v56 = vadd.f32 %v513_v52, %v318_v54 }
  0x20   : > { %357 = vst [vmem:[%s271_s7 + $0x30] sm:$0xff] %v349_v55 }
  0x21   : > { %v350_v57 = vmax.f32 %v342_v56, 0.0 }
  0x23   : > { %358 = vst [vmem:[%s271_s7 + $0x38] sm:$0xff] %v350_v57 }
  0x24 PF: > { %s14_s17 = sadd.s32 1, %s566_s17   ;;  %s644_s15 = smov %s562_s16 }
  0x25   : > { %p11_p5 = scmp.ge.s32.totalorder %s14_s17, 4   ;;  %s645_s16 = smov %s647_s18 }
  0x27   :  { %13 = sbr.rel (!%p11_p5) target bundleno = 2 (0x2), region = 69 }

// kernel: downblock_forward.6
= control target key start
LH: loop header
LB: loop body
LE: loop exit
PB: predicated region body
PF: predicated region fallthrough
CT: control target
= control target key end

     0   :  { %s1877_s18 = smov 0   ;;  %s2446_s0 = inlined_call_operand.vmem [shape: bf16[2,8,2,8,8], index: 0, kind: input, shape index: {}]   ;;  %s2447_s1 = inlined_call_operand.vmem [shape: bf16[2,8,2,8,8], index: 1, kind: input, shape index: {}]   ;;  %s2448_s2 = inlined_call_operand.vmem [shape: bf16[72,128], index: 2, kind: input, shape index: {}]   ;;  %s2449_s3 = inlined_call_operand.vmem [shape: bf16[2,64,128], index: 3, kind: output, shape index: {0}]   ;;  %s2450_s4 = inlined_call_operand.vmem [shape: f32[2,1,128], index: 4, kind: output, shape index: {1}]   ;;  %s2451_s5 = inlined_call_operand.vmem [shape: f32[2,1,128], index: 5, kind: output, shape index: {2}]  }
   0x1 LB: > { %s1616_s19 = sadd.s32 4294967295, %s1836_s18   ;;  %p1620_p0 = scmp.ge.s32.totalorder %s1836_s18, 1  ;;  %s1836_s18 = sphi %s1877_s18, %s16_s18  }
   0x2   : > { %p202_p1 = scmp.lt.s32.totalorder %s1836_s18, 3 }
   0x4   : > { %p203_p2 = pnand %p1620_p0, %p202_p1 }
   0x5   : > { %p1885_p3 = scmp.lt.s32.totalorder (!%p203_p2), %s1616_s19, 1  ;;  %vm321_vm0 = vcmask (!%p203_p2), 60416   ;;  %v1838_v0 = vmov (!%p203_p2), 0   ;;  %vm323_vm1 = vcmask (!%p203_p2), 57344   ;;  %vm425_vm2 = vsmask.f32 (!%p203_p2), 7938 }
   0x6   : > { %206 = sbr.rel (%p203_p2) target bundleno = 488 (0x1e8), region = 32  ;;  %329 = vst.msk [vmem:[#allocation2 + $0x18] sm:$0xf] (!%p203_p2), %vm321_vm0, %v1838_v0  ;;  %331 = vst.msk [vmem:[#allocation2 + $0x20] sm:$0xf] (!%p203_p2), %vm321_vm0, %v1838_v0  ;;  %vm633_vm4 = vcmask (!%p203_p2), 1042432  }
   0x7   : > { %322 = vst.msk [vmem:[#allocation2] sm:$0xf] (!%p203_p2), %vm321_vm0, %v1838_v0  ;;  %325 = vst.msk [vmem:[#allocation2 + $0x8] sm:$0xf] (!%p203_p2), %vm321_vm0, %v1838_v0  ;;  %vm431_vm3 = vsmask.f32 (!%p203_p2), 256 }
   0x8   : > { %327 = vst.msk [vmem:[#allocation2 + $0x10] sm:$0xf] (!%p203_p2), %vm321_vm0, %v1838_v0  ;;  %333 = vst.msk [vmem:[#allocation2 + $0x28] sm:$0xf] (!%p203_p2), %vm321_vm0, %v1838_v0  ;;  %vm634_vm5 = vcmask (!%p203_p2), 1046532   ;;  %s1839_s28 = smov (!%p203_p2), 24  }
   0x9   : > { %335 = vst.msk [vmem:[#allocation2 + $0x30] sm:$0xf] (!%p203_p2), %vm321_vm0, %v1838_v0  ;;  %337 = vst.msk [vmem:[#allocation2 + $0x38] sm:$0xf] (!%p203_p2), %vm321_vm0, %v1838_v0  ;;  %s1840_s29 = smov (!%p203_p2), 48   ;;  %s1841_s7 = smov (!%p203_p2), 40  }
   0xa   : > { %339 = vst.msk [vmem:[#allocation2 + $0x40] sm:$0xf] (!%p203_p2), %vm321_vm0, %v1838_v0  ;;  %341 = vst.msk [vmem:[#allocation2 + $0x48] sm:$0xf] (!%p203_p2), %vm321_vm0, %v1838_v0  ;;  %vm494_vm9 = vsmask.f32 (!%p203_p2), 3328 }
   0xb   : > { %326 = vst.msk [vmem:[#allocation2 + $0xc] sm:$0x1] (!%p203_p2), %vm323_vm1, %v1838_v0  ;;  %328 = vst.msk [vmem:[#allocation2 + $0x14] sm:$0x1] (!%p203_p2), %vm323_vm1, %v1838_v0  ;;  %vm495_vm10 = vsmask.f32 (!%p203_p2), 7440 }
   0xc   : > { %324 = vst.msk [vmem:[#allocation2 + $0x4] sm:$0x1] (!%p203_p2), %vm323_vm1, %v1838_v0  ;;  %330 = vst.msk [vmem:[#allocation2 + $0x1c] sm:$0x1] (!%p203_p2), %vm323_vm1, %v1838_v0  ;;  %s1842_s8 = smov (!%p203_p2), 16   ;;  %s1843_s9 = smov (!%p203_p2), 64  }
   0xd   : > { %s2463_s19 = smov (!%p1885_p3, %s1616_s19), 1  ;;  %332 = vst.msk [vmem:[#allocation2 + $0x24] sm:$0x1] %vm323_vm1, %v1838_v0  ;;  %334 = vst.msk [vmem:[#allocation2 + $0x2c] sm:$0x1] %vm323_vm1, %v1838_v0  ;;  %s1844_s16 = smov 8  }
   0xe   : > { %336 = vst.msk [vmem:[#allocation2 + $0x34] sm:$0x1] %vm323_vm1, %v1838_v0  ;;  %338 = vst.msk [vmem:[#allocation2 + $0x3c] sm:$0x1] %vm323_vm1, %v1838_v0  ;;  %s1722_s21 = sshll.u32 %s2463_s19, 6  ;;  %s1845_s17 = smov 32  }
   0xf   : > { %340 = vst.msk [vmem:[#allocation2 + $0x44] sm:$0x1] %vm323_vm1, %v1838_v0  ;;  %342 = vst.msk [vmem:[#allocation2 + $0x4c] sm:$0x1] %vm323_vm1, %v1838_v0  ;;  %s1917_s24 = scalar_lea.vmem %s2446_s0, %s1722_s21  ;;  %s1922_s27 = scalar_lea.vmem %s2447_s1, %s1722_s21  ;;  %v442_v40 = vld [vmem:[#allocation2 + $0x18] sm:$0xf] }
  0x10   : > { %v265_v1 = vld [vmem:[%s1917_s24 + $0x10] sm:$0xf]  ;;  %v266_v2 = vld [vmem:[%s1917_s24 + $0x18] sm:$0xf]  ;;  %v1629_v3 = vld [vmem:[%s1917_s24 + $0x14] sm:$0xf] }
  0x11   : > { %v1630_v4 = vld [vmem:[%s1917_s24 + $0x1c] sm:$0xf]  ;;  %v282_v5 = vmax.bf16 %v1629_v3, %v265_v1  ;;  %v290_v6 = vld [vmem:[%s1922_s27 + $0x10] sm:$0xf]  ;;  %v291_v7 = vld [vmem:[%s1922_s27 + $0x18] sm:$0xf] }
  0x12   : > { %v283_v8 = vmax.bf16 %v1630_v4, %v266_v2  ;;  %v1637_v9 = vld [vmem:[%s1922_s27 + $0x14] sm:$0xf]  ;;  %v1638_v10 = vld [vmem:[%s1922_s27 + $0x1c] sm:$0xf]  ;;  %v263_v13 = vld [vmem:[%s1917_s24] sm:$0xf] }
  0x13   : > { %v307_v11 = vmax.bf16 %v1637_v9, %v290_v6  ;;  %v308_v12 = vmax.bf16 %v1638_v10, %v291_v7  ;;  %v264_v14 = vld [vmem:[%s1917_s24 + $0x8] sm:$0xf]  ;;  %v1627_v15 = vld [vmem:[%s1917_s24 + $0x4] sm:$0xf]  ;;  %v1628_v16 = vld [vmem:[%s1917_s24 + $0xc] sm:$0xf] }
  0x14   : > { %v288_v17 = vld [vmem:[%s1922_s27] sm:$0xf]  ;;  %v280_v20 = vmax.bf16 %v1627_v15, %v263_v13  ;;  %v281_v21 = vmax.bf16 %v1628_v16, %v264_v14  ;;  %v289_v22 = vld [vmem:[%s1922_s27 + $0x8] sm:$0xf]  ;;  %v1635_v23 = vld [vmem:[%s1922_s27 + $0x4] sm:$0xf] }
  0x15   : > { %v315_v18 = vmax.bf16 %v307_v11, %v282_v5  ;;  %v316_v19 = vmax.bf16 %v308_v12, %v283_v8  ;;  %v1636_v24 = vld [vmem:[%s1922_s27 + $0xc] sm:$0xf]  ;;  %v305_v25 = vmax.bf16 %v1635_v23, %v288_v17  ;;  %v267_v27 = vld [vmem:[%s1917_s24 + $0x20] sm:$0xf]  ;;  %v1631_v32 = vld [vmem:[%s1917_s24 + $0x24] sm:$0xf] }
  0x16   : > { %v306_v26 = vmax.bf16 %v1636_v24, %v289_v22  ;;  %v284_v35 = vmax.bf16 %v1631_v32, %v267_v27  ;;  %v292_v36 = vld [vmem:[%s1922_s27 + $0x20] sm:$0xf]  ;;  %v1639_v37 = vld [vmem:[%s1922_s27 + $0x24] sm:$0xf]  ;;  %vm1946_vm6 = vmand %vm321_vm0, %vm425_vm2  ;;  %s1846_s20 = smov 56   ;;  %vm1354_vm12 = vcmask 1043456  }
  0x17   : > { %v360_v28 = vshrl.u32 %v315_v18, 16  ;;  %v363_v29 = vshll.u32 %v315_v18, 16  ;;  %v368_v30 = vshrl.u32 %v316_v19, 16  ;;  %v371_v31 = vshll.u32 %v316_v19, 16  ;;  %v448_v41 = vld [vmem:[#allocation2 + $0x20] sm:$0xf]  ;;  %vm1954_vm7 = vmand %vm323_vm1, %vm431_vm3 }
  0x18   : > { %v313_v33 = vmax.bf16 %v305_v25, %v280_v20  ;;  %v314_v34 = vmax.bf16 %v306_v26, %v281_v21  ;;  %v309_v42 = vmax.bf16 %v1639_v37, %v292_v36  ;;  %v1950_v48 = vld [vmem:[#allocation2 + $0x4] sm:$0x1]  ;;  %v427_v53 = vld [vmem:[#allocation2 + $0x8] sm:$0xf]  ;;  %v436_v54 = vld [vmem:[#allocation2 + $0x10] sm:$0xf] }
  0x19   : > { %v362_v38 = vrot.slane %v360_v28, 7  ;;  %v370_v39 = vrot.slane %v368_v30, 7  ;;  %v433_v55 = vld [vmem:[#allocation2 + $0xc] sm:$0x1]  ;;  %v609_v56 = vld [vmem:[#allocation2] sm:$0xe]  ;;  %vm1970_vm8 = vmor %vm633_vm4, %vm634_vm5 }
  0x1a   : > { %v344_v44 = vshrl.u32 %v313_v33, 16  ;;  %v347_v45 = vshll.u32 %v313_v33, 16  ;;  %v352_v46 = vshrl.u32 %v314_v34, 16  ;;  %v355_v47 = vshll.u32 %v314_v34, 16  ;;  %v445_v57 = vld [vmem:[#allocation2 + $0x1c] sm:$0x1]  ;;  %vm2143_vm11 = vmor %vm494_vm9, %vm495_vm10 }
  0x1b   : > { %v365_v49 = vor.u32 %v363_v29, %v362_v38  ;;  %v366_v50 = vrot.slane %v362_v38, 4  ;;  %v373_v51 = vor.u32 %v371_v31, %v370_v39  ;;  %v374_v52 = vrot.slane %v370_v39, 4  ;;  %v451_v63 = vld [vmem:[#allocation2 + $0x24] sm:$0x1]  ;;  %v439_v2 = vld [vmem:[#allocation2 + $0x14] sm:$0x1] }
  0x1c   : > { %v346_v58 = vrot.slane %v344_v44, 7  ;;  %v354_v59 = vrot.slane %v352_v46, 7  ;;  %v317_v60 = vmax.bf16 %v309_v42, %v284_v35  ;;  %v1643_v62 = vrot.slane %v609_v56, 9  ;;  %v268_v5 = vld [vmem:[%s1917_s24 + $0x28] sm:$0xf]  ;;  %s1724_s23 = sshll.u32 %s2463_s19, 5 }
  0x1d   : > { %v443_v0 = vsel %vm1946_vm6, %v365_v49, %v442_v40  ;;  %v449_v1 = vsel %vm1946_vm6, %v373_v51, %v448_v41  ;;  %v638_v3 = vrot.slane %v1950_v48, 5  ;;  %v446_v4 = vsel %vm1954_vm7, %v366_v50, %v445_v57  ;;  %v269_v10 = vld [vmem:[%s1917_s24 + $0x30] sm:$0xf]  ;;  %v1632_v11 = vld [vmem:[%s1917_s24 + $0x2c] sm:$0xf]  ;;  %s255_s26 = scalar_lea.vmem %s2449_s3, %s1724_s23 }
  0x1e   : > { %444 = vst [vmem:[#allocation2 + $0x18] sm:$0xf] %v443_v0  ;;  %450 = vst [vmem:[#allocation2 + $0x20] sm:$0xf] %v449_v1  ;;  %v349_v6 = vor.u32 %v347_v45, %v346_v58  ;;  %v350_v7 = vrot.slane %v346_v58, 4  ;;  %v357_v8 = vor.u32 %v355_v47, %v354_v59  ;;  %v358_v9 = vrot.slane %v354_v59, 4 }
  0x1f   : > { %447 = vst [vmem:[#allocation2 + $0x1c] sm:$0x1] %v446_v4  ;;  %v376_v12 = vshrl.u32 %v317_v60, 16  ;;  %v379_v13 = vshll.u32 %v317_v60, 16  ;;  %v452_v15 = vsel %vm1954_vm7, %v374_v52, %v451_v63  ;;  %v1633_v16 = vld [vmem:[%s1917_s24 + $0x34] sm:$0xf]  ;;  %v285_v26 = vmax.bf16 %v1632_v11, %v268_v5 }
  0x20   : > { %v293_v17 = vld [vmem:[%s1922_s27 + $0x28] sm:$0xf]  ;;  %v428_v18 = vsel %vm1946_vm6, %v349_v6, %v427_v53  ;;  %v437_v19 = vsel %vm1946_vm6, %v357_v8, %v436_v54  ;;  %v434_v20 = vsel %vm1954_vm7, %v350_v7, %v433_v55  ;;  %v440_v21 = vsel %vm1954_vm7, %v358_v9, %v439_v2  ;;  %453 = vst [vmem:[#allocation2 + $0x24] sm:$0x1] %v452_v15  ;;  %v294_v22 = vld [vmem:[%s1922_s27 + $0x30] sm:$0xf] }
  0x21   : > { %v1640_v23 = vld [vmem:[%s1922_s27 + $0x2c] sm:$0xf]  ;;  %v1641_v24 = vld [vmem:[%s1922_s27 + $0x34] sm:$0xf]  ;;  %429 = vst [vmem:[#allocation2 + $0x8] sm:$0xf] %v428_v18  ;;  %v286_v27 = vmax.bf16 %v1633_v16, %v269_v10  ;;  %v1993_v35 = vsel %vm1970_vm8, %v1643_v62, %v638_v3 }
  0x22   : > { %438 = vst [vmem:[#allocation2 + $0x10] sm:$0xf] %v437_v19  ;;  %v378_v25 = vrot.slane %v376_v12, 7  ;;  %435 = vst [vmem:[#allocation2 + $0xc] sm:$0x1] %v434_v20  ;;  %v310_v28 = vmax.bf16 %v1640_v23, %v293_v17  ;;  %v311_v31 = vmax.bf16 %v1641_v24, %v294_v22  ;;  %v507_v42 = vshll.u32 %v1950_v48, 16 }
  0x23   : > { %441 = vst [vmem:[#allocation2 + $0x14] sm:$0x1] %v440_v21  ;;  %v454_v29 = vld [vmem:[#allocation2 + $0x28] sm:$0xf]  ;;  %v457_v30 = vld [vmem:[#allocation2 + $0x2c] sm:$0x1] }
  0x24   : > { %v1989_v32 = vld [vmem:[#allocation2] sm:$0xf]  ;;  %v381_v33 = vor.u32 %v379_v13, %v378_v25  ;;  %v382_v34 = vrot.slane %v378_v25, 4  ;;  %v1997_v37 = vld [vmem:[%s1917_s24 + $0x38] sm:$0xf]  ;;  %v2002_v39 = vmax.bf16 %v310_v28, %v285_v26  ;;  %v2004_v40 = vmax.bf16 %v311_v31, %v286_v27 }
  0x25   : > { %v498_v36 = vshrl.u32 %v1989_v32, 16  ;;  %v2000_v38 = vld [vmem:[%s1917_s24 + $0x3c] sm:$0xf]  ;;  %v501_v41 = vshll.u32 %v1989_v32, 16  ;;  %v2009_v44 = vld [vmem:[%s1922_s27 + $0x38] sm:$0xf] }
  0x26   : > { %v2012_v45 = vld [vmem:[%s1922_s27 + $0x3c] sm:$0xf]  ;;  %v670_v46 = vld [vmem:[#allocation2 + $0x18] sm:$0xf]  ;;  %v671_v47 = vld [vmem:[#allocation2 + $0x20] sm:$0xf]  ;;  %v455_v49 = vsel %vm1946_vm6, %v381_v33, %v454_v29  ;;  %v458_v51 = vsel %vm1954_vm7, %v382_v34, %v457_v30  ;;  %v287_v52 = vmax.bf16 %v2000_v38, %v1997_v37 }
  0x27   : > { %v2016_v50 = vld [vmem:[#allocation2 + $0x20] sm:$0xf]  ;;  %v312_v53 = vmax.bf16 %v2012_v45, %v2009_v44  ;;  %v727_v54 = vshrl.u32 %v671_v47, 16  ;;  %v730_v55 = vshll.u32 %v671_v47, 16  ;;  %v1680_v56 = vcombine.low %v670_v46, %v671_v47  ;;  %456 = vst [vmem:[#allocation2 + $0x28] sm:$0xf] %v455_v49 }
  0x28   : > { %v713_v57 = vshrl.u32 %v670_v46, 16  ;;  %v2024_v58 = vld [vmem:[#allocation2 + $0x18] sm:$0xf]  ;;  %459 = vst [vmem:[#allocation2 + $0x2c] sm:$0x1] %v458_v51  ;;  %v716_v59 = vshll.u32 %v670_v46, 16 }
  0x29   : > { %v898_v60 = vshrl.u32 %v2016_v50, 16  ;;  %v901_v62 = vshll.u32 %v2016_v50, 16  ;;  %v884_v63 = vshrl.u32 %v2024_v58, 16  ;;  %v729_v0 = vrot.slane %v727_v54, 4  ;;  %1119 = vrot.lane.b32.xlu1 %v1680_v56, %s1839_s28  ;;  %v668_v3 = vld [vmem:[#allocation2 + $0x8] sm:$0xf] }
  0x2a   : > { %v732_v1 = vrot.slane %v730_v55, 5  ;;  %v715_v2 = vrot.slane %v713_v57, 4  ;;  %v887_v4 = vshll.u32 %v2024_v58, 16  ;;  %v718_v5 = vrot.slane %v716_v59, 5  ;;  %v669_v6 = vld [vmem:[#allocation2 + $0x10] sm:$0xf] }
  0x2b   : > { %v685_v7 = vshrl.u32 %v668_v3, 16  ;;  %v688_v8 = vshll.u32 %v668_v3, 16  ;;  %v2031_v9 = vrot.slane %v898_v60, 4  ;;  %v699_v11 = vshrl.u32 %v669_v6, 16  ;;  %v853_v19 = vld [vmem:[#allocation2 + $0x10] sm:$0xf] }
  0x2c   : > { %v733_v10 = vor.u32 %v732_v1, %v729_v0  ;;  %v702_v12 = vshll.u32 %v669_v6, 16  ;;  %v1679_v13 = vcombine.low %v668_v3, %v669_v6  ;;  %v719_v15 = vor.u32 %v718_v5, %v715_v2  ;;  %v2038_v24 = vld [vmem:[#allocation2 + $0xc] sm:$0x1]  ;;  %v2040_v25 = vld [vmem:[#allocation2 + $0x14] sm:$0x1] }
  0x2d   : > { %v687_v16 = vrot.slane %v685_v7, 4  ;;  %v690_v17 = vrot.slane %v688_v8, 5  ;;  %v2033_v18 = vrot.slane %v901_v62, 5  ;;  %v701_v21 = vrot.slane %v699_v11, 4  ;;  %v796_v26 = vld [vmem:[#allocation2 + $0x8] sm:$0xe] }
  0x2e   : > { %v2035_v20 = vrot.slane %v733_v10, 4  ;;  %v704_v22 = vrot.slane %v702_v12, 5  ;;  %1117 = vrot.lane.b32.xlu0 %v1679_v13, %s1839_s28  ;;  %v870_v23 = vshrl.u32 %v853_v19, 16  ;;  %v2042_v27 = vrot.slane %v719_v15, 4  ;;  %v856_v29 = vld [vmem:[#allocation2 + $0x28] sm:$0xf] }
  0x2f   : > { %v691_v28 = vor.u32 %v690_v17, %v687_v16  ;;  %v873_v30 = vshll.u32 %v853_v19, 16  ;;  %v2044_v31 = vrot.slane %v884_v63, 4  ;;  %v912_v34 = vshrl.u32 %v856_v29, 16  ;;  %v797_v49 = vld [vmem:[#allocation2 + $0x10] sm:$0xe] }
  0x30   : > { %v705_v33 = vor.u32 %v704_v22, %v701_v21  ;;  %v915_v46 = vshll.u32 %v856_v29, 16  ;;  %v1692_v47 = vcombine.low %v2016_v50, %v856_v29  ;;  %v2047_v51 = vld [vmem:[#allocation2 + $0xc] sm:$0x1]  ;;  %v2049_v54 = vld [vmem:[#allocation2 + $0x1c] sm:$0x1]  ;;  %v2053_v56 = vrot.slane %v870_v23, 4 }
  0x31   : > { %v2051_v55 = vrot.slane %v691_v28, 4  ;;  %v2055_v57 = vrot.slane %v873_v30, 5  ;;  %v2057_v59 = vrot.slane %v887_v4, 5  ;;  %v610_v60 = vld [vmem:[#allocation2 + $0x8] sm:$0xe]  ;;  %v2061_v63 = vrot.slane %v912_v34, 4 }
  0x32   : > { %v2059_v62 = vrot.slane %v705_v33, 4  ;;  %v2063_v0 = vrot.slane %v915_v46, 5  ;;  %1187 = vrot.lane.b32.xlu1 %v1692_v47, %s1840_s29  ;;  %v1691_v50 = vcombine.low %v853_v19, %v2024_v58  ;;  %v2067_v1 = vld [vmem:[#allocation2 + $0x14] sm:$0x1]  ;;  %v1651_v2 = vrot.slane %v796_v26, 9  ;;  %v1820_v30 = vld [vmem:[%s2448_s2] sm:$0xff]  }
  0x33   : > { %v822_v3 = vrot.slane %v2038_v24, 5  ;;  %v1652_v5 = vrot.slane %v797_v49, 9  ;;  %v826_v4 = vrot.slane %v2040_v25, 5  ;;  %v981_v6 = vld [vmem:[#allocation2 + $0x10] sm:$0xe]  ;;  %v1644_v7 = vrot.slane %v610_v60, 9  ;;  %1765 = vmatprep.subr.bf16.mxu0 %v1820_v30  ;;  %1783 = vmatprep.subr.bf16.mxu1 %v1820_v30 }
  0x34   : > { %1185 = vrot.lane.b32.xlu0 %v1691_v50, %s1840_s29  ;;  %v642_v8 = vrot.slane %v2047_v51, 5  ;;  %v982_v10 = vld [vmem:[#allocation2 + $0x18] sm:$0xe]  ;;  %v1659_v11 = vrot.slane %v981_v6, 9  ;;  %v1007_v12 = vrot.slane %v2067_v1, 5  ;;  %v1011_v16 = vrot.slane %v2049_v54, 5  ;;  %1766 = vmatpush3.bf16.msra.mxu0 %v1820_v30 }
  0x35   : > { %v823_v58 = vsel %vm1970_vm8, %v1651_v2, %v822_v3  ;;  %v827_v13 = vsel %vm1970_vm8, %v1652_v5, %v826_v4  ;;  %v1660_v15 = vrot.slane %v982_v10, 9  ;;  %v2079_v17 = vld [vmem:[#allocation2 + $0x14] sm:$0x1]  ;;  %v2081_v19 = vld [vmem:[#allocation2 + $0x1c] sm:$0x1]  ;;  %1788 = vmatpush3.bf16.msra.mxu1 %v1820_v30  ;;  %vm1233_vm13 = vcmask 64512  }
  0x36   : > { %v1687_v21 = vcombine.low %v823_v58, %v827_v13  ;;  %v643_v22 = vsel %vm1970_vm8, %v1644_v7, %v642_v8  ;;  %v1008_v23 = vsel %vm1970_vm8, %v1659_v11, %v1007_v12  ;;  %v611_v26 = vld [vmem:[#allocation2 + $0x10] sm:$0xe]  ;;  %v612_v28 = vld [vmem:[#allocation2 + $0x18] sm:$0xe]  ;;  %v646_v29 = vrot.slane %v2079_v17, 5 }
  0x37   : > { %v1675_v33 = vcombine.low %v1993_v35, %v643_v22  ;;  %v1012_v34 = vsel %vm1970_vm8, %v1660_v15, %v1011_v16  ;;  %v1645_v46 = vrot.slane %v611_v26, 9  ;;  %v1646_v47 = vrot.slane %v612_v28, 9  ;;  %v2094_v49 = vld [vmem:[#allocation2 + $0x24] sm:$0x1]  ;;  %v2096_v60 = vld [vmem:[#allocation2 + $0x2c] sm:$0x1] }
  0x38   : > { %1157 = vrot.lane.b32.xlu0 %v1687_v21, %s1841_s7  ;;  %v1699_v50 = vcombine.low %v1008_v23, %v1012_v34  ;;  %v650_v2 = vrot.slane %v2081_v19, 5  ;;  %v983_v3 = vld [vmem:[#allocation2 + $0x20] sm:$0xe]  ;;  %v984_v5 = vld [vmem:[#allocation2 + $0x28] sm:$0xe]  ;;  %v1015_v4 = vrot.slane %v2094_v49, 5  ;;  %v904_v35 = vor.u32 %v2033_v18, %v2031_v9 }
  0x39   : > { %1089 = vrot.lane.b32.xlu1 %v1675_v33, %s1842_s8  ;;  %v647_v6 = vsel %vm1970_vm8, %v1645_v46, %v646_v29  ;;  %v1661_v7 = vrot.slane %v983_v3, 9  ;;  %v1662_v8 = vrot.slane %v984_v5, 9  ;;  %v1019_v10 = vrot.slane %v2096_v60, 5  ;;  %v678_v11 = vld [vmem:[#allocation2 + $0x1c] sm:$0x1] }
  0x3a   : > { %v651_v12 = vsel %vm1970_vm8, %v1646_v47, %v650_v2  ;;  %v679_v58 = vld [vmem:[#allocation2 + $0x24] sm:$0x1]  ;;  %v798_v13 = vld [vmem:[#allocation2 + $0x18] sm:$0xe]  ;;  %v799_v15 = vld [vmem:[#allocation2 + $0x20] sm:$0xe]  ;;  %v918_v16 = vor.u32 %v2063_v0, %v2061_v63  ;;  %v876_v21 = vor.u32 %v2055_v57, %v2053_v56 }
  0x3b   : > { %v1676_v23 = vcombine.low %v647_v6, %v651_v12  ;;  %v1016_v26 = vsel %vm1970_vm8, %v1661_v7, %v1015_v4  ;;  %v1020_v28 = vsel %vm1970_vm8, %v1662_v8, %v1019_v10  ;;  %v1653_v29 = vrot.slane %v798_v13, 9  ;;  %v2119_v33 = vld [vmem:[#allocation2 + $0x24] sm:$0x1]  ;;  %v2121_v34 = vld [vmem:[#allocation2 + $0x2c] sm:$0x1] }
  0x3c   : > { %1225 = vrot.lane.b32.xlu0 %v1699_v50, %s1843_s9  ;;  %v1700_v46 = vcombine.low %v1016_v26, %v1020_v28  ;;  %v830_v47 = vrot.slane %v678_v11, 5  ;;  %v1654_v2 = vrot.slane %v799_v15, 9  ;;  %v834_v3 = vrot.slane %v679_v58, 5  ;;  %v613_v5 = vld [vmem:[#allocation2 + $0x20] sm:$0xe] }
  0x3d   : > { %1091 = vrot.lane.b32.xlu1 %v1676_v23, %s1842_s8  ;;  %v614_v4 = vld [vmem:[#allocation2 + $0x28] sm:$0xe]  ;;  %v1647_v6 = vrot.slane %v613_v5, 9  ;;  %v654_v7 = vrot.slane %v2119_v33, 5  ;;  %v658_v8 = vrot.slane %v2121_v34, 5  ;;  %v384_v10 = vshrl.u32 %v2002_v39, 16 }
  0x3e   : > { %v831_v30 = vsel %vm1970_vm8, %v1653_v29, %v830_v47  ;;  %v835_v50 = vsel %vm1970_vm8, %v1654_v2, %v834_v3  ;;  %v1648_v12 = vrot.slane %v614_v4, 9  ;;  %v387_v13 = vshll.u32 %v2002_v39, 16  ;;  %v460_v5 = vld [vmem:[#allocation2 + $0x30] sm:$0xf]  ;;  %v463_v47 = vld [vmem:[#allocation2 + $0x34] sm:$0x1] }
  0x3f   : > { %v1688_v15 = vcombine.low %v831_v30, %v835_v50  ;;  %v655_v23 = vsel %vm1970_vm8, %v1647_v6, %v654_v7  ;;  %v386_v26 = vrot.slane %v384_v10, 7  ;;  %v392_v28 = vshrl.u32 %v2004_v40, 16  ;;  %v466_v7 = vld [vmem:[#allocation2 + $0x38] sm:$0xf]  ;;  %v469_v10 = vld [vmem:[#allocation2 + $0x3c] sm:$0x1] }
  0x40   : > { %1227 = vrot.lane.b32.xlu0 %v1700_v46, %s1843_s9  ;;  %v659_v22 = vsel %vm1970_vm8, %v1648_v12, %v658_v8  ;;  %v395_v29 = vshll.u32 %v2004_v40, 16  ;;  %v722_v2 = vshll.u32 %v678_v11, 16  ;;  %v736_v3 = vshll.u32 %v679_v58, 16  ;;  %v2147_v40 = vld [vmem:[#allocation2 + $0x8] sm:$0xf] }
  0x41   : > { %1159 = vrot.lane.b32.xlu1 %v1688_v15, %s1841_s7  ;;  %v1677_v39 = vcombine.low %v655_v23, %v659_v22  ;;  %v389_v4 = vor.u32 %v387_v13, %v386_v26  ;;  %v390_v30 = vrot.slane %v386_v26, 4  ;;  %v394_v6 = vrot.slane %v392_v28, 7  ;;  %v2227_v37 = vld [vmem:[#allocation2 + $0x28] sm:$0xf] }
  0x42   : > { %v724_v8 = vrot.slane %v722_v2, 5  ;;  %v738_v50 = vrot.slane %v736_v3, 5  ;;  %v500_v11 = vrot.slane %v498_v36, 4  ;;  %v503_v58 = vrot.slane %v501_v41, 5 }
  0x43   : > { %v397_v22 = vor.u32 %v395_v29, %v394_v6  ;;  %v398_v12 = vrot.slane %v394_v6, 4  ;;  %v461_v13 = vsel %vm1946_vm6, %v389_v4, %v460_v5  ;;  %v464_v15 = vsel %vm1954_vm7, %v390_v30, %v463_v47  ;;  %v2173_v47 = vld [vmem:[#allocation2 + $0x10] sm:$0xf]  ;;  %v2188_v6 = vld [vmem:[#allocation2 + $0x18] sm:$0xf] }
  0x44   : > { %1093 = vrot.lane.b32.xlu0 %v1677_v39, %s1842_s8  ;;  %462 = vst [vmem:[#allocation2 + $0x30] sm:$0xf] %v461_v13  ;;  %465 = vst [vmem:[#allocation2 + $0x34] sm:$0x1] %v464_v15  ;;  %v725_v23 = vsel %vm2143_vm11, %v2042_v27, %v724_v8  ;;  %v739_v32 = vsel %vm2143_vm11, %v2035_v20, %v738_v50  ;;  %v504_v36 = vor.u32 %v503_v58, %v500_v11  ;;  %v1821_v20 = vld [vmem:[%s2448_s2 + $0x8] sm:$0xff]   ;;  %vm1246_vm14 = vcmask 130048  }
  0x45   : > { %v509_v41 = vrot.slane %v507_v42, 5  ;;  %v467_v26 = vsel %vm1946_vm6, %v397_v22, %v466_v7  ;;  %v470_v28 = vsel %vm1954_vm7, %v398_v12, %v469_v10  ;;  %v2170_v5 = vcombine.low %v725_v23, %v739_v32  ;;  %1767 = vmatprep.subr.bf16.mxu0 %v1821_v20  ;;  %1784 = vmatprep.subr.bf16.mxu1 %v1821_v20 }
  0x46   : > { %v512_v29 = vshrl.u32 %v2147_v40, 16  ;;  %468 = vst [vmem:[#allocation2 + $0x38] sm:$0xf] %v467_v26  ;;  %471 = vst [vmem:[#allocation2 + $0x3c] sm:$0x1] %v470_v28  ;;  %v505_v48 = vrot.slane %v504_v36, 4  ;;  %1768 = vmatpush3.bf16.msra.mxu0 %v1821_v20  ;;  %1789 = vmatpush3.bf16.msra.mxu1 %v1821_v20  ;;  %v1668_v46 = vcombine.low %v2173_v47, %v2188_v6 }
  0x47   : > { %v515_v42 = vshll.u32 %v2147_v40, 16  ;;  %v521_v27 = vshll.u32 %v2047_v51, 16  ;;  %v905_v2 = vrot.slane %v904_v35, 4  ;;  %v907_v39 = vshll.u32 %v2094_v49, 16 }
  0x48   : > { %v514_v3 = vrot.slane %v512_v29, 4  ;;  %v919_v4 = vrot.slane %v918_v16, 4  ;;  %v921_v30 = vshll.u32 %v2096_v60, 16  ;;  %v510_v51 = vsel %vm2143_vm11, %v505_v48, %v509_v41  ;;  %v1823_v60 = vld [vmem:[%s2448_s2 + $0x10] sm:$0xff]   ;;  %v2209_v41 = vld [vmem:[#allocation2 + $0x20] sm:$0xf] }
  0x49   : > { %v517_v7 = vrot.slane %v515_v42, 5  ;;  %v523_v10 = vrot.slane %v521_v27, 5  ;;  %v526_v9 = vshrl.u32 %v2173_v47, 16  ;;  %v909_v18 = vrot.slane %v907_v39, 5  ;;  %1769 = vmatprep.subr.bf16.mxu0 %v1823_v60  ;;  %1785 = vmatprep.subr.bf16.mxu1 %v1823_v60 }
  0x4a   : > { %v923_v49 = vrot.slane %v921_v30, 5  ;;  %v529_v63 = vshll.u32 %v2173_v47, 16  ;;  %v535_v0 = vshll.u32 %v2079_v17, 16  ;;  %v540_v8 = vshrl.u32 %v2188_v6, 16  ;;  %1770 = vmatpush3.bf16.msra.mxu0 %v1823_v60  ;;  %1790 = vmatpush3.bf16.msra.mxu1 %v1823_v60 }
  0x4b   : > { %v518_v35 = vor.u32 %v517_v7, %v514_v3  ;;  %v528_v16 = vrot.slane %v526_v9, 4  ;;  %v543_v50 = vshll.u32 %v2188_v6, 16  ;;  %v2200_v11 = vld [vmem:[#allocation2 + $0x34] sm:$0x1]  ;;  %v615_v58 = vld [vmem:[#allocation2 + $0x30] sm:$0xe]  ;;  %v910_v22 = vsel %vm2143_vm11, %v905_v2, %v909_v18 }
  0x4c   : > { %v924_v12 = vsel %vm2143_vm11, %v919_v4, %v923_v49  ;;  %v531_v17 = vrot.slane %v529_v63, 5  ;;  %v537_v13 = vrot.slane %v535_v0, 5  ;;  %v1649_v15 = vrot.slane %v615_v58, 9 }
  0x4d   : > { %v662_v23 = vrot.slane %v2200_v11, 5  ;;  %v519_v32 = vrot.slane %v518_v35, 4  ;;  %v2207_v36 = vcombine.low %v910_v22, %v924_v12  ;;  %v2211_v26 = vld [vmem:[#allocation2 + $0x3c] sm:$0x1]  ;;  %v616_v28 = vld [vmem:[#allocation2 + $0x38] sm:$0xe]  ;;  %v2219_v42 = vmax.bf16 %v312_v53, %v287_v52 }
  0x4e   : > { %v532_v29 = vor.u32 %v531_v17, %v528_v16  ;;  %v542_v20 = vrot.slane %v540_v8, 4  ;;  %v545_v48 = vrot.slane %v543_v50, 5  ;;  %v1650_v2 = vrot.slane %v616_v28, 9  ;;  %v1825_v53 = vld [vmem:[%s2448_s2 + $0x18] sm:$0xff]   ;;  %v2241_v35 = vld [vmem:[#allocation2 + $0x30] sm:$0xf] }
  0x4f   : > { %v663_v27 = vsel %vm1970_vm8, %v1649_v15, %v662_v23  ;;  %v666_v3 = vrot.slane %v2211_v26, 5  ;;  %v524_v39 = vsel %vm2143_vm11, %v519_v32, %v523_v10  ;;  %v549_v9 = vshll.u32 %v2081_v19, 16  ;;  %1771 = vmatprep.subr.bf16.mxu0 %v1825_v53  ;;  %1786 = vmatprep.subr.bf16.mxu1 %v1825_v53  ;;  %v2282_v56 = vld [vmem:[#allocation2 + $0x38] sm:$0xf] }
  0x50   : > { %v1671_v4 = vcombine.low %v510_v51, %v524_v39  ;;  %v533_v30 = vrot.slane %v532_v29, 4  ;;  %v546_v7 = vor.u32 %v545_v48, %v542_v20  ;;  %v554_v44 = vshrl.u32 %v2209_v41, 16  ;;  %1772 = vmatpush3.bf16.msra.mxu0 %v1825_v53  ;;  %1791 = vmatpush3.bf16.msra.mxu1 %v1825_v53 }
  0x51   : > { %v667_v38 = vsel %vm1970_vm8, %v1650_v2, %v666_v3  ;;  %v557_v45 = vshll.u32 %v2209_v41, 16  ;;  %v563_v52 = vshll.u32 %v2119_v33, 16  ;;  %v551_v18 = vrot.slane %v549_v9, 5 }
  0x52   : > { %v1678_v51 = vcombine.low %v663_v27, %v667_v38  ;;  %1069 = vrot.lane.b32.xlu0 %v1671_v4, %s1844_s16  ;;  %v538_v19 = vsel %vm2143_vm11, %v533_v30, %v537_v13  ;;  %v547_v10 = vrot.slane %v546_v7, 4  ;;  %v556_v49 = vrot.slane %v554_v44, 4  ;;  %v2250_v13 = vld [vmem:[#allocation2 + $0x38] sm:$0xf] }
  0x53   : > { %v559_v63 = vrot.slane %v557_v45, 5  ;;  %v565_v0 = vrot.slane %v563_v52, 5  ;;  %v568_v60 = vshrl.u32 %v2227_v37, 16  ;;  %v571_v16 = vshll.u32 %v2227_v37, 16 }
  0x54   : > { %1095 = vrot.lane.b32.xlu1 %v1678_v51, %s1842_s8  ;;  %v552_v33 = vsel %vm2143_vm11, %v547_v10, %v551_v18  ;;  %v577_v8 = vshll.u32 %v2121_v34, 16  ;;  %v694_v50 = vshll.u32 %v2038_v24, 16  ;;  %v708_v17 = vshll.u32 %v2040_v25, 16  ;;  %v672_v10 = vld [vmem:[#allocation2 + $0x28] sm:$0xf] }
  0x55   : > { %v1672_v58 = vcombine.low %v538_v19, %v552_v33  ;;  %v560_v22 = vor.u32 %v559_v63, %v556_v49  ;;  %v570_v12 = vrot.slane %v568_v60, 4  ;;  %v573_v15 = vrot.slane %v571_v16, 5 }
  0x56   : > { %v579_v23 = vrot.slane %v577_v8, 5  ;;  %v696_v32 = vrot.slane %v694_v50, 5  ;;  %v582_v28 = vshrl.u32 %v2241_v35, 16  ;;  %v710_v34 = vrot.slane %v708_v17, 5  ;;  %v673_v50 = vld [vmem:[#allocation2 + $0x30] sm:$0xf] }
  0x57   : > { %1071 = vrot.lane.b32.xlu0 %v1672_v58, %s1844_s16  ;;  %v561_v29 = vrot.slane %v560_v22, 4  ;;  %v585_v24 = vshll.u32 %v2241_v35, 16  ;;  %v591_v20 = vshll.u32 %v2200_v11, 16  ;;  %v574_v25 = vor.u32 %v573_v15, %v570_v12  ;;  %v475_v15 = vld [vmem:[#allocation2 + $0x44] sm:$0x1] }
  0x58   : > { %1139 = vrot.lane.b32.xlu1 %v2170_v5, %s1845_s17  ;;  %v697_v48 = vsel %vm2143_vm11, %v2051_v55, %v696_v32  ;;  %v584_v27 = vrot.slane %v582_v28, 4  ;;  %v596_v2 = vshrl.u32 %v2250_v13, 16  ;;  %v711_v39 = vsel %vm2143_vm11, %v2059_v62, %v710_v34  ;;  %v2297_v34 = vld [vmem:[#allocation2 + $0x3c] sm:$0x1] }
  0x59   : > { %v566_v3 = vsel %vm2143_vm11, %v561_v29, %v565_v0  ;;  %v587_v11 = vrot.slane %v585_v24, 5  ;;  %v593_v4 = vrot.slane %v591_v20, 5  ;;  %v575_v30 = vrot.slane %v574_v25, 4  ;;  %v680_v24 = vld [vmem:[#allocation2 + $0x2c] sm:$0x1] }
  0x5a   : > { %v1683_v7 = vcombine.low %v697_v48, %v711_v39  ;;  %v598_v5 = vrot.slane %v596_v2, 4  ;;  %v599_v9 = vshll.u32 %v2250_v13, 16  ;;  %v605_v55 = vshll.u32 %v2211_v26, 16  ;;  %v681_v2 = vld [vmem:[#allocation2 + $0x34] sm:$0x1] }
  0x5b   : > { %v588_v38 = vor.u32 %v587_v11, %v584_v27  ;;  %v877_v44 = vrot.slane %v876_v21, 4  ;;  %v879_v45 = vshll.u32 %v2067_v1, 16  ;;  %v580_v62 = vsel %vm2143_vm11, %v575_v30, %v579_v23 }
  0x5c   : > { %1207 = vrot.lane.b32.xlu1 %v2207_v36, %s1846_s20  ;;  %1137 = vrot.lane.b32.xlu0 %v1683_v7, %s1845_s17  ;;  %v601_v52 = vrot.slane %v599_v9, 5  ;;  %v2461_v53 = vor.u32 %v2057_v59, %v2044_v31  ;;  %v893_v51 = vshll.u32 %v2049_v54, 16  ;;  %v1673_v57 = vcombine.low %v566_v3, %v580_v62  ;;  %v472_v54 = vld [vmem:[#allocation2 + $0x40] sm:$0xf] }
  0x5d   : > { %v589_v1 = vrot.slane %v588_v38, 4  ;;  %v607_v21 = vrot.slane %v605_v55, 5  ;;  %v881_v19 = vrot.slane %v879_v45, 5  ;;  %v400_v49 = vshrl.u32 %v2219_v42, 16  ;;  %v800_v38 = vld [vmem:[#allocation2 + $0x28] sm:$0xe] }
  0x5e   : > { %v891_v26 = vrot.slane %v2461_v53, 4  ;;  %v602_v36 = vor.u32 %v601_v52, %v598_v5  ;;  %v895_v18 = vrot.slane %v893_v51, 5  ;;  %v403_v63 = vshll.u32 %v2219_v42, 16  ;;  %v801_v45 = vld [vmem:[#allocation2 + $0x30] sm:$0xe] }
  0x5f   : > { %v594_v0 = vsel %vm2143_vm11, %v589_v1, %v593_v4  ;;  %v882_v31 = vsel %vm2143_vm11, %v877_v44, %v881_v19  ;;  %v769_v59 = vshrl.u32 %v2282_v56, 16  ;;  %v772_v60 = vshll.u32 %v2282_v56, 16  ;;  %v2311_v53 = vld [vmem:[#allocation2 + $0x38] sm:$0xe] }
  0x60   : > { %1073 = vrot.lane.b32.xlu1 %v1673_v57, %s1844_s16  ;;  %v603_v33 = vrot.slane %v602_v36, 4  ;;  %v896_v16 = vsel %vm2143_vm11, %v891_v26, %v895_v18  ;;  %v402_v8 = vrot.slane %v400_v49, 7  ;;  %v741_v42 = vshrl.u32 %v672_v10, 16 }
  0x61   : > { %v1695_v58 = vcombine.low %v882_v31, %v896_v16  ;;  %v771_v22 = vrot.slane %v769_v59, 4  ;;  %v774_v12 = vrot.slane %v772_v60, 5  ;;  %v744_v17 = vshll.u32 %v672_v10, 16  ;;  %v857_v60 = vld [vmem:[#allocation2 + $0x30] sm:$0xf] }
  0x62   : > { %v608_v23 = vsel %vm2143_vm11, %v603_v33, %v607_v21  ;;  %v405_v32 = vor.u32 %v403_v63, %v402_v8  ;;  %v406_v28 = vrot.slane %v402_v8, 4  ;;  %v743_v29 = vrot.slane %v741_v42, 4  ;;  %v2313_v21 = vld [vmem:[#allocation2 + $0x48] sm:$0xf] }
  0x63   : > { %v1674_v20 = vcombine.low %v594_v0, %v608_v23  ;;  %1205 = vrot.lane.b32.xlu0 %v1695_v58, %s1846_s20  ;;  %v746_v25 = vrot.slane %v744_v17, 5  ;;  %v755_v48 = vshrl.u32 %v673_v50, 16  ;;  %v758_v27 = vshll.u32 %v673_v50, 16 }
  0x64   : > { %v473_v3 = vsel %vm1946_vm6, %v405_v32, %v472_v54  ;;  %v1681_v39 = vcombine.low %v672_v10, %v673_v50  ;;  %v476_v11 = vsel %vm1954_vm7, %v406_v28, %v475_v15  ;;  %v775_v4 = vor.u32 %v774_v12, %v771_v22 }
  0x65   : > { %1075 = vrot.lane.b32.xlu1 %v1674_v20, %s1844_s16  ;;  %474 = vst [vmem:[#allocation2 + $0x40] sm:$0xf] %v473_v3  ;;  %v757_v30 = vrot.slane %v755_v48, 4  ;;  %v760_v7 = vrot.slane %v758_v27, 5  ;;  %477 = vst [vmem:[#allocation2 + $0x44] sm:$0x1] %v476_v11  ;;  %v747_v9 = vor.u32 %v746_v25, %v743_v29 }
  0x66   : > { %v778_v5 = vshll.u32 %v2297_v34, 16  ;;  %v750_v55 = vshll.u32 %v680_v24, 16  ;;  %v764_v44 = vshll.u32 %v681_v2, 16  ;;  %v2307_v43 = vrot.slane %v775_v4, 4  ;;  %v858_v29 = vld [vmem:[#allocation2 + $0x38] sm:$0xf] }
  0x67   : > { %1121 = vrot.lane.b32.xlu0 %v1681_v39, %s1839_s28  ;;  %v748_v62 = vrot.slane %v747_v9, 4  ;;  %v761_v52 = vor.u32 %v760_v7, %v757_v30  ;;  %v1655_v57 = vrot.slane %v800_v38, 9  ;;  %v838_v1 = vrot.slane %v680_v24, 5  ;;  %v2340_v9 = vld [vmem:[#allocation2 + $0x4c] sm:$0x1] }
  0x68   : > { %v2309_v61 = vrot.slane %v778_v5, 5  ;;  %v752_v26 = vrot.slane %v750_v55, 5  ;;  %v766_v51 = vrot.slane %v764_v44, 5  ;;  %v1656_v10 = vrot.slane %v801_v45, 9 }
  0x69   : > { %v762_v19 = vrot.slane %v761_v52, 4  ;;  %v1657_v18 = vrot.slane %v2311_v53, 9  ;;  %v846_v49 = vrot.slane %v2297_v34, 5  ;;  %v842_v63 = vrot.slane %v681_v2, 5  ;;  %v865_v53 = vld [vmem:[#allocation2 + $0x34] sm:$0x1] }
  0x6a   : > { %v753_v36 = vsel %vm2143_vm11, %v748_v62, %v752_v26  ;;  %v839_v31 = vsel %vm1970_vm8, %v1655_v57, %v838_v1  ;;  %v968_v54 = vshrl.u32 %v2313_v21, 16  ;;  %v971_v59 = vshll.u32 %v2313_v21, 16  ;;  %v866_v1 = vld [vmem:[#allocation2 + $0x3c] sm:$0x1] }
  0x6b   : > { %v767_v0 = vsel %vm2143_vm11, %v762_v19, %v766_v51  ;;  %v781_v8 = vsel %vm2143_vm11, %v2307_v43, %v2309_v61  ;;  %v843_v58 = vsel %vm1970_vm8, %v1656_v10, %v842_v63  ;;  %v926_v34 = vshrl.u32 %v857_v60, 16 }
  0x6c   : > { %v675_v33 = vld [vmem:[#allocation2 + $0x40] sm:$0xf]  ;;  %v683_v16 = vld [vmem:[#allocation2 + $0x44] sm:$0x1]  ;;  %v1685_v50 = vcombine.low %v753_v36, %v767_v0  ;;  %v1689_v32 = vcombine.low %v839_v31, %v843_v58  ;;  %v929_v24 = vshll.u32 %v857_v60, 16  ;;  %v1693_v27 = vcombine.low %v857_v60, %v858_v29 }
  0x6d   : > { %v803_v42 = vld [vmem:[#allocation2 + $0x40] sm:$0xe]  ;;  %v783_v22 = vshrl.u32 %v675_v33, 16  ;;  %v786_v12 = vshll.u32 %v675_v33, 16  ;;  %v1682_v17 = vcombine.low %v2282_v56, %v675_v33  ;;  %v792_v15 = vshll.u32 %v683_v16, 16 }
  0x6e   : > { %v2332_v23 = vld [vmem:[#allocation2 + $0x40] sm:$0xf]  ;;  %1141 = vrot.lane.b32.xlu0 %v1685_v50, %s1845_s17  ;;  %v1658_v2 = vrot.slane %v803_v42, 9  ;;  %v970_v3 = vrot.slane %v968_v54, 4  ;;  %v973_v39 = vrot.slane %v971_v59, 5  ;;  %v850_v7 = vrot.slane %v683_v16, 5 }
  0x6f   : > { %v954_v28 = vshrl.u32 %v2332_v23, 16  ;;  %v785_v20 = vrot.slane %v783_v22, 4  ;;  %v788_v25 = vrot.slane %v786_v12, 5  ;;  %1123 = vrot.lane.b32.xlu1 %v1682_v17, %s1839_s28  ;;  %v957_v48 = vshll.u32 %v2332_v23, 16  ;;  %v2338_v11 = vld [vmem:[#allocation2 + $0x44] sm:$0x1] }
  0x70   : > { %v794_v30 = vrot.slane %v792_v15, 5  ;;  %v928_v38 = vrot.slane %v926_v34, 4  ;;  %v931_v55 = vrot.slane %v929_v24, 5  ;;  %v940_v44 = vshrl.u32 %v858_v29, 16  ;;  %v985_v50 = vld [vmem:[#allocation2 + $0x30] sm:$0xe] }
  0x71   : > { %v956_v56 = vrot.slane %v954_v28, 4  ;;  %v789_v4 = vor.u32 %v788_v25, %v785_v20  ;;  %v959_v5 = vrot.slane %v957_v48, 5  ;;  %v943_v45 = vshll.u32 %v858_v29, 16  ;;  %v986_v42 = vld [vmem:[#allocation2 + $0x38] sm:$0xe] }
  0x72   : > { %1161 = vrot.lane.b32.xlu0 %v1689_v32, %s1841_s7  ;;  %v963_v62 = vshll.u32 %v2338_v11, 16  ;;  %v974_v52 = vor.u32 %v973_v39, %v970_v3  ;;  %v942_v26 = vrot.slane %v940_v44, 4  ;;  %v977_v57 = vshll.u32 %v2340_v9, 16  ;;  %v988_v29 = vld [vmem:[#allocation2 + $0x48] sm:$0xe] }
  0x73   : > { %v790_v43 = vrot.slane %v789_v4, 4  ;;  %v960_v61 = vor.u32 %v959_v5, %v956_v56  ;;  %v945_v51 = vrot.slane %v943_v45, 5  ;;  %v932_v19 = vor.u32 %v931_v55, %v928_v38  ;;  %v1827_v3 = vld [vmem:[%s2448_s2 + $0x20] ss:$0 sps:$4 sm:$0xff]  }
  0x74   : > { %v847_v36 = vsel %vm1970_vm8, %v1657_v18, %v846_v49  ;;  %v851_v63 = vsel %vm1970_vm8, %v1658_v2, %v850_v7  ;;  %v965_v54 = vrot.slane %v963_v62, 5  ;;  %v935_v60 = vshll.u32 %v865_v53, 16  ;;  %v987_v49 = vld [vmem:[#allocation2 + $0x40] sm:$0xe]  ;;  %1793 = vmatprep.subr.msk.bf16.mxu0 %vm1354_vm12, %v1827_v3  ;;  %1794 = vmatprep.subr.msk.bf16.mxu1 %vm1354_vm12, %v1827_v3 }
  0x75   : > { %v795_v10 = vsel %vm2143_vm11, %v790_v43, %v794_v30  ;;  %v961_v0 = vrot.slane %v960_v61, 4  ;;  %v933_v59 = vrot.slane %v932_v19, 4  ;;  %v946_v33 = vor.u32 %v945_v51, %v942_v26 }
  0x76   : > { %v1686_v31 = vcombine.low %v781_v8, %v795_v10  ;;  %1189 = vrot.lane.b32.xlu0 %v1693_v27, %s1840_s29  ;;  %v949_v16 = vshll.u32 %v866_v1, 16  ;;  %v1690_v58 = vcombine.low %v847_v36, %v851_v63  ;;  %v975_v22 = vrot.slane %v974_v52, 4 }
  0x77   : > { %v979_v12 = vrot.slane %v977_v57, 5  ;;  %v937_v18 = vrot.slane %v935_v60, 5  ;;  %v1694_v17 = vcombine.low %v2332_v23, %v2313_v21  ;;  %v947_v8 = vrot.slane %v946_v33, 4 }
  0x78   : > { %1143 = vrot.lane.b32.xlu1 %v1686_v31, %s1845_s17  ;;  %v951_v15 = vrot.slane %v949_v16, 5  ;;  %v966_v32 = vsel %vm2143_vm11, %v961_v0, %v965_v54  ;;  %v1663_v34 = vrot.slane %v985_v50, 9  ;;  %v1023_v24 = vrot.slane %v865_v53, 5 }
  0x79   : > { %v938_v28 = vsel %vm2143_vm11, %v933_v59, %v937_v18  ;;  %v1665_v25 = vrot.slane %v987_v49, 9  ;;  %v1664_v48 = vrot.slane %v986_v42, 9  ;;  %v1027_v27 = vrot.slane %v866_v1, 5  ;;  %v1829_v1 = vld [vmem:[#allocation2] sm:$0xf] }
  0x7a   : > { %v952_v20 = vsel %vm2143_vm11, %v947_v8, %v951_v15  ;;  %v980_v21 = vsel %vm2143_vm11, %v975_v22, %v979_v12  ;;  %v1031_v2 = vrot.slane %v2338_v11, 5  ;;  %v1024_v56 = vsel %vm1970_vm8, %v1663_v34, %v1023_v24 }
  0x7b   : > { %v1697_v23 = vcombine.low %v938_v28, %v952_v20  ;;  %v1666_v39 = vrot.slane %v988_v29, 9  ;;  %v1035_v4 = vrot.slane %v2340_v9, 5  ;;  %v1028_v30 = vsel %vm1970_vm8, %v1664_v48, %v1027_v27 }
  0x7c   : > { %1163 = vrot.lane.b32.xlu1 %v1690_v58, %s1841_s7  ;;  %v1701_v7 = vcombine.low %v1024_v56, %v1028_v30  ;;  %v1669_v11 = vcombine.low %v2209_v41, %v2227_v37  ;;  %v1670_v5 = vcombine.low %v2241_v35, %v2250_v13  ;;  %v1698_v38 = vcombine.low %v966_v32, %v980_v21  ;;  %s261_s7 = scalar_lea.vmem %s2451_s5, %s2463_s19 }
  0x7d   : > { %1209 = vrot.lane.b32.xlu0 %v1697_v23, %s1846_s20  ;;  %v1356_v9 = vsel %vm1354_vm12, %v1827_v3, 0  ;;  %v1032_v55 = vsel %vm1970_vm8, %v1665_v25, %v1031_v2  ;;  %v1036_v47 = vsel %vm1970_vm8, %v1666_v39, %v1035_v4  ;;  %v1667_v19 = vcombine.low %v1829_v1, %v2147_v40 }
  0x7e   : > { %1774 = vmatpush3.bf16.msra.mxu0 %v1356_v9  ;;  %1792 = vmatpush3.bf16.msra.mxu1 %v1356_v9  ;;  %v1702_v6 = vcombine.low %v1032_v55, %v1036_v47  ;;  %vm1264_vm15 = vcmask 261120   ;;  %vm1255_vm0 = vcmask 195584   ;;  %vm1273_vm1 = vcmask 326656  }
  0x7f   : > { %vm1282_vm2 = vcmask 392192   ;;  %vm1291_vm3 = vcmask 457728   ;;  %vm1300_vm4 = vcmask 523264   ;;  %vm1345_vm5 = vcmask 588800  }
  0x80   : > { %1191 = vrot.lane.b32.xlu1 %v1694_v17, %s1840_s29  ;;  %s258_s29 = scalar_lea.vmem %s2450_s4, %s2463_s19 }
  0x81   : > { %1229 = vrot.lane.b32.xlu0 %v1701_v7, %s1843_s9 }
  0x84   : > { %1211 = vrot.lane.b32.xlu1 %v1698_v38, %s1846_s20 }
  0x88   : > { %1231 = vrot.lane.b32.xlu1 %v1702_v6, %s1843_s9 }
  0x9b   : > { %v1120_v43 = vpop.permute.xlu1 %1119 }
  0xa0   : > { %v1118_v44 = vpop.permute.xlu0 %1117 }
  0xa4   : > { %v1188_v62 = vpop.permute.xlu1 %1187 }
  0xa6   : > { %v1186_v45 = vpop.permute.xlu0 %1185 }
  0xaa   : > { %v1158_v61 = vpop.permute.xlu0 %1157 }
  0xab   : > { %v1090_v53 = vpop.permute.xlu1 %1089 }
  0xae   : > { %v1226_v52 = vpop.permute.xlu0 %1225 }
  0xaf   : > { %v1092_v14 = vpop.permute.xlu1 %1091 }
  0xb2   : > { %v1228_v26 = vpop.permute.xlu0 %1227 }
  0xb3   : > { %v1160_v57 = vpop.permute.xlu1 %1159 }
  0xb6   : > { %v1094_v51 = vpop.permute.xlu0 %1093 }
  0xc4   : > { %v1070_v10 = vpop.permute.xlu0 %1069 }
  0xc5   : > { %v1236_v63 = vsel %vm1233_vm13, %v1667_v19, %v1070_v10 }
  0xc6   : > { %v1096_v36 = vpop.permute.xlu1 %1095  ;;  %v1248_v54 = vsel %vm1246_vm14, %v1236_v63, %v1090_v53 }
  0xc7   : > { %v1257_v16 = vsel %vm1255_vm0, %v1248_v54, %v1118_v44 }
  0xc9   : > { %v1072_v0 = vpop.permute.xlu0 %1071 }
  0xca   : > { %v1239_v31 = vsel %vm1233_vm13, %v1668_v46, %v1072_v0  ;;  %v1140_v60 = vpop.permute.xlu1 %1139 }
  0xcb   : > { %v1250_v59 = vsel %vm1246_vm14, %v1239_v31, %v1092_v14 }
  0xcc   : > { %v1259_v33 = vsel %vm1255_vm0, %v1250_v59, %v1120_v43 }
  0xcd   : > { %v1268_v40 = vsel %vm1264_vm15, %v1259_v33, %v1140_v60 }
  0xce   : > { %v1138_v50 = vpop.permute.xlu0 %1137  ;;  %v1277_v58 = vsel %vm1273_vm1, %v1268_v40, %v1160_v57  ;;  %v1208_v12 = vpop.permute.xlu1 %1207 }
  0xcf   : > { %v1266_v42 = vsel %vm1264_vm15, %v1257_v16, %v1138_v50  ;;  %v1286_v18 = vsel %vm1282_vm2, %v1277_v58, %v1188_v62 }
  0xd0   : > { %v1275_v22 = vsel %vm1273_vm1, %v1266_v42, %v1158_v61  ;;  %v1295_v8 = vsel %vm1291_vm3, %v1286_v18, %v1208_v12 }
  0xd1   : > { %v1284_v49 = vsel %vm1282_vm2, %v1275_v22, %v1186_v45  ;;  %v1304_v29 = vsel %vm1300_vm4, %v1295_v8, %v1228_v26 }
  0xd2   : > { %v1074_v28 = vpop.permute.xlu1 %1073 }
  0xd3   : > { %v1242_v23 = vsel %vm1233_vm13, %v1669_v11, %v1074_v28 }
  0xd4   : > { %v1252_v56 = vsel %vm1246_vm14, %v1242_v23, %v1094_v51 }
  0xd5   : > { %v1206_v17 = vpop.permute.xlu0 %1205 }
  0xd6   : > { %v1293_v15 = vsel %vm1291_vm3, %v1284_v49, %v1206_v17 }
  0xd7   : > { %v1302_v32 = vsel %vm1300_vm4, %v1293_v15, %v1226_v52  ;;  %v1076_v24 = vpop.permute.xlu1 %1075 }
  0xd8   : > { %1775 = vmatprep.mubr.msk.bf16.mxu0 %vm1345_vm5, %v1302_v32  ;;  %v1245_v30 = vsel %vm1233_vm13, %v1670_v5, %v1076_v24 }
  0xd9   : > { %1776 = vmatmul.mubr.msk.bf16.vlgmr.msra.gmra.mrb[0].mxu0 %vm1345_vm5, %v1304_v29  ;;  %v1122_v34 = vpop.permute.xlu0 %1121  ;;  %v1254_v38 = vsel %vm1246_vm14, %v1245_v30, %v1096_v36 }
  0xda   : > { %v1261_v3 = vsel %vm1255_vm0, %v1252_v56, %v1122_v34 }
  0xe0   : > { %v1142_v20 = vpop.permute.xlu0 %1141 }
  0xe1   : > { %v1124_v25 = vpop.permute.xlu1 %1123  ;;  %v1270_v4 = vsel %vm1264_vm15, %v1261_v3, %v1142_v20 }
  0xe2   : > { %v1263_v55 = vsel %vm1255_vm0, %v1254_v38, %v1124_v25 }
  0xe4   : > { %v1162_v48 = vpop.permute.xlu0 %1161 }
  0xe5   : > { %v1279_v46 = vsel %vm1273_vm1, %v1270_v4, %v1162_v48 }
  0xe8   : > { %v1190_v21 = vpop.permute.xlu0 %1189 }
  0xe9   : > { %v1288_v41 = vsel %vm1282_vm2, %v1279_v46, %v1190_v21 }
  0xea   : > { %v1144_v27 = vpop.permute.xlu1 %1143 }
  0xeb   : > { %v1272_v35 = vsel %vm1264_vm15, %v1263_v55, %v1144_v27 }
  0xee   : > { %v1164_v2 = vpop.permute.xlu1 %1163 }
  0xef   : > { %v1210_v39 = vpop.permute.xlu0 %1209  ;;  %v1281_v13 = vsel %vm1273_vm1, %v1272_v35, %v1164_v2 }
  0xf0   : > { %v1297_v37 = vsel %vm1291_vm3, %v1288_v41, %v1210_v39 }
  0xf2   : > { %v1192_v7 = vpop.permute.xlu1 %1191 }
  0xf3   : > { %v1230_v11 = vpop.permute.xlu0 %1229  ;;  %v1290_v5 = vsel %vm1282_vm2, %v1281_v13, %v1192_v7 }
  0xf4   : > { %v1306_v9 = vsel %vm1300_vm4, %v1297_v37, %v1230_v11 }
  0xf5   : > { %1779 = vmatprep.mubr.msk.bf16.mxu1 %vm1345_vm5, %v1306_v9 }
  0xf6   : > { %v1212_v47 = vpop.permute.xlu1 %1211 }
  0xf7   : > { %v1299_v6 = vsel %vm1291_vm3, %v1290_v5, %v1212_v47 }
  0xfa   : > { %v1232_v44 = vpop.permute.xlu1 %1231 }
  0xfb   : > { %v1308_v45 = vsel %vm1300_vm4, %v1299_v6, %v1232_v44 }
  0xfc   : > { %1780 = vmatmul.mubr.msk.bf16.vlgmr.msra.gmra.mrb[0].mxu1 %vm1345_vm5, %v1308_v45 }
 0x1ac   : > { %v1777_v43 = vpop.f32.mrb[0].mxu0 }
 0x1ad   : > { %v1392_v61 = vpop.f32.mrb[1].mxu0  ;;  %v1479_v1 = vmul.f32 %v1777_v43, %v1777_v43 }
 0x1ae   : > { %v1778_v62 = vpop.f32.mrb[2].mxu0  ;;  %v1477_v26 = vmul.f32 %v1392_v61, %v1392_v61 }
 0x1af   : > { %v1741_v52 = vpack.c.bf16 %v1778_v62, %v1777_v43  ;;  %v1395_v53 = vpop.f32.mrb[3].mxu0  ;;  %v1480_v36 = vmul.f32 %v1778_v62, %v1778_v62 }
 0x1b0   : > { %v1736_v14 = vpack.c.bf16 %v1395_v53, %v1392_v61  ;;  %v1463_v51 = vadd.f32 %v1395_v53, %v1392_v61  ;;  %v1478_v57 = vmul.f32 %v1395_v53, %v1395_v53 }
 0x1b1   : > { %1753 = vst [vmem:[%s255_s26 + $0x8] sm:$0xff] %v1741_v52  }
 0x1b2   : > { %1737 = vst [vmem:[%s255_s26] sm:$0xff] %v1736_v14   ;;  %v1464_v19 = vadd.f32 %v1777_v43, %v1463_v51  ;;  %v1485_v10 = vadd.f32 %v1478_v57, %v1477_v26 }
 0x1b4   : > { %v1486_v63 = vadd.f32 %v1485_v10, %v1479_v1  ;;  %v1465_v0 = vadd.f32 %v1778_v62, %v1464_v19 }
 0x1b6   : > { %v1487_v31 = vadd.f32 %v1486_v63, %v1480_v36 }
 0x1cf   : > { %v1781_v54 = vpop.f32.mrb[0].mxu1 }
 0x1d0   : > { %v1408_v59 = vpop.f32.mrb[1].mxu1  ;;  %v1483_v18 = vmul.f32 %v1781_v54, %v1781_v54 }
 0x1d1   : > { %v1466_v60 = vadd.f32 %v1465_v0, %v1408_v59  ;;  %v1481_v33 = vmul.f32 %v1408_v59, %v1408_v59  ;;  %v1782_v40 = vpop.f32.mrb[2].mxu1 }
 0x1d2   : > { %v1751_v16 = vpack.c.bf16 %v1782_v40, %v1781_v54  ;;  %v1411_v50 = vpop.f32.mrb[3].mxu1  ;;  %v1484_v8 = vmul.f32 %v1782_v40, %v1782_v40 }
 0x1d3   : > { %v1488_v42 = vadd.f32 %v1487_v31, %v1481_v33  ;;  %v1746_v58 = vpack.c.bf16 %v1411_v50, %v1408_v59  ;;  %v1467_v22 = vadd.f32 %v1466_v60, %v1411_v50  ;;  %v1482_v12 = vmul.f32 %v1411_v50, %v1411_v50 }
 0x1d4   : > { %1755 = vst [vmem:[%s255_s26 + $0x18] sm:$0xff] %v1751_v16  }
 0x1d5   : > { %1754 = vst [vmem:[%s255_s26 + $0x10] sm:$0xff] %v1746_v58   ;;  %v1468_v49 = vadd.f32 %v1781_v54, %v1467_v22  ;;  %v1489_v17 = vadd.f32 %v1488_v42, %v1482_v12 }
 0x1d7   : > { %v1469_v15 = vadd.f32 %v1782_v40, %v1468_v49  ;;  %v1490_v32 = vadd.f32 %v1489_v17, %v1483_v18 }
 0x1d9   : > { %v1470_v28 = vrot.slane %v1469_v15, 4  ;;  %v1491_v29 = vadd.f32 %v1490_v32, %v1484_v8 }
 0x1db   : > { %v1471_v34 = vadd.f32 %v1470_v28, %v1469_v15  ;;  %v1492_v24 = vrot.slane %v1491_v29, 4 }
 0x1dd   : > { %v1472_v20 = vrot.slane %v1471_v34, 2  ;;  %v1493_v25 = vadd.f32 %v1492_v24, %v1491_v29 }
 0x1df   : > { %v1473_v48 = vadd.f32 %v1472_v20, %v1471_v34  ;;  %v1494_v27 = vrot.slane %v1493_v25, 2 }
 0x1e1   : > { %v1474_v21 = vrot.slane %v1473_v48, 1  ;;  %v1495_v23 = vadd.f32 %v1494_v27, %v1493_v25 }
 0x1e3   : > { %v1475_v2 = vadd.f32 %v1474_v21, %v1473_v48  ;;  %v1496_v56 = vrot.slane %v1495_v23, 1 }
 0x1e5   : > { %1476 = vst [vmem:[%s258_s29] sm:$0x1] %v1475_v2  ;;  %v1497_v3 = vadd.f32 %v1496_v56, %v1495_v23 }
 0x1e7   : > { %1498 = vst [vmem:[%s261_s7] sm:$0x1] %v1497_v3 }
 0x1e8 PF: > { %s16_s18 = sadd.s32 1, %s1836_s18  }
 0x1e9   : > { %p13_p4 = scmp.ge.s32.totalorder %s16_s18, 4  }
 0x1eb   :  { %15 = sbr.rel (!%p13_p4) target bundleno = 1 (0x1), region = 93 }

// kernel: downblock_forward.8
= control target key start
LH: loop header
LB: loop body
LE: loop exit
PB: predicated region body
PF: predicated region fallthrough
CT: control target
= control target key end

     0   :  { %s3029_s15 = smov 0   ;;  %s3508_s0 = inlined_call_operand.vmem [shape: bf16[2,10,10,128], index: 0, kind: input, shape index: {}]   ;;  %s3509_s1 = inlined_call_operand.vmem [shape: bf16[3,384,128], index: 1, kind: input, shape index: {}]   ;;  %s3510_s2 = inlined_call_operand.vmem [shape: bf16[2,64,128], index: 2, kind: output, shape index: {0}]   ;;  %s3511_s3 = inlined_call_operand.vmem [shape: f32[2,1,128], index: 3, kind: output, shape index: {1}]   ;;  %s3512_s4 = inlined_call_operand.vmem [shape: f32[2,1,128], index: 4, kind: output, shape index: {2}]  }
   0x1 LB: > { %s2277_s16 = sadd.s32 4294967295, %s3002_s15   ;;  %p2281_p0 = scmp.ge.s32.totalorder %s3002_s15, 1  ;;  %s3002_s15 = sphi %s3029_s15, %s15_s15  }
   0x2   : > { %p167_p1 = scmp.lt.s32.totalorder %s3002_s15, 3 }
   0x4   : > { %p168_p2 = pnand %p2281_p0, %p167_p1 }
   0x5   : > { %v2912_v0 = vld [vmem:[%s3509_s1 + $0x40] sm:$0xff] (!%p168_p2)   ;;  %v2915_v3 = vld [vmem:[%s3509_s1 + $0x48] sm:$0xff] (!%p168_p2)   ;;  %v2918_v6 = vld [vmem:[%s3509_s1 + $0x50] sm:$0xff] (!%p168_p2)   ;;  %p199_p3 = scmp.lt.s32.totalorder (!%p168_p2), %s2277_s16, 1  ;;  %vm435_vm0 = vcmask (!%p168_p2), 1042432   ;;  %vm436_vm1 = vcmask (!%p168_p2), 1046532  }
   0x6   : > { %171 = sbr.rel (%p168_p2) target bundleno = 367 (0x16f), region = 28  ;;  %v2913_v1 = vld [vmem:[%s3509_s1 + $0x80] sm:$0xff] (!%p168_p2)   ;;  %2635 = vmatprep.subr.bf16.mxu0 (!%p168_p2), %v2912_v0  ;;  %v2916_v4 = vld [vmem:[%s3509_s1 + $0x88] sm:$0xff] (!%p168_p2)   ;;  %v2919_v7 = vld [vmem:[%s3509_s1 + $0x90] sm:$0xff] (!%p168_p2)   ;;  %vm268_vm2 = vsmask.f32 (!%p168_p2), 3328 }
   0x7   : > { %v2914_v2 = vld [vmem:[%s3509_s1] sm:$0xff] (!%p168_p2)   ;;  %2791 = vmatprep.subr.bf16.mxu1 (!%p168_p2), %v2913_v1  ;;  %v2917_v5 = vld [vmem:[%s3509_s1 + $0x8] sm:$0xff] (!%p168_p2)   ;;  %v2920_v8 = vld [vmem:[%s3509_s1 + $0x10] sm:$0xff] (!%p168_p2)   ;;  %vm269_vm3 = vsmask.f32 (!%p168_p2), 7440 }
   0x8   : > { %2636 = vmatpush3.bf16.msra.mxu0 (!%p168_p2), %v2914_v2  ;;  %2792 = vmatpush3.bf16.msra.mxu1 (!%p168_p2), %v2913_v1  ;;  %v2921_v9 = vld [vmem:[%s3509_s1 + $0x58] sm:$0xff] (!%p168_p2)   ;;  %v2924_v12 = vld [vmem:[%s3509_s1 + $0x60] sm:$0xff] (!%p168_p2)   ;;  %v2927_v15 = vld [vmem:[%s3509_s1 + $0x68] sm:$0xff] (!%p168_p2)  }
   0x9   : > { %2637 = vmatprep.subr.bf16.mxu0 (!%p168_p2), %v2915_v3  ;;  %2793 = vmatprep.subr.bf16.mxu1 (!%p168_p2), %v2916_v4  ;;  %v2922_v10 = vld [vmem:[%s3509_s1 + $0x98] sm:$0xff] (!%p168_p2)   ;;  %v2925_v13 = vld [vmem:[%s3509_s1 + $0xa0] sm:$0xff] (!%p168_p2)   ;;  %v2928_v16 = vld [vmem:[%s3509_s1 + $0xa8] sm:$0xff] (!%p168_p2)  }
   0xa   : > { %v2923_v11 = vld [vmem:[%s3509_s1 + $0x18] sm:$0xff] (!%p168_p2)   ;;  %v2926_v14 = vld [vmem:[%s3509_s1 + $0x20] sm:$0xff] (!%p168_p2)   ;;  %v2929_v17 = vld [vmem:[%s3509_s1 + $0x28] sm:$0xff] (!%p168_p2)  }
   0xb   : > { %v2930_v18 = vld [vmem:[%s3509_s1 + $0x70] sm:$0xff] (!%p168_p2)   ;;  %v2933_v24 = vld [vmem:[%s3509_s1 + $0x78] sm:$0xff] (!%p168_p2)   ;;  %vm3130_vm4 = vmor (!%p168_p2), %vm435_vm0, %vm436_vm1 }
   0xc   : > { %2638 = vmatpush3.bf16.msra.mxu0 (!%p168_p2), %v2917_v5  ;;  %2794 = vmatpush3.bf16.msra.mxu1 (!%p168_p2), %v2916_v4  ;;  %v2931_v19 = vld [vmem:[%s3509_s1 + $0xb0] sm:$0xff] (!%p168_p2)   ;;  %v2934_v25 = vld [vmem:[%s3509_s1 + $0xb8] sm:$0xff] (!%p168_p2)   ;;  %vm3136_vm5 = vmor (!%p168_p2), %vm268_vm2, %vm269_vm3 }
   0xd   : > { %2639 = vmatprep.subr.bf16.mxu0 %v2918_v6  ;;  %2795 = vmatprep.subr.bf16.mxu1 %v2919_v7  ;;  %s3518_s16 = smov (!%p199_p3, %s2277_s16), 1  ;;  %v2932_v20 = vld [vmem:[%s3509_s1 + $0x30] sm:$0xff]   ;;  %v2935_v27 = vld [vmem:[%s3509_s1 + $0x38] sm:$0xff]   ;;  %v2937_v50 = vld [vmem:[%s3509_s1 + $0x100] sm:$0xff]  }
   0xe   : > { %s2903_s27 = smul.u32 80, %s3518_s16  ;;  %v2938_v53 = vld [vmem:[%s3509_s1 + $0x140] sm:$0xff]   ;;  %s211_s30 = scalar_lea.vmem %s3511_s3, %s3518_s16 }
   0xf   : > { %v2939_v3 = vld [vmem:[%s3509_s1 + $0xc0] sm:$0xff]   ;;  %s214_s7 = scalar_lea.vmem %s3512_s4, %s3518_s16 }
  0x10   : > { %2640 = vmatpush3.bf16.msra.mxu0 %v2920_v8  ;;  %2796 = vmatpush3.bf16.msra.mxu1 %v2919_v7  ;;  %s3107_s10 = scalar_lea.vmem %s3508_s0, %s2903_s27  ;;  %v2940_v7 = vld [vmem:[%s3509_s1 + $0x108] sm:$0xff]  }
  0x11   : > { %2641 = vmatprep.subr.bf16.mxu0 %v2921_v9  ;;  %2797 = vmatprep.subr.bf16.mxu1 %v2922_v10  ;;  %v252_v21 = vld [vmem:[%s3107_s10] sm:$0xf]  ;;  %v253_v22 = vld [vmem:[%s3107_s10 + $0x4] sm:$0x1]  ;;  %v254_v23 = vld [vmem:[%s3107_s10 + $0x8] sm:$0xf] }
  0x12   : > { %v255_v26 = vld [vmem:[%s3107_s10 + $0xc] sm:$0x1]  ;;  %v272_v28 = vshrl.u32 %v252_v21, 16  ;;  %v275_v29 = vshll.u32 %v252_v21, 16  ;;  %v281_v30 = vshll.u32 %v253_v22, 16  ;;  %v286_v31 = vshrl.u32 %v254_v23, 16 }
  0x13   : > { %v289_v32 = vshll.u32 %v254_v23, 16  ;;  %v295_v33 = vshll.u32 %v255_v26, 16  ;;  %v403_v38 = vld [vmem:[%s3107_s10] sm:$0xe]  ;;  %v404_v41 = vld [vmem:[%s3107_s10 + $0x4] sm:$0x1] }
  0x14   : > { %2642 = vmatpush3.bf16.msra.mxu0 %v2923_v11  ;;  %2798 = vmatpush3.bf16.msra.mxu1 %v2922_v10  ;;  %v274_v34 = vrot.slane %v272_v28, 4  ;;  %v277_v35 = vrot.slane %v275_v29, 5  ;;  %v283_v36 = vrot.slane %v281_v30, 5  ;;  %v288_v37 = vrot.slane %v286_v31, 4  ;;  %v405_v42 = vld [vmem:[%s3107_s10 + $0x8] sm:$0xe] }
  0x15   : > { %2643 = vmatprep.subr.bf16.mxu0 %v2924_v12  ;;  %2799 = vmatprep.subr.bf16.mxu1 %v2925_v13  ;;  %v291_v39 = vrot.slane %v289_v32, 5  ;;  %v297_v40 = vrot.slane %v295_v33, 5  ;;  %v406_v46 = vld [vmem:[%s3107_s10 + $0xc] sm:$0x1]  ;;  %v2293_v47 = vrot.slane %v403_v38, 9  ;;  %v440_v48 = vrot.slane %v404_v41, 5 }
  0x16   : > { %v278_v45 = vor.u32 %v277_v35, %v274_v34  ;;  %v2294_v49 = vrot.slane %v405_v42, 9  ;;  %v444_v52 = vrot.slane %v406_v46, 5  ;;  %v2936_v57 = vld [vmem:[%s3107_s10] ss:$8 sps:$4 sm:$0xff]   ;;  %v407_v59 = vld [vmem:[%s3107_s10 + $0x10] sm:$0xe] }
  0x17   : > { %v292_v51 = vor.u32 %v291_v39, %v288_v37  ;;  %v441_v55 = vsel %vm3130_vm4, %v2293_v47, %v440_v48  ;;  %v408_v60 = vld [vmem:[%s3107_s10 + $0x14] sm:$0x1]  ;;  %v409_v63 = vld [vmem:[%s3107_s10 + $0x18] sm:$0xe]  ;;  %v410_v0 = vld [vmem:[%s3107_s10 + $0x1c] sm:$0x1] }
  0x18   : > { %2644 = vmatpush3.bf16.msra.mxu0 %v2926_v14  ;;  %2800 = vmatpush3.bf16.msra.mxu1 %v2925_v13  ;;  %v279_v54 = vrot.slane %v278_v45, 4  ;;  %v445_v58 = vsel %vm3130_vm4, %v2294_v49, %v444_v52  ;;  %v2295_v1 = vrot.slane %v407_v59, 9  ;;  %v448_v2 = vrot.slane %v408_v60, 5  ;;  %v2941_v11 = vld [vmem:[%s3509_s1 + $0x148] sm:$0xff]   ;;  %v256_v14 = vld [vmem:[%s3107_s10 + $0x10] sm:$0xf] }
  0x19   : > { %2645 = vmatprep.subr.bf16.mxu0 %v2927_v15  ;;  %2801 = vmatprep.subr.bf16.mxu1 %v2928_v16  ;;  %v293_v56 = vrot.slane %v292_v51, 4  ;;  %v2301_v62 = vcombine.low %v441_v55, %v445_v58  ;;  %v2296_v5 = vrot.slane %v409_v63, 9  ;;  %v452_v6 = vrot.slane %v410_v0, 5  ;;  %v2942_v13 = vld [vmem:[%s3509_s1 + $0xc8] sm:$0xff]   ;;  %v257_v15 = vld [vmem:[%s3107_s10 + $0x14] sm:$0x1] }
  0x1a   : > { %v284_v61 = vsel %vm3136_vm5, %v279_v54, %v283_v36  ;;  %v449_v9 = vsel %vm3130_vm4, %v2295_v1, %v448_v2  ;;  %v2944_v29 = vld [vmem:[%s3509_s1 + $0x110] sm:$0xff]   ;;  %v2947_v36 = vld [vmem:[%s3509_s1 + $0x118] sm:$0xff]   ;;  %v260_v42 = vld [vmem:[%s3107_s10 + $0x20] sm:$0xf] }
  0x1b   : > { %v298_v4 = vsel %vm3136_vm5, %v293_v56, %v297_v40  ;;  %2807 = vmatprep.mubr.bf16.mxu1 %v2301_v62  ;;  %v453_v10 = vsel %vm3130_vm4, %v2296_v5, %v452_v6  ;;  %v2945_v30 = vld [vmem:[%s3509_s1 + $0x150] sm:$0xff]   ;;  %v2948_v39 = vld [vmem:[%s3509_s1 + $0x158] sm:$0xff]   ;;  %v261_v46 = vld [vmem:[%s3107_s10 + $0x24] sm:$0x1]  ;;  %v331_v51 = vshll.u32 %v260_v42, 16 }
  0x1c   : > { %2646 = vmatpush3.bf16.msra.mxu0 %v2929_v17  ;;  %2802 = vmatpush3.bf16.msra.mxu1 %v2928_v16  ;;  %v2289_v8 = vcombine.low %v284_v61, %v298_v4  ;;  %v2302_v12 = vcombine.low %v449_v9, %v453_v10  ;;  %v258_v16 = vld [vmem:[%s3107_s10 + $0x18] sm:$0xf]  ;;  %v259_v17 = vld [vmem:[%s3107_s10 + $0x1c] sm:$0x1]  ;;  %v2946_v34 = vld [vmem:[%s3509_s1 + $0xd0] sm:$0xff]   ;;  %v337_v52 = vshll.u32 %v261_v46, 16 }
  0x1d   : > { %2647 = vmatprep.subr.bf16.mxu0 %v2930_v18  ;;  %2803 = vmatprep.subr.bf16.mxu1 %v2931_v19  ;;  %v300_v18 = vshrl.u32 %v256_v14, 16  ;;  %v314_v21 = vshrl.u32 %v258_v16, 16  ;;  %v317_v22 = vshll.u32 %v258_v16, 16  ;;  %v323_v23 = vshll.u32 %v259_v17, 16  ;;  %v2943_v38 = vld [vmem:[%s3107_s10 + $0x10] ss:$8 sps:$4 sm:$0xff]  }
  0x1e   : > { %726 = vmatprep.mubr.bf16.mxu0 %v2289_v8  ;;  %v2949_v41 = vld [vmem:[%s3509_s1 + $0xd8] sm:$0xff]   ;;  %v262_v47 = vld [vmem:[%s3107_s10 + $0x28] sm:$0xf]  ;;  %v263_v48 = vld [vmem:[%s3107_s10 + $0x2c] sm:$0x1]  ;;  %v333_v59 = vrot.slane %v331_v51, 5 }
  0x1f   : > { %v316_v26 = vrot.slane %v314_v21, 4  ;;  %v319_v28 = vrot.slane %v317_v22, 5  ;;  %v325_v33 = vrot.slane %v323_v23, 5  ;;  %v342_v54 = vshrl.u32 %v262_v47, 16  ;;  %v2953_v61 = vld [vmem:[%s3509_s1 + $0xe0] sm:$0xff]   ;;  %v2954_v1 = vld [vmem:[%s3509_s1 + $0x128] sm:$0xff]  }
  0x20   : > { %2648 = vmatpush3.bf16.msra.mxu0 %v2932_v20  ;;  %2804 = vmatpush3.bf16.msra.mxu1 %v2931_v19  ;;  %v303_v19 = vshll.u32 %v256_v14, 16  ;;  %v309_v20 = vshll.u32 %v257_v15, 16  ;;  %v345_v55 = vshll.u32 %v262_v47, 16  ;;  %v351_v56 = vshll.u32 %v263_v48, 16  ;;  %v2955_v5 = vld [vmem:[%s3509_s1 + $0x168] sm:$0xff]   ;;  %v2958_v21 = vld [vmem:[%s3509_s1 + $0x130] sm:$0xff]  }
  0x21   : > { %2649 = vmatprep.subr.bf16.mxu0 %v2933_v24  ;;  %2805 = vmatprep.subr.bf16.mxu1 %v2934_v25  ;;  %v302_v24 = vrot.slane %v300_v18, 4  ;;  %v320_v32 = vor.u32 %v319_v28, %v316_v26  ;;  %v339_v60 = vrot.slane %v337_v52, 5  ;;  %v344_v62 = vrot.slane %v342_v54, 4  ;;  %v2956_v8 = vld [vmem:[%s3509_s1 + $0xe8] sm:$0xff]   ;;  %v264_v10 = vld [vmem:[%s3107_s10 + $0x30] sm:$0xf] }
  0x22   : > { %v347_v63 = vrot.slane %v345_v55, 5  ;;  %v353_v0 = vrot.slane %v351_v56, 5  ;;  %v267_v14 = vld [vmem:[%s3107_s10 + $0x3c] sm:$0x1]  ;;  %v356_v15 = vshrl.u32 %v264_v10, 16  ;;  %v359_v16 = vshll.u32 %v264_v10, 16 }
  0x23   : > { %v321_v37 = vrot.slane %v320_v32, 4  ;;  %v411_v32 = vld [vmem:[%s3107_s10 + $0x20] sm:$0xe]  ;;  %v2957_v47 = vld [vmem:[%s3107_s10 + $0x30] ss:$8 sps:$4 sm:$0xff]  }
  0x24   : > { %2650 = vmatpush3.bf16.msra.mxu0 %v2935_v27  ;;  %2806 = vmatpush3.bf16.msra.mxu1 %v2934_v25  ;;  %v305_v25 = vrot.slane %v303_v19, 5  ;;  %v311_v27 = vrot.slane %v309_v20, 5  ;;  %v358_v22 = vrot.slane %v356_v15, 4  ;;  %v361_v23 = vrot.slane %v359_v16, 5  ;;  %v415_v52 = vld [vmem:[%s3107_s10 + $0x30] sm:$0xe] }
  0x25   : > { %2687 = vmatprep.subr.bf16.mxu0 %v2937_v50  ;;  %2815 = vmatprep.subr.bf16.mxu1 %v2938_v53  ;;  %v326_v45 = vsel %vm3136_vm5, %v321_v37, %v325_v33  ;;  %v328_v50 = vshrl.u32 %v260_v42, 16  ;;  %v412_v33 = vld [vmem:[%s3107_s10 + $0x24] sm:$0x1]  ;;  %v414_v37 = vld [vmem:[%s3107_s10 + $0x2c] sm:$0x1] }
  0x26   : > { %v306_v31 = vor.u32 %v305_v25, %v302_v24  ;;  %v379_v24 = vshll.u32 %v267_v14, 16  ;;  %v2959_v25 = vld [vmem:[%s3509_s1 + $0x170] sm:$0xff]   ;;  %v460_v42 = vrot.slane %v414_v37, 5  ;;  %v417_v56 = vld [vmem:[%s3107_s10 + $0x38] sm:$0xe] }
  0x27   : > { %727 = vmatmul.mubr.bf16.vlgmr.msra.gmra.mrb[0].mxu0 %v2936_v57  ;;  %2808 = vmatmul.mubr.bf16.vlgmr.msra.gmra.mrb[0].mxu1 %v2302_v12  ;;  %v2952_v57 = vld [vmem:[%s3509_s1 + $0x160] sm:$0xff]   ;;  %v330_v58 = vrot.slane %v328_v50, 4 }
  0x28   : > { %2688 = vmatpush3.bf16.msra.mxu0 %v2939_v3  ;;  %2816 = vmatpush3.bf16.msra.mxu1 %v2938_v53  ;;  %v307_v35 = vrot.slane %v306_v31, 4  ;;  %v2951_v53 = vld [vmem:[%s3509_s1 + $0x120] sm:$0xff]   ;;  %v348_v3 = vor.u32 %v347_v63, %v344_v62  ;;  %v381_v31 = vrot.slane %v379_v24, 5 }
  0x29   : > { %2689 = vmatprep.subr.bf16.mxu0 %v2940_v7  ;;  %2817 = vmatprep.subr.bf16.mxu1 %v2941_v11  ;;  %v334_v2 = vor.u32 %v333_v59, %v330_v58  ;;  %v2950_v7 = vld [vmem:[%s3107_s10 + $0x20] ss:$8 sps:$4 sm:$0xff]   ;;  %v2299_v58 = vrot.slane %v415_v52, 9 }
  0x2a   : > { %v312_v40 = vsel %vm3136_vm5, %v307_v35, %v311_v27  ;;  %v349_v6 = vrot.slane %v348_v3, 4  ;;  %v2342_v3 = vld [vmem:[%s3107_s10 + $0xc] sm:$0x1]  ;;  %v2485_v43 = vld [vmem:[%s3107_s10 + $0x40] sm:$0xf] }
  0x2b   : > { %v2290_v49 = vcombine.low %v312_v40, %v326_v45  ;;  %v335_v4 = vrot.slane %v334_v2, 4  ;;  %v2962_v45 = vld [vmem:[%s3509_s1 + $0x178] sm:$0xff]   ;;  %v2341_v2 = vld [vmem:[%s3107_s10 + $0x8] sm:$0xf] }
  0x2c   : > { %2690 = vmatpush3.bf16.msra.mxu0 %v2942_v13  ;;  %2818 = vmatpush3.bf16.msra.mxu1 %v2941_v11  ;;  %v265_v11 = vld [vmem:[%s3107_s10 + $0x34] sm:$0x1]  ;;  %v354_v12 = vsel %vm3136_vm5, %v349_v6, %v353_v0  ;;  %v266_v13 = vld [vmem:[%s3107_s10 + $0x38] sm:$0xf]  ;;  %v886_v6 = vshrl.u32 %v2341_v2, 16  ;;  %v2968_v52 = vld [vmem:[%s3509_s1 + $0x1c8] sm:$0xff]  }
  0x2d   : > { %2691 = vmatprep.subr.bf16.mxu0 %v2944_v29  ;;  %2819 = vmatprep.subr.bf16.mxu1 %v2945_v30  ;;  %v340_v9 = vsel %vm3136_vm5, %v335_v4, %v339_v60  ;;  %v365_v18 = vshll.u32 %v265_v11, 16  ;;  %v370_v19 = vshrl.u32 %v266_v13, 16  ;;  %v373_v20 = vshll.u32 %v266_v13, 16  ;;  %v2960_v29 = vld [vmem:[%s3509_s1 + $0xf0] sm:$0xff]  }
  0x2e   : > { %734 = vmatprep.mubr.bf16.mxu0 %v2290_v49  ;;  %v2291_v17 = vcombine.low %v340_v9, %v354_v12  ;;  %v2963_v49 = vld [vmem:[%s3509_s1 + $0xf8] sm:$0xff]   ;;  %v2343_v4 = vld [vmem:[%s3107_s10 + $0x10] sm:$0xf]  ;;  %v888_v12 = vrot.slane %v886_v6, 4 }
  0x2f   : > { %735 = vmatmul.mubr.bf16.gmra.mrb[4].mxu0 %v2943_v38  ;;  %v367_v26 = vrot.slane %v365_v18, 5  ;;  %v372_v27 = vrot.slane %v370_v19, 4  ;;  %v375_v28 = vrot.slane %v373_v20, 5  ;;  %v2297_v38 = vrot.slane %v411_v32, 9  ;;  %v2361_v18 = vld [vmem:[%s3107_s10 + $0x8] sm:$0xe] }
  0x30   : > { %2692 = vmatpush3.bf16.msra.mxu0 %v2946_v34  ;;  %2820 = vmatpush3.bf16.msra.mxu1 %v2945_v30  ;;  %v362_v30 = vor.u32 %v361_v23, %v358_v22  ;;  %v2961_v34 = vld [vmem:[%s3509_s1 + $0x138] sm:$0xff]   ;;  %v900_v9 = vshrl.u32 %v2343_v4, 16  ;;  %v903_v10 = vshll.u32 %v2343_v4, 16  ;;  %v2362_v19 = vld [vmem:[%s3107_s10 + $0xc] sm:$0x1]  ;;  %v2377_v23 = vrot.slane %v2361_v18, 9 }
  0x31   : > { %2693 = vmatprep.subr.bf16.mxu0 %v2947_v36  ;;  %2821 = vmatprep.subr.bf16.mxu1 %v2948_v39  ;;  %v376_v35 = vor.u32 %v375_v28, %v372_v27  ;;  %v413_v36 = vld [vmem:[%s3107_s10 + $0x28] sm:$0xe]  ;;  %v2364_v22 = vld [vmem:[%s3107_s10 + $0x14] sm:$0x1]  ;;  %v1051_v24 = vrot.slane %v2362_v19, 5  ;;  %v2976_v18 = vld [vmem:[%s3509_s1 + $0x218] sm:$0xff]  }
  0x32   : > { %742 = vmatprep.mubr.bf16.mxu0 %v2291_v17  ;;  %v363_v40 = vrot.slane %v362_v30, 4  ;;  %v902_v15 = vrot.slane %v900_v9, 4  ;;  %v905_v16 = vrot.slane %v903_v10, 5  ;;  %v1055_v27 = vrot.slane %v2364_v22, 5  ;;  %v2965_v30 = vld [vmem:[%s3509_s1 + $0x1c0] sm:$0xff]  }
  0x33   : > { %v377_v46 = vrot.slane %v376_v35, 4  ;;  %v2964_v32 = vld [vmem:[%s3107_s10 + $0x8] ss:$8 sps:$4 sm:$0xff]   ;;  %v2365_v35 = vld [vmem:[%s3107_s10 + $0x18] sm:$0xe] }
  0x34   : > { %2694 = vmatpush3.bf16.msra.mxu0 %v2949_v41  ;;  %2822 = vmatpush3.bf16.msra.mxu1 %v2948_v39  ;;  %v456_v39 = vrot.slane %v412_v33, 5  ;;  %v2298_v41 = vrot.slane %v413_v36, 9  ;;  %v368_v50 = vsel %vm3136_vm5, %v363_v40, %v367_v26  ;;  %v2366_v36 = vld [vmem:[%s3107_s10 + $0x1c] sm:$0x1]  ;;  %v2368_v40 = vld [vmem:[%s3107_s10 + $0x24] sm:$0x1] }
  0x35   : > { %2695 = vmatprep.subr.bf16.mxu0 %v2951_v53  ;;  %2823 = vmatprep.subr.bf16.mxu1 %v2952_v57  ;;  %v416_v53 = vld [vmem:[%s3107_s10 + $0x34] sm:$0x1]  ;;  %v382_v54 = vsel %vm3136_vm5, %v377_v46, %v381_v31 }
  0x36   : > { %v457_v48 = vsel %vm3130_vm4, %v2297_v38, %v456_v39  ;;  %v461_v51 = vsel %vm3130_vm4, %v2298_v41, %v460_v42  ;;  %v464_v59 = vrot.slane %v416_v53, 5  ;;  %v2292_v60 = vcombine.low %v368_v50, %v382_v54  ;;  %v2367_v39 = vld [vmem:[%s3107_s10 + $0x20] sm:$0xe]  ;;  %v2969_v54 = vld [vmem:[%s3509_s1 + $0x208] sm:$0xff]  }
  0x37   : > { %743 = vmatmul.mubr.bf16.gmra.mrb[8].mxu0 %v2950_v7  ;;  %v2303_v55 = vcombine.low %v457_v48, %v461_v51  ;;  %v889_v7 = vshll.u32 %v2341_v2, 16  ;;  %v2379_v41 = vrot.slane %v2365_v35, 9  ;;  %v1059_v42 = vrot.slane %v2366_v36, 5  ;;  %v2967_v50 = vld [vmem:[%s3509_s1 + $0x180] sm:$0xff]  }
  0x38   : > { %2696 = vmatpush3.bf16.msra.mxu0 %v2953_v61  ;;  %2824 = vmatpush3.bf16.msra.mxu1 %v2952_v57  ;;  %v418_v57 = vld [vmem:[%s3107_s10 + $0x3c] sm:$0x1]  ;;  %v2300_v61 = vrot.slane %v417_v56, 9  ;;  %v465_v63 = vsel %vm3130_vm4, %v2299_v58, %v464_v59  ;;  %v2380_v46 = vrot.slane %v2367_v39, 9  ;;  %v2345_v56 = vld [vmem:[%s3107_s10 + $0x18] sm:$0xf] }
  0x39   : > { %2697 = vmatprep.subr.bf16.mxu0 %v2954_v1  ;;  %2825 = vmatprep.subr.bf16.mxu1 %v2955_v5  ;;  %v468_v62 = vrot.slane %v418_v57, 5  ;;  %v891_v13 = vrot.slane %v889_v7, 5  ;;  %v2346_v57 = vld [vmem:[%s3107_s10 + $0x1c] sm:$0x1]  ;;  %v2347_v58 = vld [vmem:[%s3107_s10 + $0x20] sm:$0xf] }
  0x3a   : > { %2811 = vmatprep.mubr.bf16.mxu1 %v2303_v55  ;;  %750 = vmatprep.mubr.bf16.mxu0 %v2292_v60  ;;  %v2970_v55 = vld [vmem:[%s3509_s1 + $0x188] sm:$0xff]   ;;  %v2348_v59 = vld [vmem:[%s3107_s10 + $0x24] sm:$0x1]  ;;  %v914_v60 = vshrl.u32 %v2345_v56, 16 }
  0x3b   : > { %v469_v0 = vsel %vm3130_vm4, %v2300_v61, %v468_v62  ;;  %v892_v20 = vor.u32 %v891_v13, %v888_v12  ;;  %v917_v61 = vshll.u32 %v2345_v56, 16  ;;  %v923_v62 = vshll.u32 %v2346_v57, 16  ;;  %v2974_v13 = vld [vmem:[%s3509_s1 + $0x190] sm:$0xff]   ;;  %v2356_v56 = vld [vmem:[%s3107_s10 + $0x44] sm:$0x1] }
  0x3c   : > { %2698 = vmatpush3.bf16.msra.mxu0 %v2956_v8  ;;  %2826 = vmatpush3.bf16.msra.mxu1 %v2955_v5  ;;  %v2304_v1 = vcombine.low %v465_v63, %v469_v0  ;;  %v2344_v5 = vld [vmem:[%s3107_s10 + $0x14] sm:$0x1]  ;;  %v895_v8 = vshll.u32 %v2342_v3, 16  ;;  %v928_v63 = vshrl.u32 %v2347_v58, 16  ;;  %v931_v0 = vshll.u32 %v2347_v58, 16 }
  0x3d   : > { %2699 = vmatprep.subr.bf16.mxu0 %v2958_v21  ;;  %2827 = vmatprep.subr.bf16.mxu1 %v2959_v25  ;;  %v909_v11 = vshll.u32 %v2344_v5, 16  ;;  %v2363_v21 = vld [vmem:[%s3107_s10 + $0x10] sm:$0xe]  ;;  %v893_v28 = vrot.slane %v892_v20, 4  ;;  %v916_v2 = vrot.slane %v914_v60, 4  ;;  %v919_v3 = vrot.slane %v917_v61, 5 }
  0x3e   : > { %2812 = vmatmul.mubr.bf16.gmra.mrb[4].mxu1 %v2304_v1  ;;  %v897_v14 = vrot.slane %v895_v8, 5  ;;  %v2378_v26 = vrot.slane %v2363_v21, 9  ;;  %v937_v1 = vshll.u32 %v2348_v59, 16  ;;  %v930_v4 = vrot.slane %v928_v63, 4  ;;  %v2972_v8 = vld [vmem:[%s3509_s1 + $0x1d0] sm:$0xff]   ;;  %v2977_v20 = vld [vmem:[%s3509_s1 + $0x198] sm:$0xff]  }
  0x3f   : > { %751 = vmatmul.mubr.bf16.gmra.mrb[12].mxu0 %v2957_v47  ;;  %v911_v17 = vrot.slane %v909_v11, 5  ;;  %v1063_v47 = vrot.slane %v2368_v40, 5  ;;  %v933_v5 = vrot.slane %v931_v0, 5  ;;  %v920_v6 = vor.u32 %v919_v3, %v916_v2  ;;  %v2973_v11 = vld [vmem:[%s3509_s1 + $0x210] sm:$0xff]   ;;  %v2349_v21 = vld [vmem:[%s3107_s10 + $0x28] sm:$0xf] }
  0x40   : > { %2700 = vmatpush3.bf16.msra.mxu0 %v2960_v29  ;;  %2828 = vmatpush3.bf16.msra.mxu1 %v2959_v25  ;;  %v906_v25 = vor.u32 %v905_v16, %v902_v15  ;;  %v1052_v29 = vsel %vm3130_vm4, %v2377_v23, %v1051_v24  ;;  %v1056_v33 = vsel %vm3130_vm4, %v2378_v26, %v1055_v27  ;;  %v925_v7 = vrot.slane %v923_v62, 5  ;;  %v2971_v15 = vld [vmem:[%s3107_s10 + $0x18] ss:$8 sps:$4 sm:$0xff]   ;;  %v2350_v23 = vld [vmem:[%s3107_s10 + $0x2c] sm:$0x1]  ;;  %v2986_v62 = vld [vmem:[%s3509_s1 + $0x1f0] sm:$0xff]  }
  0x41   : > { %2701 = vmatprep.subr.bf16.mxu0 %v2961_v34  ;;  %2829 = vmatprep.subr.bf16.mxu1 %v2962_v45  ;;  %v2966_v34 = vld [vmem:[%s3509_s1 + $0x200] sm:$0xff]   ;;  %v898_v37 = vsel %vm3136_vm5, %v893_v28, %v897_v14  ;;  %v2385_v38 = vcombine.low %v1052_v29, %v1056_v33  ;;  %v1064_v51 = vsel %vm3130_vm4, %v2380_v46, %v1063_v47  ;;  %v939_v10 = vrot.slane %v937_v1, 5  ;;  %v2975_v16 = vld [vmem:[%s3509_s1 + $0x1d8] sm:$0xff]   ;;  %v2351_v24 = vld [vmem:[%s3107_s10 + $0x30] sm:$0xf] }
  0x42   : > { %v907_v31 = vrot.slane %v906_v25, 4  ;;  %v934_v9 = vor.u32 %v933_v5, %v930_v4  ;;  %v921_v12 = vrot.slane %v920_v6, 4  ;;  %v2352_v25 = vld [vmem:[%s3107_s10 + $0x34] sm:$0x1]  ;;  %v942_v26 = vshrl.u32 %v2349_v21, 16  ;;  %v2982_v46 = vld [vmem:[%s3509_s1 + $0x1e8] sm:$0xff]  }
  0x43   : > { %2831 = vmatprep.mubr.bf16.mxu1 %v2385_v38  ;;  %v945_v27 = vshll.u32 %v2349_v21, 16  ;;  %v951_v28 = vshll.u32 %v2350_v23, 16  ;;  %v956_v29 = vshrl.u32 %v2351_v24, 16  ;;  %v2980_v38 = vld [vmem:[%s3509_s1 + $0x220] sm:$0xff]   ;;  %v2369_v61 = vld [vmem:[%s3107_s10 + $0x28] sm:$0xe] }
  0x44   : > { %2702 = vmatpush3.bf16.msra.mxu0 %v2963_v49  ;;  %2830 = vmatpush3.bf16.msra.mxu1 %v2962_v45  ;;  %v912_v45 = vsel %vm3136_vm5, %v907_v31, %v911_v17  ;;  %v1060_v49 = vsel %vm3130_vm4, %v2379_v41, %v1059_v42  ;;  %v935_v14 = vrot.slane %v934_v9, 4  ;;  %v926_v17 = vsel %vm3136_vm5, %v921_v12, %v925_v7  ;;  %v2981_v42 = vld [vmem:[%s3509_s1 + $0x1a0] sm:$0xff]   ;;  %v2370_v2 = vld [vmem:[%s3107_s10 + $0x2c] sm:$0x1]  ;;  %v2371_v6 = vld [vmem:[%s3107_s10 + $0x30] sm:$0xe] }
  0x45   : > { %2739 = vmatprep.subr.bf16.mxu0 %v2965_v30  ;;  %2839 = vmatprep.subr.bf16.mxu1 %v2966_v34  ;;  %v2357_v48 = vcombine.low %v898_v37, %v912_v45  ;;  %v2386_v53 = vcombine.low %v1060_v49, %v1064_v51  ;;  %v959_v30 = vshll.u32 %v2351_v24, 16  ;;  %v965_v31 = vshll.u32 %v2352_v25, 16  ;;  %v2979_v37 = vld [vmem:[%s3509_s1 + $0x1e0] sm:$0xff]   ;;  %v2983_v49 = vld [vmem:[%s3509_s1 + $0x228] sm:$0xff]  }
  0x46   : > { %v940_v19 = vsel %vm3136_vm5, %v935_v14, %v939_v10  ;;  %v947_v33 = vrot.slane %v945_v27, 5  ;;  %v953_v35 = vrot.slane %v951_v28, 5  ;;  %v2984_v51 = vld [vmem:[%s3509_s1 + $0x1a8] sm:$0xff]   ;;  %v993_v1 = vshll.u32 %v2356_v56, 16  ;;  %v2375_v23 = vld [vmem:[%s3107_s10 + $0x40] sm:$0xe] }
  0x47   : > { %1338 = vmatprep.mubr.bf16.mxu0 %v2357_v48  ;;  %2832 = vmatmul.mubr.bf16.vlgmr.msra.gmra.mrb[0].mxu1 %v2386_v53  ;;  %v2358_v22 = vcombine.low %v926_v17, %v940_v19  ;;  %v961_v36 = vrot.slane %v959_v30, 5  ;;  %v967_v41 = vrot.slane %v965_v31, 5  ;;  %v2978_v48 = vld [vmem:[%s3107_s10 + $0x28] ss:$8 sps:$4 sm:$0xff]   ;;  %v2381_v3 = vrot.slane %v2369_v61, 9 }
  0x48   : > { %1339 = vmatmul.mubr.bf16.vlgmr.msra.gmra.mrb[16].mxu0 %v2964_v32  ;;  %2840 = vmatpush3.bf16.msra.mxu1 %v2966_v34  ;;  %v944_v32 = vrot.slane %v942_v26, 4  ;;  %v958_v34 = vrot.slane %v956_v29, 4  ;;  %v1067_v7 = vrot.slane %v2370_v2, 5  ;;  %v2382_v12 = vrot.slane %v2371_v6, 9  ;;  %v2373_v19 = vld [vmem:[%s3107_s10 + $0x38] sm:$0xe] }
  0x49   : > { %2740 = vmatpush3.bf16.msra.mxu0 %v2967_v50  ;;  %2841 = vmatprep.subr.bf16.mxu1 %v2969_v54  ;;  %v2376_v24 = vld [vmem:[%s3107_s10 + $0x44] sm:$0x1]  ;;  %v2383_v25 = vrot.slane %v2373_v19, 9  ;;  %v2985_v28 = vld [vmem:[%s3107_s10 + $0x38] ss:$8 sps:$4 sm:$0xff]   ;;  %v2384_v30 = vrot.slane %v2375_v23, 9 }
  0x4a   : > { %2741 = vmatprep.subr.bf16.mxu0 %v2968_v52  ;;  %1346 = vmatprep.mubr.bf16.mxu0 %v2358_v22  ;;  %v948_v39 = vor.u32 %v947_v33, %v944_v32  ;;  %v962_v40 = vor.u32 %v961_v36, %v958_v34  ;;  %v2353_v52 = vld [vmem:[%s3107_s10 + $0x38] sm:$0xf]  ;;  %v1068_v14 = vsel %vm3130_vm4, %v2381_v3, %v1067_v7  ;;  %v2988_v31 = vld [vmem:[%s3509_s1 + $0x1b0] sm:$0xff]   ;;  %v1079_v33 = vrot.slane %v2376_v24, 5  ;;  %v2497_v7 = vld [vmem:[%s3107_s10 + $0x20] sm:$0xe] }
  0x4b   : > { %v970_v58 = vshrl.u32 %v2353_v52, 16  ;;  %v973_v59 = vshll.u32 %v2353_v52, 16  ;;  %v2989_v34 = vld [vmem:[%s3509_s1 + $0x1f8] sm:$0xff]   ;;  %v2493_v52 = vld [vmem:[%s3107_s10 + $0x10] sm:$0xe] }
  0x4c   : > { %2842 = vmatpush3.bf16.msra.mxu1 %v2969_v54  ;;  %v949_v45 = vrot.slane %v948_v39, 4  ;;  %v963_v47 = vrot.slane %v962_v40, 4  ;;  %v2354_v54 = vld [vmem:[%s3107_s10 + $0x3c] sm:$0x1]  ;;  %v2495_v56 = vld [vmem:[%s3107_s10 + $0x18] sm:$0xe] }
  0x4d   : > { %2742 = vmatpush3.bf16.msra.mxu0 %v2970_v55  ;;  %2843 = vmatprep.subr.bf16.mxu1 %v2973_v11  ;;  %v2355_v55 = vld [vmem:[%s3107_s10 + $0x40] sm:$0xf]  ;;  %v979_v60 = vshll.u32 %v2354_v54, 16  ;;  %v972_v4 = vrot.slane %v970_v58, 4  ;;  %v975_v5 = vrot.slane %v973_v59, 5  ;;  %v2990_v40 = vld [vmem:[%s3509_s1 + $0x238] sm:$0xff]  }
  0x4e   : > { %2743 = vmatprep.subr.bf16.mxu0 %v2972_v8  ;;  %v954_v50 = vsel %vm3136_vm5, %v949_v45, %v953_v35  ;;  %v968_v53 = vsel %vm3136_vm5, %v963_v47, %v967_v41  ;;  %v984_v63 = vshrl.u32 %v2355_v55, 16  ;;  %v987_v0 = vshll.u32 %v2355_v55, 16  ;;  %v2991_v41 = vld [vmem:[%s3509_s1 + $0x1b8] sm:$0xff]   ;;  %v2474_v45 = vld [vmem:[%s3107_s10 + $0x14] sm:$0x1] }
  0x4f   : > { %v2359_v57 = vcombine.low %v954_v50, %v968_v53  ;;  %v981_v8 = vrot.slane %v979_v60, 5  ;;  %v2476_v47 = vld [vmem:[%s3107_s10 + $0x1c] sm:$0x1]  ;;  %v1523_v50 = vshll.u32 %v2474_v45, 16  ;;  %v2494_v55 = vld [vmem:[%s3107_s10 + $0x14] sm:$0x1] }
  0x50   : > { %2844 = vmatpush3.bf16.msra.mxu1 %v2973_v11  ;;  %1347 = vmatmul.mubr.bf16.gmra.mrb[20].mxu0 %v2971_v15  ;;  %v986_v9 = vrot.slane %v984_v63, 4  ;;  %v989_v10 = vrot.slane %v987_v0, 5  ;;  %v2372_v11 = vld [vmem:[%s3107_s10 + $0x34] sm:$0x1]  ;;  %v1537_v54 = vshll.u32 %v2476_v47, 16  ;;  %v2509_v63 = vrot.slane %v2493_v52, 9 }
  0x51   : > { %2744 = vmatpush3.bf16.msra.mxu0 %v2974_v13  ;;  %2845 = vmatprep.subr.bf16.mxu1 %v2976_v18  ;;  %v976_v13 = vor.u32 %v975_v5, %v972_v4  ;;  %v1071_v15 = vrot.slane %v2372_v11, 5  ;;  %v2496_v60 = vld [vmem:[%s3107_s10 + $0x1c] sm:$0x1]  ;;  %v1525_v61 = vrot.slane %v1523_v50, 5  ;;  %v1679_v0 = vrot.slane %v2494_v55, 5 }
  0x52   : > { %2745 = vmatprep.subr.bf16.mxu0 %v2975_v16  ;;  %1354 = vmatprep.mubr.bf16.mxu0 %v2359_v57  ;;  %v2987_v16 = vld [vmem:[%s3509_s1 + $0x230] sm:$0xff]   ;;  %v990_v17 = vor.u32 %v989_v10, %v986_v9  ;;  %v1539_v2 = vrot.slane %v1537_v54, 5  ;;  %v2510_v3 = vrot.slane %v2495_v56, 9  ;;  %v1683_v4 = vrot.slane %v2496_v60, 5  ;;  %v2499_v9 = vld [vmem:[%s3107_s10 + $0x28] sm:$0xe] }
  0x53   : > { %v977_v21 = vrot.slane %v976_v13, 4  ;;  %v1072_v22 = vsel %vm3130_vm4, %v2382_v12, %v1071_v15  ;;  %v1680_v6 = vsel %vm3130_vm4, %v2509_v63, %v1679_v0  ;;  %v2500_v12 = vld [vmem:[%s3107_s10 + $0x2c] sm:$0x1]  ;;  %v2511_v13 = vrot.slane %v2497_v7, 9  ;;  %v2478_v23 = vld [vmem:[%s3107_s10 + $0x24] sm:$0x1] }
  0x54   : > { %2846 = vmatpush3.bf16.msra.mxu1 %v2976_v18  ;;  %v995_v18 = vrot.slane %v993_v1, 5  ;;  %v991_v26 = vrot.slane %v990_v17, 4  ;;  %v2387_v27 = vcombine.low %v1068_v14, %v1072_v22  ;;  %v1684_v11 = vsel %vm3130_vm4, %v2510_v3, %v1683_v4  ;;  %v2992_v17 = vld [vmem:[%s3107_s10 + $0x10] ss:$8 sps:$4 sm:$0xff]   ;;  %v2479_v24 = vld [vmem:[%s3107_s10 + $0x28] sm:$0xf] }
  0x55   : > { %2746 = vmatpush3.bf16.msra.mxu0 %v2977_v20  ;;  %2847 = vmatprep.subr.bf16.mxu1 %v2980_v38  ;;  %v2374_v20 = vld [vmem:[%s3107_s10 + $0x3c] sm:$0x1]  ;;  %v982_v32 = vsel %vm3136_vm5, %v977_v21, %v981_v8  ;;  %v2498_v8 = vld [vmem:[%s3107_s10 + $0x24] sm:$0x1]  ;;  %v1691_v19 = vrot.slane %v2500_v12, 5 }
  0x56   : > { %2747 = vmatprep.subr.bf16.mxu0 %v2979_v37  ;;  %v1075_v29 = vrot.slane %v2374_v20, 5  ;;  %v996_v35 = vsel %vm3136_vm5, %v991_v26, %v995_v18  ;;  %2835 = vmatprep.mubr.bf16.mxu1 %v2387_v27  ;;  %v1687_v14 = vrot.slane %v2498_v8, 5  ;;  %v2512_v18 = vrot.slane %v2499_v9, 9  ;;  %v2477_v20 = vld [vmem:[%s3107_s10 + $0x20] sm:$0xf] }
  0x57   : > { %v2360_v37 = vcombine.low %v982_v32, %v996_v35  ;;  %v1556_v35 = vshrl.u32 %v2479_v24, 16  ;;  %v2505_v54 = vld [vmem:[%s3107_s10 + $0x40] sm:$0xe]  ;;  %v2506_v55 = vld [vmem:[%s3107_s10 + $0x44] sm:$0x1] }
  0x58   : > { %2848 = vmatpush3.bf16.msra.mxu1 %v2980_v38  ;;  %1355 = vmatmul.mubr.bf16.gmra.mrb[24].mxu0 %v2978_v48  ;;  %v1076_v36 = vsel %vm3130_vm4, %v2383_v25, %v1075_v29  ;;  %v1080_v38 = vsel %vm3130_vm4, %v2384_v30, %v1079_v33  ;;  %v1688_v22 = vsel %vm3130_vm4, %v2511_v13, %v1687_v14  ;;  %v2480_v25 = vld [vmem:[%s3107_s10 + $0x2c] sm:$0x1]  ;;  %v1545_v29 = vshll.u32 %v2477_v20, 16  ;;  %v2501_v30 = vld [vmem:[%s3107_s10 + $0x30] sm:$0xe] }
  0x59   : > { %2748 = vmatpush3.bf16.msra.mxu0 %v2981_v42  ;;  %2849 = vmatprep.subr.bf16.mxu1 %v2983_v49  ;;  %v2388_v39 = vcombine.low %v1076_v36, %v1080_v38  ;;  %v2473_v42 = vld [vmem:[%s3107_s10 + $0x10] sm:$0xf]  ;;  %v1692_v27 = vsel %vm3130_vm4, %v2512_v18, %v1691_v19  ;;  %v2503_v36 = vld [vmem:[%s3107_s10 + $0x38] sm:$0xe]  ;;  %v2513_v45 = vrot.slane %v2501_v30, 9  ;;  %v2515_v60 = vrot.slane %v2505_v54, 9 }
  0x5a   : > { %2749 = vmatprep.subr.bf16.mxu0 %v2982_v46  ;;  %1362 = vmatprep.mubr.bf16.mxu0 %v2360_v37  ;;  %v2475_v46 = vld [vmem:[%s3107_s10 + $0x18] sm:$0xf]  ;;  %v1514_v48 = vshrl.u32 %v2473_v42, 16  ;;  %v2518_v33 = vcombine.low %v1688_v22, %v1692_v27  ;;  %v2504_v37 = vld [vmem:[%s3107_s10 + $0x3c] sm:$0x1]  ;;  %v2514_v50 = vrot.slane %v2503_v36, 9 }
  0x5b   : > { %2836 = vmatmul.mubr.bf16.gmra.mrb[4].mxu1 %v2388_v39  ;;  %v1531_v53 = vshll.u32 %v2475_v46, 16  ;;  %v1547_v39 = vrot.slane %v1545_v29, 5  ;;  %v2993_v14 = vld [vmem:[%s3107_s10 + $0x20] ss:$8 sps:$4 sm:$0xff]   ;;  %v1598_v29 = vshrl.u32 %v2485_v43, 16  ;;  %v1601_v30 = vshll.u32 %v2485_v43, 16 }
  0x5c   : > { %2850 = vmatpush3.bf16.msra.mxu1 %v2983_v49  ;;  %v1517_v49 = vshll.u32 %v2473_v42, 16  ;;  %v1516_v57 = vrot.slane %v1514_v48, 4  ;;  %v1558_v42 = vrot.slane %v1556_v35, 4 }
  0x5d   : > { %2750 = vmatpush3.bf16.msra.mxu0 %v2984_v51  ;;  %2851 = vmatprep.subr.bf16.mxu1 %v2987_v16  ;;  %v1528_v51 = vshrl.u32 %v2475_v46, 16 }
  0x5e   : > { %2751 = vmatprep.subr.bf16.mxu0 %v2986_v62  ;;  %v1519_v58 = vrot.slane %v1517_v49, 5  ;;  %v1533_v62 = vrot.slane %v1531_v53, 5  ;;  %v1699_v53 = vrot.slane %v2504_v37, 5  ;;  %v1600_v37 = vrot.slane %v1598_v29, 4 }
  0x5f   : > { %v1530_v59 = vrot.slane %v1528_v51, 4 }
  0x60   : > { %2852 = vmatpush3.bf16.msra.mxu1 %v2987_v16  ;;  %1363 = vmatmul.mubr.bf16.gmra.mrb[28].mxu0 %v2985_v28  ;;  %v1520_v1 = vor.u32 %v1519_v58, %v1516_v57  ;;  %v2517_v16 = vcombine.low %v1680_v6, %v1684_v11  ;;  %v1542_v28 = vshrl.u32 %v2477_v20, 16  ;;  %v2507_v58 = vld [vmem:[%s3107_s10 + $0x48] sm:$0xe]  ;;  %v2483_v6 = vld [vmem:[%s3107_s10 + $0x38] sm:$0xf] }
  0x61   : > { %2752 = vmatpush3.bf16.msra.mxu0 %v2988_v31  ;;  %2853 = vmatprep.subr.bf16.mxu1 %v2990_v40  ;;  %v1534_v5 = vor.u32 %v1533_v62, %v1530_v59  ;;  %v2502_v31 = vld [vmem:[%s3107_s10 + $0x34] sm:$0x1]  ;;  %v2508_v59 = vld [vmem:[%s3107_s10 + $0x4c] sm:$0x1]  ;;  %v1703_v62 = vrot.slane %v2506_v55, 5  ;;  %v2516_v63 = vrot.slane %v2507_v58, 9 }
  0x62   : > { %2753 = vmatprep.subr.bf16.mxu0 %v2989_v34  ;;  %v1521_v10 = vrot.slane %v1520_v1, 4  ;;  %2855 = vmatprep.mubr.bf16.mxu1 %v2517_v16  ;;  %v1551_v34 = vshll.u32 %v2478_v23, 16  ;;  %v1544_v38 = vrot.slane %v1542_v28, 4  ;;  %v1695_v46 = vrot.slane %v2502_v31, 5  ;;  %v2481_v1 = vld [vmem:[%s3107_s10 + $0x30] sm:$0xf] }
  0x63   : > { %v1535_v15 = vrot.slane %v1534_v5, 4  ;;  %v1707_v0 = vrot.slane %v2508_v59, 5  ;;  %v2482_v5 = vld [vmem:[%s3107_s10 + $0x34] sm:$0x1]  ;;  %v1570_v7 = vshrl.u32 %v2481_v1, 16  ;;  %v1704_v8 = vsel %vm3130_vm4, %v2515_v60, %v1703_v62 }
  0x64   : > { %2854 = vmatpush3.bf16.msra.mxu1 %v2990_v40  ;;  %v1526_v21 = vsel %vm3136_vm5, %v1521_v10, %v1525_v61  ;;  %v1559_v40 = vshll.u32 %v2479_v24, 16  ;;  %v1548_v47 = vor.u32 %v1547_v39, %v1544_v38  ;;  %v1553_v48 = vrot.slane %v1551_v34, 5  ;;  %v2484_v10 = vld [vmem:[%s3107_s10 + $0x3c] sm:$0x1]  ;;  %v2486_v24 = vld [vmem:[%s3107_s10 + $0x44] sm:$0x1] }
  0x65   : > { %2754 = vmatpush3.bf16.msra.mxu0 %v2991_v41  ;;  %v1540_v26 = vsel %vm3136_vm5, %v1535_v15, %v1539_v2  ;;  %v1565_v41 = vshll.u32 %v2480_v25, 16  ;;  %v1696_v52 = vsel %vm3130_vm4, %v2513_v45, %v1695_v46  ;;  %v1700_v61 = vsel %vm3130_vm4, %v2514_v50, %v1699_v53  ;;  %v2487_v25 = vld [vmem:[%s3107_s10 + $0x48] sm:$0xf]  ;;  %v2488_v28 = vld [vmem:[%s3107_s10 + $0x4c] sm:$0x1] }
  0x66   : > { %v2489_v32 = vcombine.low %v1526_v21, %v1540_v26  ;;  %v1561_v49 = vrot.slane %v1559_v40, 5  ;;  %v1549_v56 = vrot.slane %v1548_v47, 4  ;;  %v2519_v4 = vcombine.low %v1696_v52, %v1700_v61  ;;  %v2995_v58 = vld [vmem:[%s3107_s10 + $0x40] ss:$8 sps:$4 sm:$0xff]  }
  0x67   : > { %2856 = vmatmul.mubr.bf16.vlgmr.msra.gmra.mrb[0].mxu1 %v2518_v33  ;;  %v1567_v51 = vrot.slane %v1565_v41, 5  ;;  %v1708_v9 = vsel %vm3130_vm4, %v2516_v63, %v1707_v0  ;;  %v1573_v11 = vshll.u32 %v2481_v1, 16  ;;  %v1579_v12 = vshll.u32 %v2482_v5, 16 }
  0x68   : > { %1966 = vmatprep.mubr.bf16.mxu0 %v2489_v32  ;;  %v1562_v57 = vor.u32 %v1561_v49, %v1558_v42  ;;  %v1554_v2 = vsel %vm3136_vm5, %v1549_v56, %v1553_v48  ;;  %2859 = vmatprep.mubr.bf16.mxu1 %v2519_v4  ;;  %v2520_v15 = vcombine.low %v1704_v8, %v1708_v9  ;;  %v1572_v16 = vrot.slane %v1570_v7, 4 }
  0x69   : > { %1967 = vmatmul.mubr.bf16.vlgmr.msra.gmra.mrb[32].mxu0 %v2992_v17  ;;  %v1584_v17 = vshrl.u32 %v2483_v6, 16  ;;  %v1575_v19 = vrot.slane %v1573_v11, 5  ;;  %v1581_v20 = vrot.slane %v1579_v12, 5  ;;  %v1587_v21 = vshll.u32 %v2483_v6, 16 }
  0x6a   : > { %v1563_v3 = vrot.slane %v1562_v57, 4  ;;  %v1593_v23 = vshll.u32 %v2484_v10, 16  ;;  %v1607_v32 = vshll.u32 %v2486_v24, 16  ;;  %v1612_v33 = vshrl.u32 %v2487_v25, 16 }
  0x6b   : > { %v1586_v22 = vrot.slane %v1584_v17, 4  ;;  %v1576_v26 = vor.u32 %v1575_v19, %v1572_v16  ;;  %v1589_v27 = vrot.slane %v1587_v21, 5  ;;  %v1615_v34 = vshll.u32 %v2487_v25, 16 }
  0x6c   : > { %v1568_v13 = vsel %vm3136_vm5, %v1563_v3, %v1567_v51  ;;  %v1595_v31 = vrot.slane %v1593_v23, 5  ;;  %v1603_v38 = vrot.slane %v1601_v30, 5  ;;  %v1614_v39 = vrot.slane %v1612_v33, 4  ;;  %v2994_v51 = vld [vmem:[%s3107_s10 + $0x30] ss:$8 sps:$4 sm:$0xff]   ;;  %s2603_s10 = sshll.u32 %s3518_s16, 5 }
  0x6d   : > { %v2490_v18 = vcombine.low %v1554_v2, %v1568_v13  ;;  %v1577_v35 = vrot.slane %v1576_v26, 4  ;;  %v1590_v36 = vor.u32 %v1589_v27, %v1586_v22  ;;  %v1617_v40 = vrot.slane %v1615_v34, 5  ;;  %s3489_s27 = scalar_lea.vmem %s3510_s2, %s2603_s10 }
  0x6e   : > { %v1621_v41 = vshll.u32 %v2488_v28, 16  ;;  %v1604_v46 = vor.u32 %v1603_v38, %v1600_v37  ;;  %v1609_v47 = vrot.slane %v1607_v32, 5 }
  0x6f   : > { %2860 = vmatmul.mubr.bf16.gmra.mrb[4].mxu1 %v2520_v15  ;;  %1974 = vmatprep.mubr.bf16.mxu0 %v2490_v18  ;;  %v1582_v42 = vsel %vm3136_vm5, %v1577_v35, %v1581_v20  ;;  %v1591_v45 = vrot.slane %v1590_v36, 4  ;;  %v1618_v48 = vor.u32 %v1617_v40, %v1614_v39 }
  0x70   : > { %v1623_v49 = vrot.slane %v1621_v41, 5  ;;  %v1605_v52 = vrot.slane %v1604_v46, 4 }
  0x71   : > { %1975 = vmatmul.mubr.bf16.gmra.mrb[36].mxu0 %v2993_v14  ;;  %v1596_v50 = vsel %vm3136_vm5, %v1591_v45, %v1595_v31  ;;  %v1619_v54 = vrot.slane %v1618_v48, 4 }
  0x72   : > { %v2491_v53 = vcombine.low %v1582_v42, %v1596_v50  ;;  %v1610_v55 = vsel %vm3136_vm5, %v1605_v52, %v1609_v47 }
  0x73   : > { %v1624_v56 = vsel %vm3136_vm5, %v1619_v54, %v1623_v49 }
  0x74   : > { %1982 = vmatprep.mubr.bf16.mxu0 %v2491_v53  ;;  %v2492_v57 = vcombine.low %v1610_v55, %v1624_v56 }
  0x79   : > { %1983 = vmatmul.mubr.bf16.gmra.mrb[40].mxu0 %v2994_v51 }
  0x7a   : > { %1990 = vmatprep.mubr.bf16.mxu0 %v2492_v57 }
  0x81   : > { %1991 = vmatmul.mubr.bf16.gmra.mrb[44].mxu0 %v2995_v58 }
  0xfa   : > { %v2651_v59 = vpop.f32.mrb[0].mxu0 }
  0xfb   : > { %v2652_v60 = vpop.f32.mrb[1].mxu0 }
  0xfc   : > { %v2653_v61 = vadd.f32 %v2652_v60, %v2651_v59  ;;  %v2654_v62 = vpop.f32.mrb[2].mxu0 }
  0xfd   : > { %v2655_v63 = vpop.f32.mrb[3].mxu0 }
  0xfe   : > { %v2656_v0 = vadd.f32 %v2655_v63, %v2654_v62 }
 0x102   : > { %v2657_v1 = vpop.f32.mrb[4].mxu0 }
 0x103   : > { %v2658_v2 = vpop.f32.mrb[5].mxu0 }
 0x104   : > { %v2659_v3 = vadd.f32 %v2658_v2, %v2657_v1  ;;  %v2660_v4 = vpop.f32.mrb[6].mxu0 }
 0x105   : > { %v2661_v5 = vpop.f32.mrb[7].mxu0 }
 0x106   : > { %v2662_v6 = vadd.f32 %v2661_v5, %v2660_v4 }
 0x10a   : > { %v2663_v7 = vpop.f32.mrb[8].mxu0 }
 0x10b   : > { %v2664_v44 = vpop.f32.mrb[9].mxu0 }
 0x10c   : > { %v2665_v8 = vadd.f32 %v2664_v44, %v2663_v7  ;;  %v2666_v9 = vpop.f32.mrb[10].mxu0 }
 0x10d   : > { %v2667_v10 = vpop.f32.mrb[11].mxu0 }
 0x10e   : > { %v2668_v11 = vadd.f32 %v2667_v10, %v2666_v9 }
 0x112   : > { %v2669_v12 = vpop.f32.mrb[12].mxu0 }
 0x113   : > { %v2670_v13 = vpop.f32.mrb[13].mxu0 }
 0x114   : > { %v2671_v14 = vadd.f32 %v2670_v13, %v2669_v12  ;;  %v2672_v15 = vpop.f32.mrb[14].mxu0 }
 0x115   : > { %v2673_v16 = vpop.f32.mrb[15].mxu0 }
 0x116   : > { %v2674_v17 = vadd.f32 %v2673_v16, %v2672_v15 }
 0x11b   : > { %v2703_v18 = vpop.f32.mrb[16].mxu0 }
 0x11c   : > { %v2704_v19 = vpop.f32.mrb[17].mxu0 }
 0x11d   : > { %v2705_v20 = vadd.f32 %v2704_v19, %v2703_v18  ;;  %v2706_v21 = vpop.f32.mrb[18].mxu0 }
 0x11e   : > { %v2707_v43 = vpop.f32.mrb[19].mxu0 }
 0x11f   : > { %v2866_v22 = vadd.f32 %v2705_v20, %v2653_v61  ;;  %v2708_v23 = vadd.f32 %v2707_v43, %v2706_v21 }
 0x121   : > { %v2872_v24 = vadd.f32 %v2708_v23, %v2656_v0 }
 0x123   : > { %v2709_v25 = vpop.f32.mrb[20].mxu0 }
 0x124   : > { %v2710_v26 = vpop.f32.mrb[21].mxu0 }
 0x125   : > { %v2711_v27 = vadd.f32 %v2710_v26, %v2709_v25  ;;  %v2712_v28 = vpop.f32.mrb[22].mxu0 }
 0x126   : > { %v2713_v29 = vpop.f32.mrb[23].mxu0 }
 0x127   : > { %v2863_v30 = vadd.f32 %v2711_v27, %v2659_v3  ;;  %v2714_v31 = vadd.f32 %v2713_v29, %v2712_v28 }
 0x129   : > { %v2869_v32 = vadd.f32 %v2714_v31, %v2662_v6 }
 0x12b   : > { %v2715_v33 = vpop.f32.mrb[24].mxu0 }
 0x12c   : > { %v2716_v34 = vpop.f32.mrb[25].mxu0 }
 0x12d   : > { %v2717_v35 = vadd.f32 %v2716_v34, %v2715_v33  ;;  %v2718_v36 = vpop.f32.mrb[26].mxu0 }
 0x12e   : > { %v2719_v37 = vpop.f32.mrb[27].mxu0 }
 0x12f   : > { %v2878_v38 = vadd.f32 %v2717_v35, %v2665_v8  ;;  %v2720_v39 = vadd.f32 %v2719_v37, %v2718_v36 }
 0x131   : > { %v2884_v40 = vadd.f32 %v2720_v39, %v2668_v11 }
 0x133   : > { %v2721_v41 = vpop.f32.mrb[28].mxu0 }
 0x134   : > { %v2722_v42 = vpop.f32.mrb[29].mxu0 }
 0x135   : > { %v2723_v45 = vadd.f32 %v2722_v42, %v2721_v41  ;;  %v2724_v46 = vpop.f32.mrb[30].mxu0 }
 0x136   : > { %v2725_v47 = vpop.f32.mrb[31].mxu0 }
 0x137   : > { %v3481_v48 = vadd.f32 %v2723_v45, %v2671_v14  ;;  %v2726_v49 = vadd.f32 %v2725_v47, %v2724_v46 }
 0x139   : > { %v3483_v50 = vadd.f32 %v2726_v49, %v2674_v17 }
 0x13a   : > { %v2857_v51 = vpop.f32.mrb[0].mxu1 }
 0x13b   : > { %v2033_v53 = vpop.f32.mrb[1].mxu1 }
 0x13c   : > { %v2755_v52 = vpop.f32.mrb[32].mxu0  ;;  %v2858_v55 = vpop.f32.mrb[2].mxu1 }
 0x13d   : > { %v2756_v54 = vpop.f32.mrb[33].mxu0  ;;  %v2036_v58 = vpop.f32.mrb[3].mxu1 }
 0x13e   : > { %v2757_v56 = vadd.f32 %v2756_v54, %v2755_v52  ;;  %v2758_v57 = vpop.f32.mrb[34].mxu0 }
 0x13f   : > { %v2759_v59 = vpop.f32.mrb[35].mxu0 }
 0x140   : > { %v2867_v60 = vadd.f32 %v2866_v22, %v2757_v56  ;;  %v2760_v61 = vadd.f32 %v2759_v59, %v2758_v57 }
 0x142   : > { %v2868_v62 = vadd.f32 %v2867_v60, %v2033_v53  ;;  %v2873_v63 = vadd.f32 %v2872_v24, %v2760_v61  ;;  %v2861_v1 = vpop.f32.mrb[4].mxu1 }
 0x143   : > { %v2049_v2 = vpop.f32.mrb[5].mxu1 }
 0x144   : > { %v2874_v0 = vadd.f32 %v2873_v63, %v2036_v58  ;;  %v2150_v3 = vmul.f32 %v2868_v62, %v2868_v62  ;;  %v2761_v7 = vpop.f32.mrb[36].mxu0  ;;  %v2862_v44 = vpop.f32.mrb[6].mxu1 }
 0x145   : > { %v2762_v8 = vpop.f32.mrb[37].mxu0  ;;  %v2052_v9 = vpop.f32.mrb[7].mxu1 }
 0x146   : > { %v2615_v4 = vpack.c.bf16 %v2874_v0, %v2868_v62  ;;  %v2136_v5 = vadd.f32 %v2874_v0, %v2868_v62  ;;  %v2151_v6 = vmul.f32 %v2874_v0, %v2874_v0  ;;  %v2763_v11 = vadd.f32 %v2762_v8, %v2761_v7  ;;  %v2764_v12 = vpop.f32.mrb[38].mxu0 }
 0x147   : > { %v2765_v13 = vpop.f32.mrb[39].mxu0 }
 0x148   : > { %2616 = vst [vmem:[%s3489_s27] sm:$0xff] %v2615_v4   ;;  %v2158_v10 = vadd.f32 %v2151_v6, %v2150_v3  ;;  %v2864_v14 = vadd.f32 %v2863_v30, %v2763_v11  ;;  %v2766_v15 = vadd.f32 %v2765_v13, %v2764_v12 }
 0x14a   : > { %v2865_v16 = vadd.f32 %v2864_v14, %v2857_v51  ;;  %v2870_v17 = vadd.f32 %v2869_v32, %v2766_v15 }
 0x14c   : > { %v2137_v18 = vadd.f32 %v2865_v16, %v2136_v5  ;;  %v2152_v19 = vmul.f32 %v2865_v16, %v2865_v16  ;;  %v2871_v20 = vadd.f32 %v2870_v17, %v2858_v55  ;;  %v2767_v21 = vpop.f32.mrb[40].mxu0 }
 0x14d   : > { %v2768_v25 = vpop.f32.mrb[41].mxu0 }
 0x14e   : > { %v2159_v43 = vadd.f32 %v2158_v10, %v2152_v19  ;;  %v2620_v22 = vpack.c.bf16 %v2871_v20, %v2865_v16  ;;  %v2138_v23 = vadd.f32 %v2871_v20, %v2137_v18  ;;  %v2153_v24 = vmul.f32 %v2871_v20, %v2871_v20  ;;  %v2770_v27 = vpop.f32.mrb[42].mxu0 }
 0x14f   : > { %v2769_v26 = vadd.f32 %v2768_v25, %v2767_v21  ;;  %v2771_v29 = vpop.f32.mrb[43].mxu0 }
 0x150   : > { %2632 = vst [vmem:[%s3489_s27 + $0x8] sm:$0xff] %v2620_v22   ;;  %v2160_v28 = vadd.f32 %v2159_v43, %v2153_v24  ;;  %v2772_v30 = vadd.f32 %v2771_v29, %v2770_v27 }
 0x151   : > { %v2879_v31 = vadd.f32 %v2878_v38, %v2769_v26 }
 0x152   : > { %v2885_v34 = vadd.f32 %v2884_v40, %v2772_v30 }
 0x153   : > { %v2880_v33 = vadd.f32 %v2879_v31, %v2049_v2 }
 0x154   : > { %v2886_v36 = vadd.f32 %v2885_v34, %v2052_v9  ;;  %v2773_v37 = vpop.f32.mrb[44].mxu0 }
 0x155   : > { %v2139_v32 = vadd.f32 %v2880_v33, %v2138_v23  ;;  %v2154_v35 = vmul.f32 %v2880_v33, %v2880_v33  ;;  %v2774_v39 = vpop.f32.mrb[45].mxu0 }
 0x156   : > { %v2625_v42 = vpack.c.bf16 %v2886_v36, %v2880_v33  ;;  %v2155_v46 = vmul.f32 %v2886_v36, %v2886_v36  ;;  %v2776_v47 = vpop.f32.mrb[46].mxu0  ;;  %v2775_v49 = vadd.f32 %v2774_v39, %v2773_v37 }
 0x157   : > { %v2161_v41 = vadd.f32 %v2160_v28, %v2154_v35  ;;  %v2140_v45 = vadd.f32 %v2886_v36, %v2139_v32  ;;  %v2777_v51 = vpop.f32.mrb[47].mxu0 }
 0x158   : > { %2633 = vst [vmem:[%s3489_s27 + $0x10] sm:$0xff] %v2625_v42   ;;  %v2778_v38 = vadd.f32 %v2777_v51, %v2776_v47  ;;  %v2876_v53 = vadd.f32 %v3481_v48, %v2775_v49 }
 0x159   : > { %v2162_v52 = vadd.f32 %v2161_v41, %v2155_v46 }
 0x15a   : > { %v2882_v40 = vadd.f32 %v3483_v50, %v2778_v38  ;;  %v2877_v54 = vadd.f32 %v2876_v53, %v2861_v1 }
 0x15c   : > { %v2883_v55 = vadd.f32 %v2882_v40, %v2862_v44  ;;  %v2141_v56 = vadd.f32 %v2877_v54, %v2140_v45  ;;  %v2156_v57 = vmul.f32 %v2877_v54, %v2877_v54 }
 0x15e   : > { %v2630_v58 = vpack.c.bf16 %v2883_v55, %v2877_v54  ;;  %v2157_v59 = vmul.f32 %v2883_v55, %v2883_v55  ;;  %v2163_v60 = vadd.f32 %v2162_v52, %v2156_v57  ;;  %v2142_v61 = vadd.f32 %v2883_v55, %v2141_v56 }
 0x160   : > { %2634 = vst [vmem:[%s3489_s27 + $0x18] sm:$0xff] %v2630_v58   ;;  %v2143_v62 = vrot.slane %v2142_v61, 4  ;;  %v2164_v63 = vadd.f32 %v2163_v60, %v2157_v59 }
 0x162   : > { %v2144_v0 = vadd.f32 %v2143_v62, %v2142_v61  ;;  %v2165_v2 = vrot.slane %v2164_v63, 4 }
 0x164   : > { %v2145_v3 = vrot.slane %v2144_v0, 2  ;;  %v2166_v4 = vadd.f32 %v2165_v2, %v2164_v63 }
 0x166   : > { %v2146_v48 = vadd.f32 %v2145_v3, %v2144_v0  ;;  %v2167_v5 = vrot.slane %v2166_v4, 2 }
 0x168   : > { %v2147_v50 = vrot.slane %v2146_v48, 1  ;;  %v2168_v1 = vadd.f32 %v2167_v5, %v2166_v4 }
 0x16a   : > { %v2148_v6 = vadd.f32 %v2147_v50, %v2146_v48  ;;  %v2169_v7 = vrot.slane %v2168_v1, 1 }
 0x16c   : > { %2149 = vst [vmem:[%s211_s30] sm:$0x1] %v2148_v6  ;;  %v2170_v44 = vadd.f32 %v2169_v7, %v2168_v1 }
 0x16e   : > { %2171 = vst [vmem:[%s214_s7] sm:$0x1] %v2170_v44 }
 0x16f PF: > { %s15_s15 = sadd.s32 1, %s3002_s15  }
 0x170   : > { %p12_p4 = scmp.ge.s32.totalorder %s15_s15, 4  }
 0x172   :  { %14 = sbr.rel (!%p12_p4) target bundleno = 1 (0x1), region = 86 }

</bundles_post_ra>
